<compile_context>
chip_gen: v6e
topology: v6e:2x2x1
jax: 0.10.0
libtpu: 0.0.40
codegen_flags: <defaults>
</compile_context>

<pallas_src>
import functools

import jax
import jax.numpy as jnp
from jax.experimental import pallas as pl
from jax.experimental.pallas import tpu as pltpu


# --------------------------------------------------------------------------- tiling helper
def _lane_tile(hw, c, batch, max_bytes=2 << 20, lane=128):
    """Tile length along the HW (lane) axis for (1, C, t) blocks.

    2 MiB blocks are safe on every generation (v5e scoped-VMEM default is only
    16 MiB and these kernels hold ~4 blocks live); raise max_bytes on v6e if
    desired.  Returned t is either the full HW (when HW <= 128) or a multiple
    of 128; partial last tiles are handled by the callers (cdiv grid + mask).
    """
    if hw <= lane:
        return hw                                     # full-extent block (< 128 ok)
    cap = max(lane, (max_bytes // (c * 4)) // lane * lane)
    if batch == 1:
        # keep >= 2 grid steps so both v7x TensorCores get work
        cap = min(cap, max(lane, (hw // 2) // lane * lane))
    return min(cap, pl.cdiv(hw, lane) * lane)


# --------------------------------------------------------------------------- kernel 1: global pools
def _gpool_kernel(x_ref, sum_ref, max_ref, *, hw, t, masked):
    """Accumulate per-channel sum & max over the spatial (lane) axis."""
    s = pl.program_id(1)

    @pl.when(s == 0)
    def _():
        sum_ref[...] = jnp.zeros_like(sum_ref)
        max_ref[...] = jnp.full(max_ref.shape, -jnp.inf, dtype=max_ref.dtype)

    x = x_ref[...].astype(jnp.float32)                # (1, C, t)
    if masked:                                        # partial last tile
        lane_ix = jax.lax.broadcasted_iota(jnp.int32, x.shape, 2)
        valid = (s * t + lane_ix) < hw
        xs = jnp.where(valid, x, 0.0)
        xm = jnp.where(valid, x, -jnp.inf)
    else:
        xs = xm = x
    sum_ref[...] += jnp.sum(xs, axis=2, keepdims=True)
    max_ref[...] = jnp.maximum(max_ref[...], jnp.max(xm, axis=2, keepdims=True))


def global_pool(x):
    """x: (B, C, HW) -> (sum, max), each (B, C, 1) f32."""
    B, C, HW = x.shape
    t = _lane_tile(HW, C, B)
    kernel = functools.partial(_gpool_kernel, hw=HW, t=t, masked=(HW % t != 0))
    return pl.pallas_call(
        kernel,
        out_shape=(jax.ShapeDtypeStruct((B, C, 1), jnp.float32),
                   jax.ShapeDtypeStruct((B, C, 1), jnp.float32)),
        grid_spec=pltpu.PrefetchScalarGridSpec(
            num_scalar_prefetch=0, grid=(B, pl.cdiv(HW, t)),
            in_specs=[pl.BlockSpec((1, C, t), lambda b, s: (b, 0, s))],
            out_specs=(pl.BlockSpec((1, C, 1), lambda b, s: (b, 0, 0)),
                       pl.BlockSpec((1, C, 1), lambda b, s: (b, 0, 0)))),
        compiler_params=pltpu.CompilerParams(
            dimension_semantics=("parallel", "arbitrary")),
    )(x)


# --------------------------------------------------------------------------- kernel 2: channel maps
def _ca_maps_kernel(x_ref, ca_ref, maps_ref, *, inv_c):
    """y = ca_gate * x (kept in-register only); emit the channel mean/max maps of
    y as a lane-dense (1, 2, t) block (mean in row 0, max in row 1).  The channel
    reduction runs over the sublane axis, so the XLU path stays short."""
    y = x_ref[...].astype(jnp.float32) * ca_ref[...]  # (1, C, t), gate lane-splat
    maps_ref[:, 0:1, :] = jnp.sum(y, axis=1, keepdims=True) * inv_c
    maps_ref[:, 1:2, :] = jnp.max(y, axis=1, keepdims=True)


def ca_maps(x, ca_gate):
    """x: (B, C, HW), ca_gate (sigmoid already applied): (B, C, 1) -> (B, 2, HW)."""
    B, C, HW = x.shape
    t = _lane_tile(HW, C, B)
    kernel = functools.partial(_ca_maps_kernel, inv_c=1.0 / C)
    return pl.pallas_call(
        kernel,
        out_shape=jax.ShapeDtypeStruct((B, 2, HW), jnp.float32),
        grid_spec=pltpu.PrefetchScalarGridSpec(
            num_scalar_prefetch=0, grid=(B, pl.cdiv(HW, t)),
            in_specs=[pl.BlockSpec((1, C, t), lambda b, s: (b, 0, s)),
                      pl.BlockSpec((1, C, 1), lambda b, s: (b, 0, 0))],
            out_specs=pl.BlockSpec((1, 2, t), lambda b, s: (b, 0, s))),
        compiler_params=pltpu.CompilerParams(
            dimension_semantics=("parallel", "parallel")),
    )(x, ca_gate)


# --------------------------------------------------------------------------- kernel 3: 7x7 spatial conv
def _sa_conv_kernel(w_ref, maps_ref, sa_ref, pad_ref, *, H, W):
    """7x7 'same' conv of the 2-channel (mean,max) map, then sigmoid.
    Halo padding is done in a VMEM scratch (no padded tensor in HBM); the
    lane-direction (dj) shifts are hoisted out of the 49-tap loop (14 shifts)."""
    pad_ref[...] = jnp.zeros_like(pad_ref)
    pad_ref[:, 3:3 + H, 3:3 + W] = maps_ref[0]        # (2, H, W) interior
    acc = jnp.zeros((H, W), jnp.float32)
    # TODO(synk): for very large H*W switch to a fori_loop / H-tiled grid to bound
    # vreg live ranges; fully unrolled 49 taps is fine at typical CBAM map sizes.
    for dj in range(7):
        a_dj = pad_ref[0, :, dj:dj + W]               # (H+6, W) lane shift hoisted
        m_dj = pad_ref[1, :, dj:dj + W]
        for di in range(7):
            k = di * 7 + dj
            acc = acc + w_ref[0, k] * a_dj[di:di + H, :] \
                      + w_ref[1, k] * m_dj[di:di + H, :]
    sa_ref[...] = jax.nn.sigmoid(acc)[None]


def sa_conv(maps, H, W, w_torch):
    """maps: (B, 2, HW) packed [mean, max]; w_torch: (1, 2, 7, 7) -> gate (B, H, W)."""
    B = maps.shape[0]
    m4 = maps.reshape(B, 2, H, W)                     # free (metadata-only) reshape
    w_flat = w_torch[0].reshape(2, 49).astype(jnp.float32)   # [mean taps; max taps]
    kernel = functools.partial(_sa_conv_kernel, H=H, W=W)
    return pl.pallas_call(
        kernel,
        out_shape=jax.ShapeDtypeStruct((B, H, W), jnp.float32),
        grid_spec=pltpu.PrefetchScalarGridSpec(
            num_scalar_prefetch=0, grid=(B,),
            in_specs=[pl.BlockSpec(memory_space=pltpu.MemorySpace.SMEM),
                      pl.BlockSpec((1, 2, H, W), lambda b: (b, 0, 0, 0))],
            out_specs=pl.BlockSpec((1, H, W), lambda b: (b, 0, 0)),
            scratch_shapes=[pltpu.VMEM((2, H + 6, W + 6), jnp.float32)]),
        compiler_params=pltpu.CompilerParams(dimension_semantics=("parallel",)),
    )(w_flat, m4)


# --------------------------------------------------------------------------- kernel 4: fused gating
def _gate_kernel(x_ref, ca_ref, sa_ref, o_ref):
    """out = x * sigmoid(ca) * sigmoid(sa).  Both gates arrive pre-sigmoided, so
    this is a pure two-multiply kernel (ca broadcasts over lanes, sa over
    sublanes); the intermediate y = ca*x never hits HBM."""
    o_ref[...] = (x_ref[...].astype(jnp.float32) * ca_ref[...]
                  * sa_ref[...]).astype(o_ref.dtype)


def gate_apply(x, ca_gate, sa_gate):
    """x: (B, C, HW), ca_gate: (B, C, 1), sa_gate: (B, 1, HW) -> (B, C, HW)."""
    B, C, HW = x.shape
    t = _lane_tile(HW, C, B)
    return pl.pallas_call(
        _gate_kernel,
        out_shape=jax.ShapeDtypeStruct((B, C, HW), x.dtype),
        grid_spec=pltpu.PrefetchScalarGridSpec(
            num_scalar_prefetch=0, grid=(B, pl.cdiv(HW, t)),
            in_specs=[pl.BlockSpec((1, C, t), lambda b, s: (b, 0, s)),
                      pl.BlockSpec((1, C, 1), lambda b, s: (b, 0, 0)),
                      pl.BlockSpec((1, 1, t), lambda b, s: (b, 0, s))],
            out_specs=pl.BlockSpec((1, C, t), lambda b, s: (b, 0, s))),
        compiler_params=pltpu.CompilerParams(
            dimension_semantics=("parallel", "parallel")),
    )(x, ca_gate, sa_gate)


# --------------------------------------------------------------------------- CBAM forward
def cbam_forward(x_nchw, p):
    """Matches torch CBAM: x = SpatialAttention(ChannelAttention(x)); NCHW in/out.
    No layout transposes: (B, C, H, W) <-> (B, C, HW) are free reshapes."""
    B, C, H, W = x_nchw.shape
    HW = H * W
    x = x_nchw.reshape(B, C, HW)

    # --- channel attention (pools in Pallas; tiny MLP + sigmoid as JAX glue) ----
    s, mx = global_pool(x)                            # (B, C, 1) f32 each
    avg_vec = s[:, :, 0] / float(HW)                  # (B, C)
    max_vec = mx[:, :, 0]
    w1 = p['ca_fc1'][:, :, 0, 0]                      # (C//r, C)  1x1 conv weights
    w2 = p['ca_fc2'][:, :, 0, 0]                      # (C, C//r)
    a = jnp.maximum(avg_vec @ w1.T, 0.0) @ w2.T
    m = jnp.maximum(max_vec @ w1.T, 0.0) @ w2.T
    ca_gate = jax.nn.sigmoid(a + m)[:, :, None]       # (B, C, 1), sigmoid once

    # --- spatial attention -------------------------------------------------------
    maps = ca_maps(x, ca_gate)                        # (B, 2, HW) maps of y = ca*x
    sa_gate = sa_conv(maps, H, W, p['sa_w'])          # (B, H, W), sigmoid applied

    # --- fused final gating ------------------------------------------------------
    out = gate_apply(x, ca_gate, sa_gate.reshape(B, 1, HW))
    return out.reshape(B, C, H, W)


# --------------------------------------------------------------------------- reference (pure JAX)
def cbam_reference(x_nchw, p):
    x = x_nchw.astype(jnp.float32)
    B, C, H, W = x.shape
    avg = jnp.mean(x, axis=(2, 3))
    mx = jnp.max(x, axis=(2, 3))
    w1 = p['ca_fc1'][:, :, 0, 0]
    w2 = p['ca_fc2'][:, :, 0, 0]
    a = jnp.maximum(avg @ w1.T, 0.0) @ w2.T
    m = jnp.maximum(mx @ w1.T, 0.0) @ w2.T
    y = jax.nn.sigmoid(a + m)[:, :, None, None] * x
    mean_c = jnp.mean(y, axis=1)
    max_c = jnp.max(y, axis=1)
    pads = ((0, 0), (3, 3), (3, 3))
    mean_p = jnp.pad(mean_c, pads)
    max_p = jnp.pad(max_c, pads)
    w = p['sa_w'][0]
    sa = jnp.zeros((B, H, W), jnp.float32)
    for di in range(7):
        for dj in range(7):
            sa = sa + (w[0, di, dj] * mean_p[:, di:di + H, dj:dj + W]
                       + w[1, di, dj] * max_p[:, di:di + H, dj:dj + W])
    return jax.nn.sigmoid(sa)[:, None] * y


# --------------------------------------------------------------------------- params
def init_params(key, C, reduction=16):
    k1, k2, k3 = jax.random.split(key, 3)
    cr = max(C // reduction, 1)
    return dict(
        ca_fc1=jax.random.normal(k1, (cr, C, 1, 1), jnp.float32) * (C ** -0.5),
        ca_fc2=jax.random.normal(k2, (C, cr, 1, 1), jnp.float32) * (cr ** -0.5),
        sa_w=jax.random.normal(k3, (1, 2, 7, 7), jnp.float32) * (98.0 ** -0.5),
    )


# --------------------------------------------------------------------------- main
if __name__ == "__main__":
    key = jax.random.PRNGKey(0)
    k_x, k_p = jax.random.split(key)

    B, C, H, W = 2, 64, 16, 16          # small shapes; reduction=16 => C//16 = 4
    x = jax.random.normal(k_x, (B, C, H, W), jnp.float32)
    params = init_params(k_p, C)

    fwd = jax.jit(cbam_forward)
    out = jax.block_until_ready(fwd(x, params))
    assert out.shape == (B, C, H, W)

    ref = jax.block_until_ready(cbam_reference(x, params))
    assert jnp.allclose(out, ref, atol=1e-3, rtol=1e-3), "mismatch vs JAX reference"

    print("KERNEL_OK")
</pallas_src>

<mosaic_0001>
module attributes {stable_mosaic.version = 11 : i64} {
  func.func @_gpool_kernel(%arg0: i32, %arg1: i32, %arg2: memref<1x64x256xf32, #tpu.memory_space<vmem>>, %arg3: memref<1x64x1xf32, #tpu.memory_space<vmem>>, %arg4: memref<1x64x1xf32, #tpu.memory_space<vmem>>) attributes {dimension_semantics = [#tpu.dimension_semantics<parallel>, #tpu.dimension_semantics<arbitrary>], iteration_bounds = array<i64: 2, 1>, scalar_prefetch = 0 : i64, scratch_operands = 0 : i64, tpu.core_type = #tpu.core_type<tc>, window_params = [{transform_indices = @transform_0, window_bounds = array<i64: 1, 64, 256>}, {transform_indices = @transform_1, window_bounds = array<i64: 1, 64, 1>}, {transform_indices = @transform_2, window_bounds = array<i64: 1, 64, 1>}]} {
    %c0_i32 = arith.constant 0 : i32
    %0 = arith.cmpi eq, %arg1, %c0_i32 : i32
    %1 = arith.extui %0 : i1 to i32
    %c0_i32_0 = arith.constant 0 : i32
    %2 = arith.cmpi ne, %1, %c0_i32_0 : i32
    scf.if %2 {
      %cst_16 = arith.constant 0.000000e+00 : f32
      %14 = vector.broadcast %cst_16 : f32 to vector<1x64x1xf32>
      %c0_17 = arith.constant 0 : index
      %c0_18 = arith.constant 0 : index
      %c0_19 = arith.constant 0 : index
      %15 = vector.load %arg3[%c0_17, %c0_18, %c0_19] : memref<1x64x1xf32, #tpu.memory_space<vmem>>, vector<1x64x1xf32>
      tpu.vector_store %arg3[%c0_17, %c0_18, %c0_19], %14 {strides = array<i32>} : memref<1x64x1xf32, #tpu.memory_space<vmem>>, vector<1x64x1xf32>,
      %cst_20 = arith.constant 0xFF800000 : f32
      %16 = vector.broadcast %cst_20 : f32 to vector<1x64x1xf32>
      %c0_21 = arith.constant 0 : index
      %c0_22 = arith.constant 0 : index
      %c0_23 = arith.constant 0 : index
      %17 = vector.load %arg4[%c0_21, %c0_22, %c0_23] : memref<1x64x1xf32, #tpu.memory_space<vmem>>, vector<1x64x1xf32>
      tpu.vector_store %arg4[%c0_21, %c0_22, %c0_23], %16 {strides = array<i32>} : memref<1x64x1xf32, #tpu.memory_space<vmem>>, vector<1x64x1xf32>,
    } else {
    }
    %c0 = arith.constant 0 : index
    %c0_1 = arith.constant 0 : index
    %c0_2 = arith.constant 0 : index
    %3 = vector.load %arg2[%c0, %c0_1, %c0_2] : memref<1x64x256xf32, #tpu.memory_space<vmem>>, vector<1x64x256xf32>
    %c0_3 = arith.constant 0 : index
    %c0_4 = arith.constant 0 : index
    %c0_5 = arith.constant 0 : index
    %4 = vector.load %arg3[%c0_3, %c0_4, %c0_5] : memref<1x64x1xf32, #tpu.memory_space<vmem>>, vector<1x64x1xf32>
    %cst = arith.constant dense<0.000000e+00> : vector<1x64xf32>
    %5 = vector.multi_reduction <add>, %3, %cst [2] : vector<1x64x256xf32> to vector<1x64xf32>
    %6 = vector.shape_cast %5 : vector<1x64xf32> to vector<1x64x1xf32>
    %7 = arith.addf %4, %6 : vector<1x64x1xf32>
    %c0_6 = arith.constant 0 : index
    %c0_7 = arith.constant 0 : index
    %c0_8 = arith.constant 0 : index
    %8 = vector.load %arg3[%c0_6, %c0_7, %c0_8] : memref<1x64x1xf32, #tpu.memory_space<vmem>>, vector<1x64x1xf32>
    tpu.vector_store %arg3[%c0_6, %c0_7, %c0_8], %7 {strides = array<i32>} : memref<1x64x1xf32, #tpu.memory_space<vmem>>, vector<1x64x1xf32>,
    %c0_9 = arith.constant 0 : index
    %c0_10 = arith.constant 0 : index
    %c0_11 = arith.constant 0 : index
    %9 = vector.load %arg4[%c0_9, %c0_10, %c0_11] : memref<1x64x1xf32, #tpu.memory_space<vmem>>, vector<1x64x1xf32>
    %cst_12 = arith.constant dense<0xFF800000> : vector<1x64xf32>
    %10 = vector.multi_reduction <maximumf>, %3, %cst_12 [2] : vector<1x64x256xf32> to vector<1x64xf32>
    %11 = vector.shape_cast %10 : vector<1x64xf32> to vector<1x64x1xf32>
    %12 = arith.maximumf %9, %11 : vector<1x64x1xf32>
    %c0_13 = arith.constant 0 : index
    %c0_14 = arith.constant 0 : index
    %c0_15 = arith.constant 0 : index
    %13 = vector.load %arg4[%c0_13, %c0_14, %c0_15] : memref<1x64x1xf32, #tpu.memory_space<vmem>>, vector<1x64x1xf32>
    tpu.vector_store %arg4[%c0_13, %c0_14, %c0_15], %12 {strides = array<i32>} : memref<1x64x1xf32, #tpu.memory_space<vmem>>, vector<1x64x1xf32>,
    return
  }
  func.func @transform_0(%arg0: i32, %arg1: i32) -> (i32, i32, i32) {
    %c0_i32 = arith.constant 0 : i32
    %c0_i32_0 = arith.constant 0 : i32
    return %arg0, %c0_i32, %arg1 : i32, i32, i32
  }
  func.func @transform_1(%arg0: i32, %arg1: i32) -> (i32, i32, i32) {
    %c0_i32 = arith.constant 0 : i32
    %c0_i32_0 = arith.constant 0 : i32
    %c0_i32_1 = arith.constant 0 : i32
    return %arg0, %c0_i32, %c0_i32_0 : i32, i32, i32
  }
  func.func @transform_2(%arg0: i32, %arg1: i32) -> (i32, i32, i32) {
    %c0_i32 = arith.constant 0 : i32
    %c0_i32_0 = arith.constant 0 : i32
    %c0_i32_1 = arith.constant 0 : i32
    return %arg0, %c0_i32, %c0_i32_0 : i32, i32, i32
  }
}

module attributes {stable_mosaic.version = 11 : i64} {
  func.func @_ca_maps_kernel(%arg0: i32, %arg1: i32, %arg2: memref<1x64x256xf32, #tpu.memory_space<vmem>>, %arg3: memref<1x64x1xf32, #tpu.memory_space<vmem>>, %arg4: memref<1x2x256xf32, #tpu.memory_space<vmem>>) attributes {dimension_semantics = [#tpu.dimension_semantics<parallel>, #tpu.dimension_semantics<parallel>], iteration_bounds = array<i64: 2, 1>, scalar_prefetch = 0 : i64, scratch_operands = 0 : i64, tpu.core_type = #tpu.core_type<tc>, window_params = [{transform_indices = @transform_0, window_bounds = array<i64: 1, 64, 256>}, {transform_indices = @transform_1, window_bounds = array<i64: 1, 64, 1>}, {transform_indices = @transform_2, window_bounds = array<i64: 1, 2, 256>}]} {
    %c0 = arith.constant 0 : index
    %c0_0 = arith.constant 0 : index
    %c0_1 = arith.constant 0 : index
    %0 = vector.load %arg2[%c0, %c0_0, %c0_1] : memref<1x64x256xf32, #tpu.memory_space<vmem>>, vector<1x64x256xf32>
    %c0_2 = arith.constant 0 : index
    %c0_3 = arith.constant 0 : index
    %c0_4 = arith.constant 0 : index
    %1 = vector.load %arg3[%c0_2, %c0_3, %c0_4] : memref<1x64x1xf32, #tpu.memory_space<vmem>>, vector<1x64x1xf32>
    %2 = vector.broadcast %1 : vector<1x64x1xf32> to vector<1x64x256xf32>
    %3 = arith.mulf %0, %2 : vector<1x64x256xf32>
    %cst = arith.constant dense<0.000000e+00> : vector<1x256xf32>
    %4 = vector.multi_reduction <add>, %3, %cst [1] : vector<1x64x256xf32> to vector<1x256xf32>
    %5 = vector.shape_cast %4 : vector<1x256xf32> to vector<1x1x256xf32>
    %cst_5 = arith.constant 1.562500e-02 : f32
    %6 = vector.broadcast %cst_5 : f32 to vector<1x1x256xf32>
    %7 = arith.mulf %5, %6 : vector<1x1x256xf32>
    %c0_6 = arith.constant 0 : index
    %c0_7 = arith.constant 0 : index
    %c0_8 = arith.constant 0 : index
    %8 = vector.load %arg4[%c0_6, %c0_7, %c0_8] : memref<1x2x256xf32, #tpu.memory_space<vmem>>, vector<1x1x256xf32>
    tpu.vector_store %arg4[%c0_6, %c0_7, %c0_8], %7 {strides = array<i32>} : memref<1x2x256xf32, #tpu.memory_space<vmem>>, vector<1x1x256xf32>,
    %cst_9 = arith.constant dense<0xFF800000> : vector<1x256xf32>
    %9 = vector.multi_reduction <maximumf>, %3, %cst_9 [1] : vector<1x64x256xf32> to vector<1x256xf32>
    %10 = vector.shape_cast %9 : vector<1x256xf32> to vector<1x1x256xf32>
    %c0_10 = arith.constant 0 : index
    %c1 = arith.constant 1 : index
    %c0_11 = arith.constant 0 : index
    %11 = vector.load %arg4[%c0_10, %c1, %c0_11] : memref<1x2x256xf32, #tpu.memory_space<vmem>>, vector<1x1x256xf32>
    tpu.vector_store %arg4[%c0_10, %c1, %c0_11], %10 {strides = array<i32>} : memref<1x2x256xf32, #tpu.memory_space<vmem>>, vector<1x1x256xf32>,
    return
  }
  func.func @transform_0(%arg0: i32, %arg1: i32) -> (i32, i32, i32) {
    %c0_i32 = arith.constant 0 : i32
    %c0_i32_0 = arith.constant 0 : i32
    return %arg0, %c0_i32, %arg1 : i32, i32, i32
  }
  func.func @transform_1(%arg0: i32, %arg1: i32) -> (i32, i32, i32) {
    %c0_i32 = arith.constant 0 : i32
    %c0_i32_0 = arith.constant 0 : i32
    %c0_i32_1 = arith.constant 0 : i32
    return %arg0, %c0_i32, %c0_i32_0 : i32, i32, i32
  }
  func.func @transform_2(%arg0: i32, %arg1: i32) -> (i32, i32, i32) {
    %c0_i32 = arith.constant 0 : i32
    %c0_i32_0 = arith.constant 0 : i32
    return %arg0, %c0_i32, %arg1 : i32, i32, i32
  }
}

module attributes {stable_mosaic.version = 11 : i64} {
  func.func @_gate_kernel(%arg0: i32, %arg1: i32, %arg2: memref<1x64x256xf32, #tpu.memory_space<vmem>>, %arg3: memref<1x64x1xf32, #tpu.memory_space<vmem>>, %arg4: memref<1x1x256xf32, #tpu.memory_space<vmem>>, %arg5: memref<1x64x256xf32, #tpu.memory_space<vmem>>) attributes {dimension_semantics = [#tpu.dimension_semantics<parallel>, #tpu.dimension_semantics<parallel>], iteration_bounds = array<i64: 2, 1>, scalar_prefetch = 0 : i64, scratch_operands = 0 : i64, tpu.core_type = #tpu.core_type<tc>, window_params = [{transform_indices = @transform_0, window_bounds = array<i64: 1, 64, 256>}, {transform_indices = @transform_1, window_bounds = array<i64: 1, 64, 1>}, {transform_indices = @transform_2, window_bounds = array<i64: 1, 1, 256>}, {transform_indices = @transform_3, window_bounds = array<i64: 1, 64, 256>}]} {
    %c0 = arith.constant 0 : index
    %c0_0 = arith.constant 0 : index
    %c0_1 = arith.constant 0 : index
    %0 = vector.load %arg2[%c0, %c0_0, %c0_1] : memref<1x64x256xf32, #tpu.memory_space<vmem>>, vector<1x64x256xf32>
    %c0_2 = arith.constant 0 : index
    %c0_3 = arith.constant 0 : index
    %c0_4 = arith.constant 0 : index
    %1 = vector.load %arg3[%c0_2, %c0_3, %c0_4] : memref<1x64x1xf32, #tpu.memory_space<vmem>>, vector<1x64x1xf32>
    %2 = vector.broadcast %1 : vector<1x64x1xf32> to vector<1x64x256xf32>
    %3 = arith.mulf %0, %2 : vector<1x64x256xf32>
    %c0_5 = arith.constant 0 : index
    %c0_6 = arith.constant 0 : index
    %c0_7 = arith.constant 0 : index
    %4 = vector.load %arg4[%c0_5, %c0_6, %c0_7] : memref<1x1x256xf32, #tpu.memory_space<vmem>>, vector<1x1x256xf32>
    %5 = vector.broadcast %4 : vector<1x1x256xf32> to vector<1x64x256xf32>
    %6 = arith.mulf %3, %5 : vector<1x64x256xf32>
    %c0_8 = arith.constant 0 : index
    %c0_9 = arith.constant 0 : index
    %c0_10 = arith.constant 0 : index
    %7 = vector.load %arg5[%c0_8, %c0_9, %c0_10] : memref<1x64x256xf32, #tpu.memory_space<vmem>>, vector<1x64x256xf32>
    tpu.vector_store %arg5[%c0_8, %c0_9, %c0_10], %6 {strides = array<i32>} : memref<1x64x256xf32, #tpu.memory_space<vmem>>, vector<1x64x256xf32>,
    return
  }
  func.func @transform_0(%arg0: i32, %arg1: i32) -> (i32, i32, i32) {
    %c0_i32 = arith.constant 0 : i32
    %c0_i32_0 = arith.constant 0 : i32
    return %arg0, %c0_i32, %arg1 : i32, i32, i32
  }
  func.func @transform_1(%arg0: i32, %arg1: i32) -> (i32, i32, i32) {
    %c0_i32 = arith.constant 0 : i32
    %c0_i32_0 = arith.constant 0 : i32
    %c0_i32_1 = arith.constant 0 : i32
    return %arg0, %c0_i32, %c0_i32_0 : i32, i32, i32
  }
  func.func @transform_2(%arg0: i32, %arg1: i32) -> (i32, i32, i32) {
    %c0_i32 = arith.constant 0 : i32
    %c0_i32_0 = arith.constant 0 : i32
    return %arg0, %c0_i32, %arg1 : i32, i32, i32
  }
  func.func @transform_3(%arg0: i32, %arg1: i32) -> (i32, i32, i32) {
    %c0_i32 = arith.constant 0 : i32
    %c0_i32_0 = arith.constant 0 : i32
    return %arg0, %c0_i32, %arg1 : i32, i32, i32
  }
}

module attributes {stable_mosaic.version = 11 : i64} {
  func.func @_sa_conv_kernel(%arg0: i32, %arg1: memref<2x49xf32, #tpu.memory_space<smem>>, %arg2: memref<1x2x16x16xf32, #tpu.memory_space<vmem>>, %arg3: memref<1x16x16xf32, #tpu.memory_space<vmem>>, %arg4: memref<2x22x22xf32, #tpu.memory_space<vmem>>) attributes {dimension_semantics = [#tpu.dimension_semantics<parallel>], iteration_bounds = array<i64: 2>, scalar_prefetch = 0 : i64, scratch_operands = 1 : i64, tpu.core_type = #tpu.core_type<tc>, window_params = [{transform_indices = @transform_0, window_bounds = array<i64: 2, 49>}, {transform_indices = @transform_1, window_bounds = array<i64: 1, 2, 16, 16>}, {transform_indices = @transform_2, window_bounds = array<i64: 1, 16, 16>}]} {
    %cst = arith.constant 0.000000e+00 : f32
    %0 = vector.broadcast %cst : f32 to vector<2x22x22xf32>
    %c0 = arith.constant 0 : index
    %c0_0 = arith.constant 0 : index
    %c0_1 = arith.constant 0 : index
    %1 = vector.load %arg4[%c0, %c0_0, %c0_1] : memref<2x22x22xf32, #tpu.memory_space<vmem>>, vector<2x22x22xf32>
    tpu.vector_store %arg4[%c0, %c0_0, %c0_1], %0 {strides = array<i32>} : memref<2x22x22xf32, #tpu.memory_space<vmem>>, vector<2x22x22xf32>,
    %c0_2 = arith.constant 0 : index
    %c0_3 = arith.constant 0 : index
    %c0_4 = arith.constant 0 : index
    %c0_5 = arith.constant 0 : index
    %2 = vector.load %arg2[%c0_2, %c0_3, %c0_4, %c0_5] : memref<1x2x16x16xf32, #tpu.memory_space<vmem>>, vector<1x2x16x16xf32>
    %3 = vector.shape_cast %2 : vector<1x2x16x16xf32> to vector<2x16x16xf32>
    %c0_6 = arith.constant 0 : index
    %c3 = arith.constant 3 : index
    %c3_7 = arith.constant 3 : index
    %4 = vector.load %arg4[%c0_6, %c3, %c3_7] : memref<2x22x22xf32, #tpu.memory_space<vmem>>, vector<2x16x16xf32>
    tpu.vector_store %arg4[%c0_6, %c3, %c3_7], %3 {strides = array<i32>} : memref<2x22x22xf32, #tpu.memory_space<vmem>>, vector<2x16x16xf32>,
    %cst_8 = arith.constant 0.000000e+00 : f32
    %5 = vector.broadcast %cst_8 : f32 to vector<16x16xf32>
    %c0_9 = arith.constant 0 : index
    %c0_10 = arith.constant 0 : index
    %c0_11 = arith.constant 0 : index
    %6 = vector.load %arg4[%c0_9, %c0_10, %c0_11] : memref<2x22x22xf32, #tpu.memory_space<vmem>>, vector<1x22x16xf32>
    %7 = vector.shape_cast %6 : vector<1x22x16xf32> to vector<22x16xf32>
    %c1 = arith.constant 1 : index
    %c0_12 = arith.constant 0 : index
    %c0_13 = arith.constant 0 : index
    %8 = vector.load %arg4[%c1, %c0_12, %c0_13] : memref<2x22x22xf32, #tpu.memory_space<vmem>>, vector<1x22x16xf32>
    %9 = vector.shape_cast %8 : vector<1x22x16xf32> to vector<22x16xf32>
    %c0_14 = arith.constant 0 : index
    %c0_15 = arith.constant 0 : index
    %10 = memref.load %arg1[%c0_14, %c0_15] : memref<2x49xf32, #tpu.memory_space<smem>>
    %11 = vector.extract_strided_slice %7 {offsets = [0, 0], sizes = [16, 16], strides = [1, 1]} : vector<22x16xf32> to vector<16x16xf32>
    %12 = vector.broadcast %10 : f32 to vector<16x16xf32>
    %13 = arith.mulf %12, %11 : vector<16x16xf32>
    %14 = arith.addf %5, %13 : vector<16x16xf32>
    %c1_16 = arith.constant 1 : index
    %c0_17 = arith.constant 0 : index
    %15 = memref.load %arg1[%c1_16, %c0_17] : memref<2x49xf32, #tpu.memory_space<smem>>
    %16 = vector.extract_strided_slice %9 {offsets = [0, 0], sizes = [16, 16], strides = [1, 1]} : vector<22x16xf32> to vector<16x16xf32>
    %17 = vector.broadcast %15 : f32 to vector<16x16xf32>
    %18 = arith.mulf %17, %16 : vector<16x16xf32>
    %19 = arith.addf %14, %18 : vector<16x16xf32>
    %c0_18 = arith.constant 0 : index
    %c7 = arith.constant 7 : index
    %20 = memref.load %arg1[%c0_18, %c7] : memref<2x49xf32, #tpu.memory_space<smem>>
    %21 = vector.extract_strided_slice %7 {offsets = [1, 0], sizes = [16, 16], strides = [1, 1]} : vector<22x16xf32> to vector<16x16xf32>
    %22 = vector.broadcast %20 : f32 to vector<16x16xf32>
    %23 = arith.mulf %22, %21 : vector<16x16xf32>
    %24 = arith.addf %19, %23 : vector<16x16xf32>
    %c1_19 = arith.constant 1 : index
    %c7_20 = arith.constant 7 : index
    %25 = memref.load %arg1[%c1_19, %c7_20] : memref<2x49xf32, #tpu.memory_space<smem>>
    %26 = vector.extract_strided_slice %9 {offsets = [1, 0], sizes = [16, 16], strides = [1, 1]} : vector<22x16xf32> to vector<16x16xf32>
    %27 = vector.broadcast %25 : f32 to vector<16x16xf32>
    %28 = arith.mulf %27, %26 : vector<16x16xf32>
    %29 = arith.addf %24, %28 : vector<16x16xf32>
    %c0_21 = arith.constant 0 : index
    %c14 = arith.constant 14 : index
    %30 = memref.load %arg1[%c0_21, %c14] : memref<2x49xf32, #tpu.memory_space<smem>>
    %31 = vector.extract_strided_slice %7 {offsets = [2, 0], sizes = [16, 16], strides = [1, 1]} : vector<22x16xf32> to vector<16x16xf32>
    %32 = vector.broadcast %30 : f32 to vector<16x16xf32>
    %33 = arith.mulf %32, %31 : vector<16x16xf32>
    %34 = arith.addf %29, %33 : vector<16x16xf32>
    %c1_22 = arith.constant 1 : index
    %c14_23 = arith.constant 14 : index
    %35 = memref.load %arg1[%c1_22, %c14_23] : memref<2x49xf32, #tpu.memory_space<smem>>
    %36 = vector.extract_strided_slice %9 {offsets = [2, 0], sizes = [16, 16], strides = [1, 1]} : vector<22x16xf32> to vector<16x16xf32>
    %37 = vector.broadcast %35 : f32 to vector<16x16xf32>
    %38 = arith.mulf %37, %36 : vector<16x16xf32>
    %39 = arith.addf %34, %38 : vector<16x16xf32>
    %c0_24 = arith.constant 0 : index
    %c21 = arith.constant 21 : index
    %40 = memref.load %arg1[%c0_24, %c21] : memref<2x49xf32, #tpu.memory_space<smem>>
    %41 = vector.extract_strided_slice %7 {offsets = [3, 0], sizes = [16, 16], strides = [1, 1]} : vector<22x16xf32> to vector<16x16xf32>
    %42 = vector.broadcast %40 : f32 to vector<16x16xf32>
    %43 = arith.mulf %42, %41 : vector<16x16xf32>
    %44 = arith.addf %39, %43 : vector<16x16xf32>
    %c1_25 = arith.constant 1 : index
    %c21_26 = arith.constant 21 : index
    %45 = memref.load %arg1[%c1_25, %c21_26] : memref<2x49xf32, #tpu.memory_space<smem>>
    %46 = vector.extract_strided_slice %9 {offsets = [3, 0], sizes = [16, 16], strides = [1, 1]} : vector<22x16xf32> to vector<16x16xf32>
    %47 = vector.broadcast %45 : f32 to vector<16x16xf32>
    %48 = arith.mulf %47, %46 : vector<16x16xf32>
    %49 = arith.addf %44, %48 : vector<16x16xf32>
    %c0_27 = arith.constant 0 : index
    %c28 = arith.constant 28 : index
    %50 = memref.load %arg1[%c0_27, %c28] : memref<2x49xf32, #tpu.memory_space<smem>>
    %51 = vector.extract_strided_slice %7 {offsets = [4, 0], sizes = [16, 16], strides = [1, 1]} : vector<22x16xf32> to vector<16x16xf32>
    %52 = vector.broadcast %50 : f32 to vector<16x16xf32>
    %53 = arith.mulf %52, %51 : vector<16x16xf32>
    %54 = arith.addf %49, %53 : vector<16x16xf32>
    %c1_28 = arith.constant 1 : index
    %c28_29 = arith.constant 28 : index
    %55 = memref.load %arg1[%c1_28, %c28_29] : memref<2x49xf32, #tpu.memory_space<smem>>
    %56 = vector.extract_strided_slice %9 {offsets = [4, 0], sizes = [16, 16], strides = [1, 1]} : vector<22x16xf32> to vector<16x16xf32>
    %57 = vector.broadcast %55 : f32 to vector<16x16xf32>
    %58 = arith.mulf %57, %56 : vector<16x16xf32>
    %59 = arith.addf %54, %58 : vector<16x16xf32>
    %c0_30 = arith.constant 0 : index
    %c35 = arith.constant 35 : index
    %60 = memref.load %arg1[%c0_30, %c35] : memref<2x49xf32, #tpu.memory_space<smem>>
    %61 = vector.extract_strided_slice %7 {offsets = [5, 0], sizes = [16, 16], strides = [1, 1]} : vector<22x16xf32> to vector<16x16xf32>
    %62 = vector.broadcast %60 : f32 to vector<16x16xf32>
    %63 = arith.mulf %62, %61 : vector<16x16xf32>
    %64 = arith.addf %59, %63 : vector<16x16xf32>
    %c1_31 = arith.constant 1 : index
    %c35_32 = arith.constant 35 : index
    %65 = memref.load %arg1[%c1_31, %c35_32] : memref<2x49xf32, #tpu.memory_space<smem>>
    %66 = vector.extract_strided_slice %9 {offsets = [5, 0], sizes = [16, 16], strides = [1, 1]} : vector<22x16xf32> to vector<16x16xf32>
    %67 = vector.broadcast %65 : f32 to vector<16x16xf32>
    %68 = arith.mulf %67, %66 : vector<16x16xf32>
    %69 = arith.addf %64, %68 : vector<16x16xf32>
    %c0_33 = arith.constant 0 : index
    %c42 = arith.constant 42 : index
    %70 = memref.load %arg1[%c0_33, %c42] : memref<2x49xf32, #tpu.memory_space<smem>>
    %71 = vector.extract_strided_slice %7 {offsets = [6, 0], sizes = [16, 16], strides = [1, 1]} : vector<22x16xf32> to vector<16x16xf32>
    %72 = vector.broadcast %70 : f32 to vector<16x16xf32>
    %73 = arith.mulf %72, %71 : vector<16x16xf32>
    %74 = arith.addf %69, %73 : vector<16x16xf32>
    %c1_34 = arith.constant 1 : index
    %c42_35 = arith.constant 42 : index
    %75 = memref.load %arg1[%c1_34, %c42_35] : memref<2x49xf32, #tpu.memory_space<smem>>
    %76 = vector.extract_strided_slice %9 {offsets = [6, 0], sizes = [16, 16], strides = [1, 1]} : vector<22x16xf32> to vector<16x16xf32>
    %77 = vector.broadcast %75 : f32 to vector<16x16xf32>
    %78 = arith.mulf %77, %76 : vector<16x16xf32>
    %79 = arith.addf %74, %78 : vector<16x16xf32>
    %c0_36 = arith.constant 0 : index
    %c0_37 = arith.constant 0 : index
    %c1_38 = arith.constant 1 : index
    %80 = vector.load %arg4[%c0_36, %c0_37, %c1_38] : memref<2x22x22xf32, #tpu.memory_space<vmem>>, vector<1x22x16xf32>
    %81 = vector.shape_cast %80 : vector<1x22x16xf32> to vector<22x16xf32>
    %c1_39 = arith.constant 1 : index
    %c0_40 = arith.constant 0 : index
    %c1_41 = arith.constant 1 : index
    %82 = vector.load %arg4[%c1_39, %c0_40, %c1_41] : memref<2x22x22xf32, #tpu.memory_space<vmem>>, vector<1x22x16xf32>
    %83 = vector.shape_cast %82 : vector<1x22x16xf32> to vector<22x16xf32>
    %c0_42 = arith.constant 0 : index
    %c1_43 = arith.constant 1 : index
    %84 = memref.load %arg1[%c0_42, %c1_43] : memref<2x49xf32, #tpu.memory_space<smem>>
    %85 = vector.extract_strided_slice %81 {offsets = [0, 0], sizes = [16, 16], strides = [1, 1]} : vector<22x16xf32> to vector<16x16xf32>
    %86 = vector.broadcast %84 : f32 to vector<16x16xf32>
    %87 = arith.mulf %86, %85 : vector<16x16xf32>
    %88 = arith.addf %79, %87 : vector<16x16xf32>
    %c1_44 = arith.constant 1 : index
    %c1_45 = arith.constant 1 : index
    %89 = memref.load %arg1[%c1_44, %c1_45] : memref<2x49xf32, #tpu.memory_space<smem>>
    %90 = vector.extract_strided_slice %83 {offsets = [0, 0], sizes = [16, 16], strides = [1, 1]} : vector<22x16xf32> to vector<16x16xf32>
    %91 = vector.broadcast %89 : f32 to vector<16x16xf32>
    %92 = arith.mulf %91, %90 : vector<16x16xf32>
    %93 = arith.addf %88, %92 : vector<16x16xf32>
    %c0_46 = arith.constant 0 : index
    %c8 = arith.constant 8 : index
    %94 = memref.load %arg1[%c0_46, %c8] : memref<2x49xf32, #tpu.memory_space<smem>>
    %95 = vector.extract_strided_slice %81 {offsets = [1, 0], sizes = [16, 16], strides = [1, 1]} : vector<22x16xf32> to vector<16x16xf32>
    %96 = vector.broadcast %94 : f32 to vector<16x16xf32>
    %97 = arith.mulf %96, %95 : vector<16x16xf32>
    %98 = arith.addf %93, %97 : vector<16x16xf32>
    %c1_47 = arith.constant 1 : index
    %c8_48 = arith.constant 8 : index
    %99 = memref.load %arg1[%c1_47, %c8_48] : memref<2x49xf32, #tpu.memory_space<smem>>
    %100 = vector.extract_strided_slice %83 {offsets = [1, 0], sizes = [16, 16], strides = [1, 1]} : vector<22x16xf32> to vector<16x16xf32>
    %101 = vector.broadcast %99 : f32 to vector<16x16xf32>
    %102 = arith.mulf %101, %100 : vector<16x16xf32>
    %103 = arith.addf %98, %102 : vector<16x16xf32>
    %c0_49 = arith.constant 0 : index
    %c15 = arith.constant 15 : index
    %104 = memref.load %arg1[%c0_49, %c15] : memref<2x49xf32, #tpu.memory_space<smem>>
    %105 = vector.extract_strided_slice %81 {offsets = [2, 0], sizes = [16, 16], strides = [1, 1]} : vector<22x16xf32> to vector<16x16xf32>
    %106 = vector.broadcast %104 : f32 to vector<16x16xf32>
    %107 = arith.mulf %106, %105 : vector<16x16xf32>
    %108 = arith.addf %103, %107 : vector<16x16xf32>
    %c1_50 = arith.constant 1 : index
    %c15_51 = arith.constant 15 : index
    %109 = memref.load %arg1[%c1_50, %c15_51] : memref<2x49xf32, #tpu.memory_space<smem>>
    %110 = vector.extract_strided_slice %83 {offsets = [2, 0], sizes = [16, 16], strides = [1, 1]} : vector<22x16xf32> to vector<16x16xf32>
    %111 = vector.broadcast %109 : f32 to vector<16x16xf32>
    %112 = arith.mulf %111, %110 : vector<16x16xf32>
    %113 = arith.addf %108, %112 : vector<16x16xf32>
    %c0_52 = arith.constant 0 : index
    %c22 = arith.constant 22 : index
    %114 = memref.load %arg1[%c0_52, %c22] : memref<2x49xf32, #tpu.memory_space<smem>>
    %115 = vector.extract_strided_slice %81 {offsets = [3, 0], sizes = [16, 16], strides = [1, 1]} : vector<22x16xf32> to vector<16x16xf32>
    %116 = vector.broadcast %114 : f32 to vector<16x16xf32>
    %117 = arith.mulf %116, %115 : vector<16x16xf32>
    %118 = arith.addf %113, %117 : vector<16x16xf32>
    %c1_53 = arith.constant 1 : index
    %c22_54 = arith.constant 22 : index
    %119 = memref.load %arg1[%c1_53, %c22_54] : memref<2x49xf32, #tpu.memory_space<smem>>
    %120 = vector.extract_strided_slice %83 {offsets = [3, 0], sizes = [16, 16], strides = [1, 1]} : vector<22x16xf32> to vector<16x16xf32>
    %121 = vector.broadcast %119 : f32 to vector<16x16xf32>
    %122 = arith.mulf %121, %120 : vector<16x16xf32>
    %123 = arith.addf %118, %122 : vector<16x16xf32>
    %c0_55 = arith.constant 0 : index
    %c29 = arith.constant 29 : index
    %124 = memref.load %arg1[%c0_55, %c29] : memref<2x49xf32, #tpu.memory_space<smem>>
    %125 = vector.extract_strided_slice %81 {offsets = [4, 0], sizes = [16, 16], strides = [1, 1]} : vector<22x16xf32> to vector<16x16xf32>
    %126 = vector.broadcast %124 : f32 to vector<16x16xf32>
    %127 = arith.mulf %126, %125 : vector<16x16xf32>
    %128 = arith.addf %123, %127 : vector<16x16xf32>
    %c1_56 = arith.constant 1 : index
    %c29_57 = arith.constant 29 : index
    %129 = memref.load %arg1[%c1_56, %c29_57] : memref<2x49xf32, #tpu.memory_space<smem>>
    %130 = vector.extract_strided_slice %83 {offsets = [4, 0], sizes = [16, 16], strides = [1, 1]} : vector<22x16xf32> to vector<16x16xf32>
    %131 = vector.broadcast %129 : f32 to vector<16x16xf32>
    %132 = arith.mulf %131, %130 : vector<16x16xf32>
    %133 = arith.addf %128, %132 : vector<16x16xf32>
    %c0_58 = arith.constant 0 : index
    %c36 = arith.constant 36 : index
    %134 = memref.load %arg1[%c0_58, %c36] : memref<2x49xf32, #tpu.memory_space<smem>>
    %135 = vector.extract_strided_slice %81 {offsets = [5, 0], sizes = [16, 16], strides = [1, 1]} : vector<22x16xf32> to vector<16x16xf32>
    %136 = vector.broadcast %134 : f32 to vector<16x16xf32>
    %137 = arith.mulf %136, %135 : vector<16x16xf32>
    %138 = arith.addf %133, %137 : vector<16x16xf32>
    %c1_59 = arith.constant 1 : index
    %c36_60 = arith.constant 36 : index
    %139 = memref.load %arg1[%c1_59, %c36_60] : memref<2x49xf32, #tpu.memory_space<smem>>
    %140 = vector.extract_strided_slice %83 {offsets = [5, 0], sizes = [16, 16], strides = [1, 1]} : vector<22x16xf32> to vector<16x16xf32>
    %141 = vector.broadcast %139 : f32 to vector<16x16xf32>
    %142 = arith.mulf %141, %140 : vector<16x16xf32>
    %143 = arith.addf %138, %142 : vector<16x16xf32>
    %c0_61 = arith.constant 0 : index
    %c43 = arith.constant 43 : index
    %144 = memref.load %arg1[%c0_61, %c43] : memref<2x49xf32, #tpu.memory_space<smem>>
    %145 = vector.extract_strided_slice %81 {offsets = [6, 0], sizes = [16, 16], strides = [1, 1]} : vector<22x16xf32> to vector<16x16xf32>
    %146 = vector.broadcast %144 : f32 to vector<16x16xf32>
    %147 = arith.mulf %146, %145 : vector<16x16xf32>
    %148 = arith.addf %143, %147 : vector<16x16xf32>
    %c1_62 = arith.constant 1 : index
    %c43_63 = arith.constant 43 : index
    %149 = memref.load %arg1[%c1_62, %c43_63] : memref<2x49xf32, #tpu.memory_space<smem>>
    %150 = vector.extract_strided_slice %83 {offsets = [6, 0], sizes = [16, 16], strides = [1, 1]} : vector<22x16xf32> to vector<16x16xf32>
    %151 = vector.broadcast %149 : f32 to vector<16x16xf32>
    %152 = arith.mulf %151, %150 : vector<16x16xf32>
    %153 = arith.addf %148, %152 : vector<16x16xf32>
    %c0_64 = arith.constant 0 : index
    %c0_65 = arith.constant 0 : index
    %c2 = arith.constant 2 : index
    %154 = vector.load %arg4[%c0_64, %c0_65, %c2] : memref<2x22x22xf32, #tpu.memory_space<vmem>>, vector<1x22x16xf32>
    %155 = vector.shape_cast %154 : vector<1x22x16xf32> to vector<22x16xf32>
    %c1_66 = arith.constant 1 : index
    %c0_67 = arith.constant 0 : index
    %c2_68 = arith.constant 2 : index
    %156 = vector.load %arg4[%c1_66, %c0_67, %c2_68] : memref<2x22x22xf32, #tpu.memory_space<vmem>>, vector<1x22x16xf32>
    %157 = vector.shape_cast %156 : vector<1x22x16xf32> to vector<22x16xf32>
    %c0_69 = arith.constant 0 : index
    %c2_70 = arith.constant 2 : index
    %158 = memref.load %arg1[%c0_69, %c2_70] : memref<2x49xf32, #tpu.memory_space<smem>>
    %159 = vector.extract_strided_slice %155 {offsets = [0, 0], sizes = [16, 16], strides = [1, 1]} : vector<22x16xf32> to vector<16x16xf32>
    %160 = vector.broadcast %158 : f32 to vector<16x16xf32>
    %161 = arith.mulf %160, %159 : vector<16x16xf32>
    %162 = arith.addf %153, %161 : vector<16x16xf32>
    %c1_71 = arith.constant 1 : index
    %c2_72 = arith.constant 2 : index
    %163 = memref.load %arg1[%c1_71, %c2_72] : memref<2x49xf32, #tpu.memory_space<smem>>
    %164 = vector.extract_strided_slice %157 {offsets = [0, 0], sizes = [16, 16], strides = [1, 1]} : vector<22x16xf32> to vector<16x16xf32>
    %165 = vector.broadcast %163 : f32 to vector<16x16xf32>
    %166 = arith.mulf %165, %164 : vector<16x16xf32>
    %167 = arith.addf %162, %166 : vector<16x16xf32>
    %c0_73 = arith.constant 0 : index
    %c9 = arith.constant 9 : index
    %168 = memref.load %arg1[%c0_73, %c9] : memref<2x49xf32, #tpu.memory_space<smem>>
    %169 = vector.extract_strided_slice %155 {offsets = [1, 0], sizes = [16, 16], strides = [1, 1]} : vector<22x16xf32> to vector<16x16xf32>
    %170 = vector.broadcast %168 : f32 to vector<16x16xf32>
    %171 = arith.mulf %170, %169 : vector<16x16xf32>
    %172 = arith.addf %167, %171 : vector<16x16xf32>
    %c1_74 = arith.constant 1 : index
    %c9_75 = arith.constant 9 : index
    %173 = memref.load %arg1[%c1_74, %c9_75] : memref<2x49xf32, #tpu.memory_space<smem>>
    %174 = vector.extract_strided_slice %157 {offsets = [1, 0], sizes = [16, 16], strides = [1, 1]} : vector<22x16xf32> to vector<16x16xf32>
    %175 = vector.broadcast %173 : f32 to vector<16x16xf32>
    %176 = arith.mulf %175, %174 : vector<16x16xf32>
    %177 = arith.addf %172, %176 : vector<16x16xf32>
    %c0_76 = arith.constant 0 : index
    %c16 = arith.constant 16 : index
    %178 = memref.load %arg1[%c0_76, %c16] : memref<2x49xf32, #tpu.memory_space<smem>>
    %179 = vector.extract_strided_slice %155 {offsets = [2, 0], sizes = [16, 16], strides = [1, 1]} : vector<22x16xf32> to vector<16x16xf32>
    %180 = vector.broadcast %178 : f32 to vector<16x16xf32>
    %181 = arith.mulf %180, %179 : vector<16x16xf32>
    %182 = arith.addf %177, %181 : vector<16x16xf32>
    %c1_77 = arith.constant 1 : index
    %c16_78 = arith.constant 16 : index
    %183 = memref.load %arg1[%c1_77, %c16_78] : memref<2x49xf32, #tpu.memory_space<smem>>
    %184 = vector.extract_strided_slice %157 {offsets = [2, 0], sizes = [16, 16], strides = [1, 1]} : vector<22x16xf32> to vector<16x16xf32>
    %185 = vector.broadcast %183 : f32 to vector<16x16xf32>
    %186 = arith.mulf %185, %184 : vector<16x16xf32>
    %187 = arith.addf %182, %186 : vector<16x16xf32>
    %c0_79 = arith.constant 0 : index
    %c23 = arith.constant 23 : index
    %188 = memref.load %arg1[%c0_79, %c23] : memref<2x49xf32, #tpu.memory_space<smem>>
    %189 = vector.extract_strided_slice %155 {offsets = [3, 0], sizes = [16, 16], strides = [1, 1]} : vector<22x16xf32> to vector<16x16xf32>
    %190 = vector.broadcast %188 : f32 to vector<16x16xf32>
    %191 = arith.mulf %190, %189 : vector<16x16xf32>
    %192 = arith.addf %187, %191 : vector<16x16xf32>
    %c1_80 = arith.constant 1 : index
    %c23_81 = arith.constant 23 : index
    %193 = memref.load %arg1[%c1_80, %c23_81] : memref<2x49xf32, #tpu.memory_space<smem>>
    %194 = vector.extract_strided_slice %157 {offsets = [3, 0], sizes = [16, 16], strides = [1, 1]} : vector<22x16xf32> to vector<16x16xf32>
    %195 = vector.broadcast %193 : f32 to vector<16x16xf32>
    %196 = arith.mulf %195, %194 : vector<16x16xf32>
    %197 = arith.addf %192, %196 : vector<16x16xf32>
    %c0_82 = arith.constant 0 : index
    %c30 = arith.constant 30 : index
    %198 = memref.load %arg1[%c0_82, %c30] : memref<2x49xf32, #tpu.memory_space<smem>>
    %199 = vector.extract_strided_slice %155 {offsets = [4, 0], sizes = [16, 16], strides = [1, 1]} : vector<22x16xf32> to vector<16x16xf32>
    %200 = vector.broadcast %198 : f32 to vector<16x16xf32>
    %201 = arith.mulf %200, %199 : vector<16x16xf32>
    %202 = arith.addf %197, %201 : vector<16x16xf32>
    %c1_83 = arith.constant 1 : index
    %c30_84 = arith.constant 30 : index
    %203 = memref.load %arg1[%c1_83, %c30_84] : memref<2x49xf32, #tpu.memory_space<smem>>
    %204 = vector.extract_strided_slice %157 {offsets = [4, 0], sizes = [16, 16], strides = [1, 1]} : vector<22x16xf32> to vector<16x16xf32>
    %205 = vector.broadcast %203 : f32 to vector<16x16xf32>
    %206 = arith.mulf %205, %204 : vector<16x16xf32>
    %207 = arith.addf %202, %206 : vector<16x16xf32>
    %c0_85 = arith.constant 0 : index
    %c37 = arith.constant 37 : index
    %208 = memref.load %arg1[%c0_85, %c37] : memref<2x49xf32, #tpu.memory_space<smem>>
    %209 = vector.extract_strided_slice %155 {offsets = [5, 0], sizes = [16, 16], strides = [1, 1]} : vector<22x16xf32> to vector<16x16xf32>
    %210 = vector.broadcast %208 : f32 to vector<16x16xf32>
    %211 = arith.mulf %210, %209 : vector<16x16xf32>
    %212 = arith.addf %207, %211 : vector<16x16xf32>
    %c1_86 = arith.constant 1 : index
    %c37_87 = arith.constant 37 : index
    %213 = memref.load %arg1[%c1_86, %c37_87] : memref<2x49xf32, #tpu.memory_space<smem>>
    %214 = vector.extract_strided_slice %157 {offsets = [5, 0], sizes = [16, 16], strides = [1, 1]} : vector<22x16xf32> to vector<16x16xf32>
    %215 = vector.broadcast %213 : f32 to vector<16x16xf32>
    %216 = arith.mulf %215, %214 : vector<16x16xf32>
    %217 = arith.addf %212, %216 : vector<16x16xf32>
    %c0_88 = arith.constant 0 : index
    %c44 = arith.constant 44 : index
    %218 = memref.load %arg1[%c0_88, %c44] : memref<2x49xf32, #tpu.memory_space<smem>>
    %219 = vector.extract_strided_slice %155 {offsets = [6, 0], sizes = [16, 16], strides = [1, 1]} : vector<22x16xf32> to vector<16x16xf32>
    %220 = vector.broadcast %218 : f32 to vector<16x16xf32>
    %221 = arith.mulf %220, %219 : vector<16x16xf32>
    %222 = arith.addf %217, %221 : vector<16x16xf32>
    %c1_89 = arith.constant 1 : index
    %c44_90 = arith.constant 44 : index
    %223 = memref.load %arg1[%c1_89, %c44_90] : memref<2x49xf32, #tpu.memory_space<smem>>
    %224 = vector.extract_strided_slice %157 {offsets = [6, 0], sizes = [16, 16], strides = [1, 1]} : vector<22x16xf32> to vector<16x16xf32>
    %225 = vector.broadcast %223 : f32 to vector<16x16xf32>
    %226 = arith.mulf %225, %224 : vector<16x16xf32>
    %227 = arith.addf %222, %226 : vector<16x16xf32>
    %c0_91 = arith.constant 0 : index
    %c0_92 = arith.constant 0 : index
    %c3_93 = arith.constant 3 : index
    %228 = vector.load %arg4[%c0_91, %c0_92, %c3_93] : memref<2x22x22xf32, #tpu.memory_space<vmem>>, vector<1x22x16xf32>
    %229 = vector.shape_cast %228 : vector<1x22x16xf32> to vector<22x16xf32>
    %c1_94 = arith.constant 1 : index
    %c0_95 = arith.constant 0 : index
    %c3_96 = arith.constant 3 : index
    %230 = vector.load %arg4[%c1_94, %c0_95, %c3_96] : memref<2x22x22xf32, #tpu.memory_space<vmem>>, vector<1x22x16xf32>
    %231 = vector.shape_cast %230 : vector<1x22x16xf32> to vector<22x16xf32>
    %c0_97 = arith.constant 0 : index
    %c3_98 = arith.constant 3 : index
    %232 = memref.load %arg1[%c0_97, %c3_98] : memref<2x49xf32, #tpu.memory_space<smem>>
    %233 = vector.extract_strided_slice %229 {offsets = [0, 0], sizes = [16, 16], strides = [1, 1]} : vector<22x16xf32> to vector<16x16xf32>
    %234 = vector.broadcast %232 : f32 to vector<16x16xf32>
    %235 = arith.mulf %234, %233 : vector<16x16xf32>
    %236 = arith.addf %227, %235 : vector<16x16xf32>
    %c1_99 = arith.constant 1 : index
    %c3_100 = arith.constant 3 : index
    %237 = memref.load %arg1[%c1_99, %c3_100] : memref<2x49xf32, #tpu.memory_space<smem>>
    %238 = vector.extract_strided_slice %231 {offsets = [0, 0], sizes = [16, 16], strides = [1, 1]} : vector<22x16xf32> to vector<16x16xf32>
    %239 = vector.broadcast %237 : f32 to vector<16x16xf32>
    %240 = arith.mulf %239, %238 : vector<16x16xf32>
    %241 = arith.addf %236, %240 : vector<16x16xf32>
    %c0_101 = arith.constant 0 : index
    %c10 = arith.constant 10 : index
    %242 = memref.load %arg1[%c0_101, %c10] : memref<2x49xf32, #tpu.memory_space<smem>>
    %243 = vector.extract_strided_slice %229 {offsets = [1, 0], sizes = [16, 16], strides = [1, 1]} : vector<22x16xf32> to vector<16x16xf32>
    %244 = vector.broadcast %242 : f32 to vector<16x16xf32>
    %245 = arith.mulf %244, %243 : vector<16x16xf32>
    %246 = arith.addf %241, %245 : vector<16x16xf32>
    %c1_102 = arith.constant 1 : index
    %c10_103 = arith.constant 10 : index
    %247 = memref.load %arg1[%c1_102, %c10_103] : memref<2x49xf32, #tpu.memory_space<smem>>
    %248 = vector.extract_strided_slice %231 {offsets = [1, 0], sizes = [16, 16], strides = [1, 1]} : vector<22x16xf32> to vector<16x16xf32>
    %249 = vector.broadcast %247 : f32 to vector<16x16xf32>
    %250 = arith.mulf %249, %248 : vector<16x16xf32>
    %251 = arith.addf %246, %250 : vector<16x16xf32>
    %c0_104 = arith.constant 0 : index
    %c17 = arith.constant 17 : index
    %252 = memref.load %arg1[%c0_104, %c17] : memref<2x49xf32, #tpu.memory_space<smem>>
    %253 = vector.extract_strided_slice %229 {offsets = [2, 0], sizes = [16, 16], strides = [1, 1]} : vector<22x16xf32> to vector<16x16xf32>
    %254 = vector.broadcast %252 : f32 to vector<16x16xf32>
    %255 = arith.mulf %254, %253 : vector<16x16xf32>
    %256 = arith.addf %251, %255 : vector<16x16xf32>
    %c1_105 = arith.constant 1 : index
    %c17_106 = arith.constant 17 : index
    %257 = memref.load %arg1[%c1_105, %c17_106] : memref<2x49xf32, #tpu.memory_space<smem>>
    %258 = vector.extract_strided_slice %231 {offsets = [2, 0], sizes = [16, 16], strides = [1, 1]} : vector<22x16xf32> to vector<16x16xf32>
    %259 = vector.broadcast %257 : f32 to vector<16x16xf32>
    %260 = arith.mulf %259, %258 : vector<16x16xf32>
    %261 = arith.addf %256, %260 : vector<16x16xf32>
    %c0_107 = arith.constant 0 : index
    %c24 = arith.constant 24 : index
    %262 = memref.load %arg1[%c0_107, %c24] : memref<2x49xf32, #tpu.memory_space<smem>>
    %263 = vector.extract_strided_slice %229 {offsets = [3, 0], sizes = [16, 16], strides = [1, 1]} : vector<22x16xf32> to vector<16x16xf32>
    %264 = vector.broadcast %262 : f32 to vector<16x16xf32>
    %265 = arith.mulf %264, %263 : vector<16x16xf32>
    %266 = arith.addf %261, %265 : vector<16x16xf32>
    %c1_108 = arith.constant 1 : index
    %c24_109 = arith.constant 24 : index
    %267 = memref.load %arg1[%c1_108, %c24_109] : memref<2x49xf32, #tpu.memory_space<smem>>
    %268 = vector.extract_strided_slice %231 {offsets = [3, 0], sizes = [16, 16], strides = [1, 1]} : vector<22x16xf32> to vector<16x16xf32>
    %269 = vector.broadcast %267 : f32 to vector<16x16xf32>
    %270 = arith.mulf %269, %268 : vector<16x16xf32>
    %271 = arith.addf %266, %270 : vector<16x16xf32>
    %c0_110 = arith.constant 0 : index
    %c31 = arith.constant 31 : index
    %272 = memref.load %arg1[%c0_110, %c31] : memref<2x49xf32, #tpu.memory_space<smem>>
    %273 = vector.extract_strided_slice %229 {offsets = [4, 0], sizes = [16, 16], strides = [1, 1]} : vector<22x16xf32> to vector<16x16xf32>
    %274 = vector.broadcast %272 : f32 to vector<16x16xf32>
    %275 = arith.mulf %274, %273 : vector<16x16xf32>
    %276 = arith.addf %271, %275 : vector<16x16xf32>
    %c1_111 = arith.constant 1 : index
    %c31_112 = arith.constant 31 : index
    %277 = memref.load %arg1[%c1_111, %c31_112] : memref<2x49xf32, #tpu.memory_space<smem>>
    %278 = vector.extract_strided_slice %231 {offsets = [4, 0], sizes = [16, 16], strides = [1, 1]} : vector<22x16xf32> to vector<16x16xf32>
    %279 = vector.broadcast %277 : f32 to vector<16x16xf32>
    %280 = arith.mulf %279, %278 : vector<16x16xf32>
    %281 = arith.addf %276, %280 : vector<16x16xf32>
    %c0_113 = arith.constant 0 : index
    %c38 = arith.constant 38 : index
    %282 = memref.load %arg1[%c0_113, %c38] : memref<2x49xf32, #tpu.memory_space<smem>>
    %283 = vector.extract_strided_slice %229 {offsets = [5, 0], sizes = [16, 16], strides = [1, 1]} : vector<22x16xf32> to vector<16x16xf32>
    %284 = vector.broadcast %282 : f32 to vector<16x16xf32>
    %285 = arith.mulf %284, %283 : vector<16x16xf32>
    %286 = arith.addf %281, %285 : vector<16x16xf32>
    %c1_114 = arith.constant 1 : index
    %c38_115 = arith.constant 38 : index
    %287 = memref.load %arg1[%c1_114, %c38_115] : memref<2x49xf32, #tpu.memory_space<smem>>
    %288 = vector.extract_strided_slice %231 {offsets = [5, 0], sizes = [16, 16], strides = [1, 1]} : vector<22x16xf32> to vector<16x16xf32>
    %289 = vector.broadcast %287 : f32 to vector<16x16xf32>
    %290 = arith.mulf %289, %288 : vector<16x16xf32>
    %291 = arith.addf %286, %290 : vector<16x16xf32>
    %c0_116 = arith.constant 0 : index
    %c45 = arith.constant 45 : index
    %292 = memref.load %arg1[%c0_116, %c45] : memref<2x49xf32, #tpu.memory_space<smem>>
    %293 = vector.extract_strided_slice %229 {offsets = [6, 0], sizes = [16, 16], strides = [1, 1]} : vector<22x16xf32> to vector<16x16xf32>
    %294 = vector.broadcast %292 : f32 to vector<16x16xf32>
    %295 = arith.mulf %294, %293 : vector<16x16xf32>
    %296 = arith.addf %291, %295 : vector<16x16xf32>
    %c1_117 = arith.constant 1 : index
    %c45_118 = arith.constant 45 : index
    %297 = memref.load %arg1[%c1_117, %c45_118] : memref<2x49xf32, #tpu.memory_space<smem>>
    %298 = vector.extract_strided_slice %231 {offsets = [6, 0], sizes = [16, 16], strides = [1, 1]} : vector<22x16xf32> to vector<16x16xf32>
    %299 = vector.broadcast %297 : f32 to vector<16x16xf32>
    %300 = arith.mulf %299, %298 : vector<16x16xf32>
    %301 = arith.addf %296, %300 : vector<16x16xf32>
    %c0_119 = arith.constant 0 : index
    %c0_120 = arith.constant 0 : index
    %c4 = arith.constant 4 : index
    %302 = vector.load %arg4[%c0_119, %c0_120, %c4] : memref<2x22x22xf32, #tpu.memory_space<vmem>>, vector<1x22x16xf32>
    %303 = vector.shape_cast %302 : vector<1x22x16xf32> to vector<22x16xf32>
    %c1_121 = arith.constant 1 : index
    %c0_122 = arith.constant 0 : index
    %c4_123 = arith.constant 4 : index
    %304 = vector.load %arg4[%c1_121, %c0_122, %c4_123] : memref<2x22x22xf32, #tpu.memory_space<vmem>>, vector<1x22x16xf32>
    %305 = vector.shape_cast %304 : vector<1x22x16xf32> to vector<22x16xf32>
    %c0_124 = arith.constant 0 : index
    %c4_125 = arith.constant 4 : index
    %306 = memref.load %arg1[%c0_124, %c4_125] : memref<2x49xf32, #tpu.memory_space<smem>>
    %307 = vector.extract_strided_slice %303 {offsets = [0, 0], sizes = [16, 16], strides = [1, 1]} : vector<22x16xf32> to vector<16x16xf32>
    %308 = vector.broadcast %306 : f32 to vector<16x16xf32>
    %309 = arith.mulf %308, %307 : vector<16x16xf32>
    %310 = arith.addf %301, %309 : vector<16x16xf32>
    %c1_126 = arith.constant 1 : index
    %c4_127 = arith.constant 4 : index
    %311 = memref.load %arg1[%c1_126, %c4_127] : memref<2x49xf32, #tpu.memory_space<smem>>
    %312 = vector.extract_strided_slice %305 {offsets = [0, 0], sizes = [16, 16], strides = [1, 1]} : vector<22x16xf32> to vector<16x16xf32>
    %313 = vector.broadcast %311 : f32 to vector<16x16xf32>
    %314 = arith.mulf %313, %312 : vector<16x16xf32>
    %315 = arith.addf %310, %314 : vector<16x16xf32>
    %c0_128 = arith.constant 0 : index
    %c11 = arith.constant 11 : index
    %316 = memref.load %arg1[%c0_128, %c11] : memref<2x49xf32, #tpu.memory_space<smem>>
    %317 = vector.extract_strided_slice %303 {offsets = [1, 0], sizes = [16, 16], strides = [1, 1]} : vector<22x16xf32> to vector<16x16xf32>
    %318 = vector.broadcast %316 : f32 to vector<16x16xf32>
    %319 = arith.mulf %318, %317 : vector<16x16xf32>
    %320 = arith.addf %315, %319 : vector<16x16xf32>
    %c1_129 = arith.constant 1 : index
    %c11_130 = arith.constant 11 : index
    %321 = memref.load %arg1[%c1_129, %c11_130] : memref<2x49xf32, #tpu.memory_space<smem>>
    %322 = vector.extract_strided_slice %305 {offsets = [1, 0], sizes = [16, 16], strides = [1, 1]} : vector<22x16xf32> to vector<16x16xf32>
    %323 = vector.broadcast %321 : f32 to vector<16x16xf32>
    %324 = arith.mulf %323, %322 : vector<16x16xf32>
    %325 = arith.addf %320, %324 : vector<16x16xf32>
    %c0_131 = arith.constant 0 : index
    %c18 = arith.constant 18 : index
    %326 = memref.load %arg1[%c0_131, %c18] : memref<2x49xf32, #tpu.memory_space<smem>>
    %327 = vector.extract_strided_slice %303 {offsets = [2, 0], sizes = [16, 16], strides = [1, 1]} : vector<22x16xf32> to vector<16x16xf32>
    %328 = vector.broadcast %326 : f32 to vector<16x16xf32>
    %329 = arith.mulf %328, %327 : vector<16x16xf32>
    %330 = arith.addf %325, %329 : vector<16x16xf32>
    %c1_132 = arith.constant 1 : index
    %c18_133 = arith.constant 18 : index
    %331 = memref.load %arg1[%c1_132, %c18_133] : memref<2x49xf32, #tpu.memory_space<smem>>
    %332 = vector.extract_strided_slice %305 {offsets = [2, 0], sizes = [16, 16], strides = [1, 1]} : vector<22x16xf32> to vector<16x16xf32>
    %333 = vector.broadcast %331 : f32 to vector<16x16xf32>
    %334 = arith.mulf %333, %332 : vector<16x16xf32>
    %335 = arith.addf %330, %334 : vector<16x16xf32>
    %c0_134 = arith.constant 0 : index
    %c25 = arith.constant 25 : index
    %336 = memref.load %arg1[%c0_134, %c25] : memref<2x49xf32, #tpu.memory_space<smem>>
    %337 = vector.extract_strided_slice %303 {offsets = [3, 0], sizes = [16, 16], strides = [1, 1]} : vector<22x16xf32> to vector<16x16xf32>
    %338 = vector.broadcast %336 : f32 to vector<16x16xf32>
    %339 = arith.mulf %338, %337 : vector<16x16xf32>
    %340 = arith.addf %335, %339 : vector<16x16xf32>
    %c1_135 = arith.constant 1 : index
    %c25_136 = arith.constant 25 : index
    %341 = memref.load %arg1[%c1_135, %c25_136] : memref<2x49xf32, #tpu.memory_space<smem>>
    %342 = vector.extract_strided_slice %305 {offsets = [3, 0], sizes = [16, 16], strides = [1, 1]} : vector<22x16xf32> to vector<16x16xf32>
    %343 = vector.broadcast %341 : f32 to vector<16x16xf32>
    %344 = arith.mulf %343, %342 : vector<16x16xf32>
    %345 = arith.addf %340, %344 : vector<16x16xf32>
    %c0_137 = arith.constant 0 : index
    %c32 = arith.constant 32 : index
    %346 = memref.load %arg1[%c0_137, %c32] : memref<2x49xf32, #tpu.memory_space<smem>>
    %347 = vector.extract_strided_slice %303 {offsets = [4, 0], sizes = [16, 16], strides = [1, 1]} : vector<22x16xf32> to vector<16x16xf32>
    %348 = vector.broadcast %346 : f32 to vector<16x16xf32>
    %349 = arith.mulf %348, %347 : vector<16x16xf32>
    %350 = arith.addf %345, %349 : vector<16x16xf32>
    %c1_138 = arith.constant 1 : index
    %c32_139 = arith.constant 32 : index
    %351 = memref.load %arg1[%c1_138, %c32_139] : memref<2x49xf32, #tpu.memory_space<smem>>
    %352 = vector.extract_strided_slice %305 {offsets = [4, 0], sizes = [16, 16], strides = [1, 1]} : vector<22x16xf32> to vector<16x16xf32>
    %353 = vector.broadcast %351 : f32 to vector<16x16xf32>
    %354 = arith.mulf %353, %352 : vector<16x16xf32>
    %355 = arith.addf %350, %354 : vector<16x16xf32>
    %c0_140 = arith.constant 0 : index
    %c39 = arith.constant 39 : index
    %356 = memref.load %arg1[%c0_140, %c39] : memref<2x49xf32, #tpu.memory_space<smem>>
    %357 = vector.extract_strided_slice %303 {offsets = [5, 0], sizes = [16, 16], strides = [1, 1]} : vector<22x16xf32> to vector<16x16xf32>
    %358 = vector.broadcast %356 : f32 to vector<16x16xf32>
    %359 = arith.mulf %358, %357 : vector<16x16xf32>
    %360 = arith.addf %355, %359 : vector<16x16xf32>
    %c1_141 = arith.constant 1 : index
    %c39_142 = arith.constant 39 : index
    %361 = memref.load %arg1[%c1_141, %c39_142] : memref<2x49xf32, #tpu.memory_space<smem>>
    %362 = vector.extract_strided_slice %305 {offsets = [5, 0], sizes = [16, 16], strides = [1, 1]} : vector<22x16xf32> to vector<16x16xf32>
    %363 = vector.broadcast %361 : f32 to vector<16x16xf32>
    %364 = arith.mulf %363, %362 : vector<16x16xf32>
    %365 = arith.addf %360, %364 : vector<16x16xf32>
    %c0_143 = arith.constant 0 : index
    %c46 = arith.constant 46 : index
    %366 = memref.load %arg1[%c0_143, %c46] : memref<2x49xf32, #tpu.memory_space<smem>>
    %367 = vector.extract_strided_slice %303 {offsets = [6, 0], sizes = [16, 16], strides = [1, 1]} : vector<22x16xf32> to vector<16x16xf32>
    %368 = vector.broadcast %366 : f32 to vector<16x16xf32>
    %369 = arith.mulf %368, %367 : vector<16x16xf32>
    %370 = arith.addf %365, %369 : vector<16x16xf32>
    %c1_144 = arith.constant 1 : index
    %c46_145 = arith.constant 46 : index
    %371 = memref.load %arg1[%c1_144, %c46_145] : memref<2x49xf32, #tpu.memory_space<smem>>
    %372 = vector.extract_strided_slice %305 {offsets = [6, 0], sizes = [16, 16], strides = [1, 1]} : vector<22x16xf32> to vector<16x16xf32>
    %373 = vector.broadcast %371 : f32 to vector<16x16xf32>
    %374 = arith.mulf %373, %372 : vector<16x16xf32>
    %375 = arith.addf %370, %374 : vector<16x16xf32>
    %c0_146 = arith.constant 0 : index
    %c0_147 = arith.constant 0 : index
    %c5 = arith.constant 5 : index
    %376 = vector.load %arg4[%c0_146, %c0_147, %c5] : memref<2x22x22xf32, #tpu.memory_space<vmem>>, vector<1x22x16xf32>
    %377 = vector.shape_cast %376 : vector<1x22x16xf32> to vector<22x16xf32>
    %c1_148 = arith.constant 1 : index
    %c0_149 = arith.constant 0 : index
    %c5_150 = arith.constant 5 : index
    %378 = vector.load %arg4[%c1_148, %c0_149, %c5_150] : memref<2x22x22xf32, #tpu.memory_space<vmem>>, vector<1x22x16xf32>
    %379 = vector.shape_cast %378 : vector<1x22x16xf32> to vector<22x16xf32>
    %c0_151 = arith.constant 0 : index
    %c5_152 = arith.constant 5 : index
    %380 = memref.load %arg1[%c0_151, %c5_152] : memref<2x49xf32, #tpu.memory_space<smem>>
    %381 = vector.extract_strided_slice %377 {offsets = [0, 0], sizes = [16, 16], strides = [1, 1]} : vector<22x16xf32> to vector<16x16xf32>
    %382 = vector.broadcast %380 : f32 to vector<16x16xf32>
    %383 = arith.mulf %382, %381 : vector<16x16xf32>
    %384 = arith.addf %375, %383 : vector<16x16xf32>
    %c1_153 = arith.constant 1 : index
    %c5_154 = arith.constant 5 : index
    %385 = memref.load %arg1[%c1_153, %c5_154] : memref<2x49xf32, #tpu.memory_space<smem>>
    %386 = vector.extract_strided_slice %379 {offsets = [0, 0], sizes = [16, 16], strides = [1, 1]} : vector<22x16xf32> to vector<16x16xf32>
    %387 = vector.broadcast %385 : f32 to vector<16x16xf32>
    %388 = arith.mulf %387, %386 : vector<16x16xf32>
    %389 = arith.addf %384, %388 : vector<16x16xf32>
    %c0_155 = arith.constant 0 : index
    %c12 = arith.constant 12 : index
    %390 = memref.load %arg1[%c0_155, %c12] : memref<2x49xf32, #tpu.memory_space<smem>>
    %391 = vector.extract_strided_slice %377 {offsets = [1, 0], sizes = [16, 16], strides = [1, 1]} : vector<22x16xf32> to vector<16x16xf32>
    %392 = vector.broadcast %390 : f32 to vector<16x16xf32>
    %393 = arith.mulf %392, %391 : vector<16x16xf32>
    %394 = arith.addf %389, %393 : vector<16x16xf32>
    %c1_156 = arith.constant 1 : index
    %c12_157 = arith.constant 12 : index
    %395 = memref.load %arg1[%c1_156, %c12_157] : memref<2x49xf32, #tpu.memory_space<smem>>
    %396 = vector.extract_strided_slice %379 {offsets = [1, 0], sizes = [16, 16], strides = [1, 1]} : vector<22x16xf32> to vector<16x16xf32>
    %397 = vector.broadcast %395 : f32 to vector<16x16xf32>
    %398 = arith.mulf %397, %396 : vector<16x16xf32>
    %399 = arith.addf %394, %398 : vector<16x16xf32>
    %c0_158 = arith.constant 0 : index
    %c19 = arith.constant 19 : index
    %400 = memref.load %arg1[%c0_158, %c19] : memref<2x49xf32, #tpu.memory_space<smem>>
    %401 = vector.extract_strided_slice %377 {offsets = [2, 0], sizes = [16, 16], strides = [1, 1]} : vector<22x16xf32> to vector<16x16xf32>
    %402 = vector.broadcast %400 : f32 to vector<16x16xf32>
    %403 = arith.mulf %402, %401 : vector<16x16xf32>
    %404 = arith.addf %399, %403 : vector<16x16xf32>
    %c1_159 = arith.constant 1 : index
    %c19_160 = arith.constant 19 : index
    %405 = memref.load %arg1[%c1_159, %c19_160] : memref<2x49xf32, #tpu.memory_space<smem>>
    %406 = vector.extract_strided_slice %379 {offsets = [2, 0], sizes = [16, 16], strides = [1, 1]} : vector<22x16xf32> to vector<16x16xf32>
    %407 = vector.broadcast %405 : f32 to vector<16x16xf32>
    %408 = arith.mulf %407, %406 : vector<16x16xf32>
    %409 = arith.addf %404, %408 : vector<16x16xf32>
    %c0_161 = arith.constant 0 : index
    %c26 = arith.constant 26 : index
    %410 = memref.load %arg1[%c0_161, %c26] : memref<2x49xf32, #tpu.memory_space<smem>>
    %411 = vector.extract_strided_slice %377 {offsets = [3, 0], sizes = [16, 16], strides = [1, 1]} : vector<22x16xf32> to vector<16x16xf32>
    %412 = vector.broadcast %410 : f32 to vector<16x16xf32>
    %413 = arith.mulf %412, %411 : vector<16x16xf32>
    %414 = arith.addf %409, %413 : vector<16x16xf32>
    %c1_162 = arith.constant 1 : index
    %c26_163 = arith.constant 26 : index
    %415 = memref.load %arg1[%c1_162, %c26_163] : memref<2x49xf32, #tpu.memory_space<smem>>
    %416 = vector.extract_strided_slice %379 {offsets = [3, 0], sizes = [16, 16], strides = [1, 1]} : vector<22x16xf32> to vector<16x16xf32>
    %417 = vector.broadcast %415 : f32 to vector<16x16xf32>
    %418 = arith.mulf %417, %416 : vector<16x16xf32>
    %419 = arith.addf %414, %418 : vector<16x16xf32>
    %c0_164 = arith.constant 0 : index
    %c33 = arith.constant 33 : index
    %420 = memref.load %arg1[%c0_164, %c33] : memref<2x49xf32, #tpu.memory_space<smem>>
    %421 = vector.extract_strided_slice %377 {offsets = [4, 0], sizes = [16, 16], strides = [1, 1]} : vector<22x16xf32> to vector<16x16xf32>
    %422 = vector.broadcast %420 : f32 to vector<16x16xf32>
    %423 = arith.mulf %422, %421 : vector<16x16xf32>
    %424 = arith.addf %419, %423 : vector<16x16xf32>
    %c1_165 = arith.constant 1 : index
    %c33_166 = arith.constant 33 : index
    %425 = memref.load %arg1[%c1_165, %c33_166] : memref<2x49xf32, #tpu.memory_space<smem>>
    %426 = vector.extract_strided_slice %379 {offsets = [4, 0], sizes = [16, 16], strides = [1, 1]} : vector<22x16xf32> to vector<16x16xf32>
    %427 = vector.broadcast %425 : f32 to vector<16x16xf32>
    %428 = arith.mulf %427, %426 : vector<16x16xf32>
    %429 = arith.addf %424, %428 : vector<16x16xf32>
    %c0_167 = arith.constant 0 : index
    %c40 = arith.constant 40 : index
    %430 = memref.load %arg1[%c0_167, %c40] : memref<2x49xf32, #tpu.memory_space<smem>>
    %431 = vector.extract_strided_slice %377 {offsets = [5, 0], sizes = [16, 16], strides = [1, 1]} : vector<22x16xf32> to vector<16x16xf32>
    %432 = vector.broadcast %430 : f32 to vector<16x16xf32>
    %433 = arith.mulf %432, %431 : vector<16x16xf32>
    %434 = arith.addf %429, %433 : vector<16x16xf32>
    %c1_168 = arith.constant 1 : index
    %c40_169 = arith.constant 40 : index
    %435 = memref.load %arg1[%c1_168, %c40_169] : memref<2x49xf32, #tpu.memory_space<smem>>
    %436 = vector.extract_strided_slice %379 {offsets = [5, 0], sizes = [16, 16], strides = [1, 1]} : vector<22x16xf32> to vector<16x16xf32>
    %437 = vector.broadcast %435 : f32 to vector<16x16xf32>
    %438 = arith.mulf %437, %436 : vector<16x16xf32>
    %439 = arith.addf %434, %438 : vector<16x16xf32>
    %c0_170 = arith.constant 0 : index
    %c47 = arith.constant 47 : index
    %440 = memref.load %arg1[%c0_170, %c47] : memref<2x49xf32, #tpu.memory_space<smem>>
    %441 = vector.extract_strided_slice %377 {offsets = [6, 0], sizes = [16, 16], strides = [1, 1]} : vector<22x16xf32> to vector<16x16xf32>
    %442 = vector.broadcast %440 : f32 to vector<16x16xf32>
    %443 = arith.mulf %442, %441 : vector<16x16xf32>
    %444 = arith.addf %439, %443 : vector<16x16xf32>
    %c1_171 = arith.constant 1 : index
    %c47_172 = arith.constant 47 : index
    %445 = memref.load %arg1[%c1_171, %c47_172] : memref<2x49xf32, #tpu.memory_space<smem>>
    %446 = vector.extract_strided_slice %379 {offsets = [6, 0], sizes = [16, 16], strides = [1, 1]} : vector<22x16xf32> to vector<16x16xf32>
    %447 = vector.broadcast %445 : f32 to vector<16x16xf32>
    %448 = arith.mulf %447, %446 : vector<16x16xf32>
    %449 = arith.addf %444, %448 : vector<16x16xf32>
    %c0_173 = arith.constant 0 : index
    %c0_174 = arith.constant 0 : index
    %c6 = arith.constant 6 : index
    %450 = vector.load %arg4[%c0_173, %c0_174, %c6] : memref<2x22x22xf32, #tpu.memory_space<vmem>>, vector<1x22x16xf32>
    %451 = vector.shape_cast %450 : vector<1x22x16xf32> to vector<22x16xf32>
    %c1_175 = arith.constant 1 : index
    %c0_176 = arith.constant 0 : index
    %c6_177 = arith.constant 6 : index
    %452 = vector.load %arg4[%c1_175, %c0_176, %c6_177] : memref<2x22x22xf32, #tpu.memory_space<vmem>>, vector<1x22x16xf32>
    %453 = vector.shape_cast %452 : vector<1x22x16xf32> to vector<22x16xf32>
    %c0_178 = arith.constant 0 : index
    %c6_179 = arith.constant 6 : index
    %454 = memref.load %arg1[%c0_178, %c6_179] : memref<2x49xf32, #tpu.memory_space<smem>>
    %455 = vector.extract_strided_slice %451 {offsets = [0, 0], sizes = [16, 16], strides = [1, 1]} : vector<22x16xf32> to vector<16x16xf32>
    %456 = vector.broadcast %454 : f32 to vector<16x16xf32>
    %457 = arith.mulf %456, %455 : vector<16x16xf32>
    %458 = arith.addf %449, %457 : vector<16x16xf32>
    %c1_180 = arith.constant 1 : index
    %c6_181 = arith.constant 6 : index
    %459 = memref.load %arg1[%c1_180, %c6_181] : memref<2x49xf32, #tpu.memory_space<smem>>
    %460 = vector.extract_strided_slice %453 {offsets = [0, 0], sizes = [16, 16], strides = [1, 1]} : vector<22x16xf32> to vector<16x16xf32>
    %461 = vector.broadcast %459 : f32 to vector<16x16xf32>
    %462 = arith.mulf %461, %460 : vector<16x16xf32>
    %463 = arith.addf %458, %462 : vector<16x16xf32>
    %c0_182 = arith.constant 0 : index
    %c13 = arith.constant 13 : index
    %464 = memref.load %arg1[%c0_182, %c13] : memref<2x49xf32, #tpu.memory_space<smem>>
    %465 = vector.extract_strided_slice %451 {offsets = [1, 0], sizes = [16, 16], strides = [1, 1]} : vector<22x16xf32> to vector<16x16xf32>
    %466 = vector.broadcast %464 : f32 to vector<16x16xf32>
    %467 = arith.mulf %466, %465 : vector<16x16xf32>
    %468 = arith.addf %463, %467 : vector<16x16xf32>
    %c1_183 = arith.constant 1 : index
    %c13_184 = arith.constant 13 : index
    %469 = memref.load %arg1[%c1_183, %c13_184] : memref<2x49xf32, #tpu.memory_space<smem>>
    %470 = vector.extract_strided_slice %453 {offsets = [1, 0], sizes = [16, 16], strides = [1, 1]} : vector<22x16xf32> to vector<16x16xf32>
    %471 = vector.broadcast %469 : f32 to vector<16x16xf32>
    %472 = arith.mulf %471, %470 : vector<16x16xf32>
    %473 = arith.addf %468, %472 : vector<16x16xf32>
    %c0_185 = arith.constant 0 : index
    %c20 = arith.constant 20 : index
    %474 = memref.load %arg1[%c0_185, %c20] : memref<2x49xf32, #tpu.memory_space<smem>>
    %475 = vector.extract_strided_slice %451 {offsets = [2, 0], sizes = [16, 16], strides = [1, 1]} : vector<22x16xf32> to vector<16x16xf32>
    %476 = vector.broadcast %474 : f32 to vector<16x16xf32>
    %477 = arith.mulf %476, %475 : vector<16x16xf32>
    %478 = arith.addf %473, %477 : vector<16x16xf32>
    %c1_186 = arith.constant 1 : index
    %c20_187 = arith.constant 20 : index
    %479 = memref.load %arg1[%c1_186, %c20_187] : memref<2x49xf32, #tpu.memory_space<smem>>
    %480 = vector.extract_strided_slice %453 {offsets = [2, 0], sizes = [16, 16], strides = [1, 1]} : vector<22x16xf32> to vector<16x16xf32>
    %481 = vector.broadcast %479 : f32 to vector<16x16xf32>
    %482 = arith.mulf %481, %480 : vector<16x16xf32>
    %483 = arith.addf %478, %482 : vector<16x16xf32>
    %c0_188 = arith.constant 0 : index
    %c27 = arith.constant 27 : index
    %484 = memref.load %arg1[%c0_188, %c27] : memref<2x49xf32, #tpu.memory_space<smem>>
    %485 = vector.extract_strided_slice %451 {offsets = [3, 0], sizes = [16, 16], strides = [1, 1]} : vector<22x16xf32> to vector<16x16xf32>
    %486 = vector.broadcast %484 : f32 to vector<16x16xf32>
    %487 = arith.mulf %486, %485 : vector<16x16xf32>
    %488 = arith.addf %483, %487 : vector<16x16xf32>
    %c1_189 = arith.constant 1 : index
    %c27_190 = arith.constant 27 : index
    %489 = memref.load %arg1[%c1_189, %c27_190] : memref<2x49xf32, #tpu.memory_space<smem>>
    %490 = vector.extract_strided_slice %453 {offsets = [3, 0], sizes = [16, 16], strides = [1, 1]} : vector<22x16xf32> to vector<16x16xf32>
    %491 = vector.broadcast %489 : f32 to vector<16x16xf32>
    %492 = arith.mulf %491, %490 : vector<16x16xf32>
    %493 = arith.addf %488, %492 : vector<16x16xf32>
    %c0_191 = arith.constant 0 : index
    %c34 = arith.constant 34 : index
    %494 = memref.load %arg1[%c0_191, %c34] : memref<2x49xf32, #tpu.memory_space<smem>>
    %495 = vector.extract_strided_slice %451 {offsets = [4, 0], sizes = [16, 16], strides = [1, 1]} : vector<22x16xf32> to vector<16x16xf32>
    %496 = vector.broadcast %494 : f32 to vector<16x16xf32>
    %497 = arith.mulf %496, %495 : vector<16x16xf32>
    %498 = arith.addf %493, %497 : vector<16x16xf32>
    %c1_192 = arith.constant 1 : index
    %c34_193 = arith.constant 34 : index
    %499 = memref.load %arg1[%c1_192, %c34_193] : memref<2x49xf32, #tpu.memory_space<smem>>
    %500 = vector.extract_strided_slice %453 {offsets = [4, 0], sizes = [16, 16], strides = [1, 1]} : vector<22x16xf32> to vector<16x16xf32>
    %501 = vector.broadcast %499 : f32 to vector<16x16xf32>
    %502 = arith.mulf %501, %500 : vector<16x16xf32>
    %503 = arith.addf %498, %502 : vector<16x16xf32>
    %c0_194 = arith.constant 0 : index
    %c41 = arith.constant 41 : index
    %504 = memref.load %arg1[%c0_194, %c41] : memref<2x49xf32, #tpu.memory_space<smem>>
    %505 = vector.extract_strided_slice %451 {offsets = [5, 0], sizes = [16, 16], strides = [1, 1]} : vector<22x16xf32> to vector<16x16xf32>
    %506 = vector.broadcast %504 : f32 to vector<16x16xf32>
    %507 = arith.mulf %506, %505 : vector<16x16xf32>
    %508 = arith.addf %503, %507 : vector<16x16xf32>
    %c1_195 = arith.constant 1 : index
    %c41_196 = arith.constant 41 : index
    %509 = memref.load %arg1[%c1_195, %c41_196] : memref<2x49xf32, #tpu.memory_space<smem>>
    %510 = vector.extract_strided_slice %453 {offsets = [5, 0], sizes = [16, 16], strides = [1, 1]} : vector<22x16xf32> to vector<16x16xf32>
    %511 = vector.broadcast %509 : f32 to vector<16x16xf32>
    %512 = arith.mulf %511, %510 : vector<16x16xf32>
    %513 = arith.addf %508, %512 : vector<16x16xf32>
    %c0_197 = arith.constant 0 : index
    %c48 = arith.constant 48 : index
    %514 = memref.load %arg1[%c0_197, %c48] : memref<2x49xf32, #tpu.memory_space<smem>>
    %515 = vector.extract_strided_slice %451 {offsets = [6, 0], sizes = [16, 16], strides = [1, 1]} : vector<22x16xf32> to vector<16x16xf32>
    %516 = vector.broadcast %514 : f32 to vector<16x16xf32>
    %517 = arith.mulf %516, %515 : vector<16x16xf32>
    %518 = arith.addf %513, %517 : vector<16x16xf32>
    %c1_198 = arith.constant 1 : index
    %c48_199 = arith.constant 48 : index
    %519 = memref.load %arg1[%c1_198, %c48_199] : memref<2x49xf32, #tpu.memory_space<smem>>
    %520 = vector.extract_strided_slice %453 {offsets = [6, 0], sizes = [16, 16], strides = [1, 1]} : vector<22x16xf32> to vector<16x16xf32>
    %521 = vector.broadcast %519 : f32 to vector<16x16xf32>
    %522 = arith.mulf %521, %520 : vector<16x16xf32>
    %523 = arith.addf %518, %522 : vector<16x16xf32>
    %524 = arith.negf %523 : vector<16x16xf32>
    %525 = math.exp %524 : vector<16x16xf32>
    %cst_200 = arith.constant 1.000000e+00 : f32
    %526 = vector.broadcast %cst_200 : f32 to vector<16x16xf32>
    %527 = arith.addf %526, %525 : vector<16x16xf32>
    %528 = arith.divf %526, %527 : vector<16x16xf32>
    %529 = vector.shape_cast %528 : vector<16x16xf32> to vector<1x16x16xf32>
    %c0_201 = arith.constant 0 : index
    %c0_202 = arith.constant 0 : index
    %c0_203 = arith.constant 0 : index
    %530 = vector.load %arg3[%c0_201, %c0_202, %c0_203] : memref<1x16x16xf32, #tpu.memory_space<vmem>>, vector<1x16x16xf32>
    tpu.vector_store %arg3[%c0_201, %c0_202, %c0_203], %529 {strides = array<i32>} : memref<1x16x16xf32, #tpu.memory_space<vmem>>, vector<1x16x16xf32>,
    return
  }
  func.func @transform_0(%arg0: i32) -> (i32, i32) {
    %c0_i32 = arith.constant 0 : i32
    %c0_i32_0 = arith.constant 0 : i32
    %c0_i32_1 = arith.constant 0 : i32
    return %c0_i32, %c0_i32_0 : i32, i32
  }
  func.func @transform_1(%arg0: i32) -> (i32, i32, i32, i32) {
    %c0_i32 = arith.constant 0 : i32
    %c0_i32_0 = arith.constant 0 : i32
    %c0_i32_1 = arith.constant 0 : i32
    %c0_i32_2 = arith.constant 0 : i32
    return %arg0, %c0_i32, %c0_i32_0, %c0_i32_1 : i32, i32, i32, i32
  }
  func.func @transform_2(%arg0: i32) -> (i32, i32, i32) {
    %c0_i32 = arith.constant 0 : i32
    %c0_i32_0 = arith.constant 0 : i32
    %c0_i32_1 = arith.constant 0 : i32
    return %arg0, %c0_i32, %c0_i32_0 : i32, i32, i32
  }
}

</mosaic_0001>

<bundles_post_ra>
// kernel: squeeze.9
= control target key start
LH: loop header
LB: loop body
LE: loop exit
PB: predicated region body
PF: predicated region fallthrough
CT: control target
= control target key end

     0   :  { %s7_s6 = smov 3  ;;  %s21_s9 = smov 3  ;;  %vm4_vm0 = vcmask 56320   ;;  %vm11_vm1 = vcmask 400720   ;;  %vm18_vm2 = vcmask 343320   ;;  %vm25_vm3 = vcmask 285920   ;;  %s108_s0 = inlined_call_operand.vmem [shape: f32[1,2,7,7], index: 0, kind: input, shape index: {}]   ;;  %s109_s1 = inlined_call_operand.vmem [shape: f32[2,49], index: 1, kind: output, shape index: {}]  }
   0x1   :  { %v56_v0 = vld [vmem:[%s108_s0 + $0x6] ss:$8 sm:%s7_s6]   ;;  %s68_s10 = smov 42   ;;  %v58_v1 = vld [vmem:[%s108_s0 + $0x4] ss:$8 sm:%s21_s9]   ;;  %s14_s13 = smov 3 }
   0x2   :  { %9 = vrot.lane.b32.xlu0 %v56_v0, %s68_s10  ;;  %s69_s14 = smov 28   ;;  %v57_v2 = vld [vmem:[%s108_s0 + $0x5] ss:$8 sm:%s14_s13]   ;;  %s28_s17 = smov 3  ;;  %vm32_vm4 = vcmask 228520   ;;  %vm39_vm5 = vcmask 171120  }
   0x3   :  { %23 = vrot.lane.b32.xlu1 %v58_v1, %s69_s14  ;;  %v59_v3 = vld [vmem:[%s108_s0 + $0x3] ss:$8 sm:%s28_s17]   ;;  %s35_s20 = smov 3  ;;  %s42_s21 = smov 3  ;;  %vm46_vm6 = vcmask 113720  }
   0x4   :  { %s70_s22 = smov 35   ;;  %v60_v4 = vld [vmem:[%s108_s0 + $0x2] ss:$8 sm:%s35_s20]   ;;  %s2_s25 = smov 3  ;;  %v61_v6 = vld [vmem:[%s108_s0 + $0x1] ss:$8 sm:%s42_s21]  }
   0x5   :  { %s71_s26 = smov 21   ;;  %v3_v5 = vld [vmem:[%s108_s0] ss:$8 sm:%s2_s25]   ;;  %s72_s0 = smov 14  }
   0x6   :  { %16 = vrot.lane.b32.xlu0 %v57_v2, %s70_s22  ;;  %5 = vst.msk [vmem:[#allocation0] sm:$0x3] %vm4_vm0, %v3_v5   ;;  %s73_s2 = smov 7  }
   0x7   :  { %30 = vrot.lane.b32.xlu1 %v59_v3, %s71_s26 }
   0xa   :  { %37 = vrot.lane.b32.xlu0 %v60_v4, %s72_s0 }
   0xb   :  { %44 = vrot.lane.b32.xlu1 %v61_v6, %s73_s2 }
  0x74   :  { %v10_v7 = vpop.permute.xlu0 %9  }
  0x75   :  { %12 = vst.msk [vmem:[#allocation0] sm:$0x3] %vm11_vm1, %v10_v7   ;;  %v24_v8 = vpop.permute.xlu1 %23  }
  0x78   :  { %v17_v9 = vpop.permute.xlu0 %16  }
  0x79   :  { %19 = vst.msk [vmem:[#allocation0] sm:$0x3] %vm18_vm2, %v17_v9   ;;  %v31_v10 = vpop.permute.xlu1 %30  }
  0x7a   :  { %26 = vst.msk [vmem:[#allocation0] sm:$0x3] %vm25_vm3, %v24_v8  }
  0x7b   :  { %33 = vst.msk [vmem:[#allocation0] sm:$0x3] %vm32_vm4, %v31_v10  }
  0x7c   :  { %v38_v11 = vpop.permute.xlu0 %37  }
  0x7d   :  { %40 = vst.msk [vmem:[#allocation0] sm:$0x3] %vm39_vm5, %v38_v11   ;;  %v45_v12 = vpop.permute.xlu1 %44  }
  0x7e   :  { %47 = vst.msk [vmem:[#allocation0] sm:$0x3] %vm46_vm6, %v45_v12  }
  0x85   :  { %v52_v13 = vld [vmem:[#allocation0] sm:$0x3] }
  0x86   :  { %55 = vst [vmem:[%s109_s1] sm:$0x3] %v52_v13 }

// kernel: cbam_forward.4
= control target key start
LH: loop header
LB: loop body
LE: loop exit
PB: predicated region body
PF: predicated region fallthrough
CT: control target
= control target key end

     0   :  { %s504_s9 = smov 0   ;;  %s506_s10 = smov 0   ;;  %s650_s0 = inlined_call_operand.vmem [shape: f32[2,64,256], index: 0, kind: input, shape index: {}]   ;;  %s651_s1 = inlined_call_operand.vmem [shape: f32[2,64,1], index: 1, kind: output, shape index: {0}]   ;;  %s652_s2 = inlined_call_operand.vmem [shape: f32[2,64,1], index: 2, kind: output, shape index: {1}]  }
   0x1   :  { %s508_s11 = smov 0  }
   0x2 LB: > { %s25_s12 = sadd.s32 1, %s481_s10  ;;  %p425_p0 = scmp.ge.s32.totalorder %s485_s11, 1  ;;  %s485_s11 = sphi %s508_s11, %s13_s11   ;;  %s481_s10 = sphi %s506_s10, %s654_s10   ;;  %s477_s9 = sphi %s504_s9, %s653_s9  }
   0x3   : > { %p27_p1 = scmp.ge.s32.totalorder %s25_s12, 2  ;;  %p134_p2 = scmp.lt.s32.totalorder %s485_s11, 3 }
   0x5   : > { %s656_s12 = smov (%p27_p1, %s25_s12), 0  ;;  %p135_p3 = pnand %p425_p0, %p134_p2 }
   0x6   : > { %p166_p4 = scmp.lt.s32.totalorder (!%p135_p3), %s477_s9, 1 }
   0x7   : > { %138 = sbr.rel (%p135_p3) target bundleno = 188 (0xbc), region = 24 }
   0xc   : > { %s658_s9 = smov (!%p166_p4, %s477_s9), 1  ;;  %vm189_vm0 = vcmask 7168   ;;  %v487_v3 = vmov 0.0   ;;  %v488_v29 = vmov -inf  }
   0xd   : > { %s434_s13 = sshll.u32 %s658_s9, 7  ;;  %s435_s14 = sshll.u32 %s658_s9, 6 }
   0xe   : > { %s529_s17 = scalar_lea.vmem %s650_s0, %s434_s13  ;;  %s536_s20 = scalar_lea.vmem %s651_s1, %s435_s14 }
   0xf   : > { %v210_v0 = vld [vmem:[%s529_s17 + $0x20] sm:$0xff]  ;;  %v211_v1 = vld [vmem:[%s529_s17 + $0x28] sm:$0xff]  ;;  %192 = vst.msk [vmem:[%s536_s20 + $0x10] sm:$0xff] %vm189_vm0, %v487_v3  ;;  %190 = vst.msk [vmem:[%s536_s20] sm:$0xff] %vm189_vm0, %v487_v3  ;;  %s575_s23 = scalar_lea.vmem %s652_s2, %s435_s14 }
  0x10   : > { %v206_v2 = vld [vmem:[%s529_s17] sm:$0xff]  ;;  %191 = vst.msk [vmem:[%s536_s20 + $0x8] sm:$0xff] %vm189_vm0, %v487_v3  ;;  %193 = vst.msk [vmem:[%s536_s20 + $0x18] sm:$0xff] %vm189_vm0, %v487_v3  ;;  %v236_v4 = vadd.f32 %v211_v1, %v210_v0  ;;  %v207_v5 = vld [vmem:[%s529_s17 + $0x8] sm:$0xff]  ;;  %v285_v28 = vmax.f32 %v210_v0, %v211_v1 }
  0x11   : > { %194 = vst.msk [vmem:[%s536_s20 + $0x20] sm:$0xff] %vm189_vm0, %v487_v3  ;;  %195 = vst.msk [vmem:[%s536_s20 + $0x28] sm:$0xff] %vm189_vm0, %v487_v3  ;;  %v212_v6 = vld [vmem:[%s529_s17 + $0x30] sm:$0xff]  ;;  %v213_v7 = vld [vmem:[%s529_s17 + $0x38] sm:$0xff]  ;;  %v230_v8 = vadd.f32 %v207_v5, %v206_v2  ;;  %v279_v26 = vmax.f32 %v206_v2, %v207_v5 }
  0x12   : > { %196 = vst.msk [vmem:[%s536_s20 + $0x30] sm:$0xff] %vm189_vm0, %v487_v3  ;;  %197 = vst.msk [vmem:[%s536_s20 + $0x38] sm:$0xff] %vm189_vm0, %v487_v3  ;;  %v208_v9 = vld [vmem:[%s529_s17 + $0x10] sm:$0xff]  ;;  %v209_v10 = vld [vmem:[%s529_s17 + $0x18] sm:$0xff]  ;;  %237 = vadd.xlane.f32.xlu1 %v236_v4  ;;  %v239_v11 = vadd.f32 %v213_v7, %v212_v6  ;;  %v288_v27 = vmax.f32 %v212_v6, %v213_v7 }
  0x13   : > { %231 = vadd.xlane.f32.xlu0 %v230_v8  ;;  %v233_v12 = vadd.f32 %v209_v10, %v208_v9  ;;  %v216_v13 = vld [vmem:[%s529_s17 + $0x50] sm:$0xff]  ;;  %v217_v14 = vld [vmem:[%s529_s17 + $0x58] sm:$0xff]  ;;  %v214_v15 = vld [vmem:[%s529_s17 + $0x40] sm:$0xff]  ;;  %v282_v25 = vmax.f32 %v208_v9, %v209_v10  ;;  %199 = vst.msk [vmem:[%s575_s23 + $0x8] sm:$0xff] %vm189_vm0, %v488_v29 }
  0x14   : > { %v215_v16 = vld [vmem:[%s529_s17 + $0x48] sm:$0xff]  ;;  %v245_v17 = vadd.f32 %v217_v14, %v216_v13  ;;  %v220_v19 = vld [vmem:[%s529_s17 + $0x70] sm:$0xff]  ;;  %v221_v20 = vld [vmem:[%s529_s17 + $0x78] sm:$0xff]  ;;  %198 = vst.msk [vmem:[%s575_s23] sm:$0xff] %vm189_vm0, %v488_v29  ;;  %v294_v30 = vmax.f32 %v216_v13, %v217_v14 }
  0x15   : > { %v242_v18 = vadd.f32 %v215_v16, %v214_v15  ;;  %v218_v21 = vld [vmem:[%s529_s17 + $0x60] sm:$0xff]  ;;  %v219_v22 = vld [vmem:[%s529_s17 + $0x68] sm:$0xff]  ;;  %v251_v23 = vadd.f32 %v221_v20, %v220_v19  ;;  %200 = vst.msk [vmem:[%s575_s23 + $0x10] sm:$0xff] %vm189_vm0, %v488_v29  ;;  %201 = vst.msk [vmem:[%s575_s23 + $0x18] sm:$0xff] %vm189_vm0, %v488_v29  ;;  %v291_v31 = vmax.f32 %v214_v15, %v215_v16 }
  0x16   : > { %240 = vadd.xlane.f32.xlu1 %v239_v11  ;;  %v248_v24 = vadd.f32 %v219_v22, %v218_v21  ;;  %202 = vst.msk [vmem:[%s575_s23 + $0x20] sm:$0xff] %vm189_vm0, %v488_v29  ;;  %203 = vst.msk [vmem:[%s575_s23 + $0x28] sm:$0xff] %vm189_vm0, %v488_v29  ;;  %v300_v32 = vmax.f32 %v220_v19, %v221_v20  ;;  %v297_v33 = vmax.f32 %v218_v21, %v219_v22  ;;  %v224_v34 = vld [vmem:[%s536_s20 + $0x10] sm:$0xff]  ;;  %v222_v35 = vld [vmem:[%s536_s20] sm:$0xff] }
  0x17   : > { %234 = vadd.xlane.f32.xlu0 %v233_v12  ;;  %204 = vst.msk [vmem:[%s575_s23 + $0x30] sm:$0xff] %vm189_vm0, %v488_v29  ;;  %205 = vst.msk [vmem:[%s575_s23 + $0x38] sm:$0xff] %vm189_vm0, %v488_v29  ;;  %v225_v40 = vld [vmem:[%s536_s20 + $0x18] sm:$0xff]  ;;  %v223_v41 = vld [vmem:[%s536_s20 + $0x8] sm:$0xff] }
  0x18   : > { %v227_v46 = vld [vmem:[%s536_s20 + $0x28] sm:$0xff]  ;;  %v226_v47 = vld [vmem:[%s536_s20 + $0x20] sm:$0xff] }
  0x19   : > { %v229_v52 = vld [vmem:[%s536_s20 + $0x38] sm:$0xff]  ;;  %v228_v53 = vld [vmem:[%s536_s20 + $0x30] sm:$0xff] }
  0x1a   : > { %246 = vadd.xlane.f32.xlu1 %v245_v17  ;;  %v272_v58 = vld [vmem:[%s575_s23 + $0x8] sm:$0xff] }
  0x1b   : > { %243 = vadd.xlane.f32.xlu0 %v242_v18  ;;  %v271_v59 = vld [vmem:[%s575_s23] sm:$0xff] }
  0x1c   : > { %v274_v0 = vld [vmem:[%s575_s23 + $0x18] sm:$0xff]  ;;  %v273_v1 = vld [vmem:[%s575_s23 + $0x10] sm:$0xff] }
  0x1d   : > { %v276_v6 = vld [vmem:[%s575_s23 + $0x28] sm:$0xff]  ;;  %v275_v7 = vld [vmem:[%s575_s23 + $0x20] sm:$0xff] }
  0x1e   : > { %252 = vadd.xlane.f32.xlu1 %v251_v23  ;;  %v278_v12 = vld [vmem:[%s575_s23 + $0x38] sm:$0xff]  ;;  %v277_v13 = vld [vmem:[%s575_s23 + $0x30] sm:$0xff] }
  0x1f   : > { %249 = vadd.xlane.f32.xlu0 %v248_v24 }
  0x22   : > { %283 = vmax.xlane.f32.xlu1 %v282_v25 }
  0x23   : > { %280 = vmax.xlane.f32.xlu0 %v279_v26 }
  0x26   : > { %289 = vmax.xlane.f32.xlu1 %v288_v27 }
  0x27   : > { %286 = vmax.xlane.f32.xlu0 %v285_v28 }
  0x2a   : > { %295 = vmax.xlane.f32.xlu1 %v294_v30 }
  0x2b   : > { %292 = vmax.xlane.f32.xlu0 %v291_v31 }
  0x2e   : > { %301 = vmax.xlane.f32.xlu1 %v300_v32 }
  0x2f   : > { %298 = vmax.xlane.f32.xlu0 %v297_v33 }
  0x9b   : > { %v238_v36 = vpop.xlane.xlu1 %237 }
  0x9c   : > { %v256_v37 = vadd.f32 %v238_v36, %v224_v34  ;;  %v232_v38 = vpop.xlane.xlu0 %231 }
  0x9d   : > { %v254_v39 = vadd.f32 %v232_v38, %v222_v35 }
  0x9e   : > { %265 = vst.msk [vmem:[%s536_s20 + $0x10] sm:$0xff] %vm189_vm0, %v256_v37 }
  0x9f   : > { %263 = vst.msk [vmem:[%s536_s20] sm:$0xff] %vm189_vm0, %v254_v39  ;;  %v241_v42 = vpop.xlane.xlu1 %240 }
  0xa0   : > { %v257_v43 = vadd.f32 %v241_v42, %v225_v40  ;;  %v235_v44 = vpop.xlane.xlu0 %234 }
  0xa1   : > { %v255_v45 = vadd.f32 %v235_v44, %v223_v41 }
  0xa2   : > { %266 = vst.msk [vmem:[%s536_s20 + $0x18] sm:$0xff] %vm189_vm0, %v257_v43 }
  0xa3   : > { %264 = vst.msk [vmem:[%s536_s20 + $0x8] sm:$0xff] %vm189_vm0, %v255_v45  ;;  %v247_v48 = vpop.xlane.xlu1 %246 }
  0xa4   : > { %v259_v49 = vadd.f32 %v247_v48, %v227_v46  ;;  %v244_v50 = vpop.xlane.xlu0 %243 }
  0xa5   : > { %v258_v51 = vadd.f32 %v244_v50, %v226_v47 }
  0xa6   : > { %268 = vst.msk [vmem:[%s536_s20 + $0x28] sm:$0xff] %vm189_vm0, %v259_v49 }
  0xa7   : > { %267 = vst.msk [vmem:[%s536_s20 + $0x20] sm:$0xff] %vm189_vm0, %v258_v51  ;;  %v253_v54 = vpop.xlane.xlu1 %252 }
  0xa8   : > { %v261_v55 = vadd.f32 %v253_v54, %v229_v52  ;;  %v250_v56 = vpop.xlane.xlu0 %249 }
  0xa9   : > { %v260_v57 = vadd.f32 %v250_v56, %v228_v53 }
  0xaa   : > { %270 = vst.msk [vmem:[%s536_s20 + $0x38] sm:$0xff] %vm189_vm0, %v261_v55 }
  0xab   : > { %269 = vst.msk [vmem:[%s536_s20 + $0x30] sm:$0xff] %vm189_vm0, %v260_v57  ;;  %v284_v60 = vpop.xlane.xlu1 %283 }
  0xac   : > { %v304_v61 = vmax.f32 %v272_v58, %v284_v60  ;;  %v281_v62 = vpop.xlane.xlu0 %280 }
  0xad   : > { %v303_v63 = vmax.f32 %v271_v59, %v281_v62 }
  0xae   : > { %312 = vst.msk [vmem:[%s575_s23 + $0x8] sm:$0xff] %vm189_vm0, %v304_v61 }
  0xaf   : > { %311 = vst.msk [vmem:[%s575_s23] sm:$0xff] %vm189_vm0, %v303_v63  ;;  %v290_v2 = vpop.xlane.xlu1 %289 }
  0xb0   : > { %v306_v3 = vmax.f32 %v274_v0, %v290_v2  ;;  %v287_v4 = vpop.xlane.xlu0 %286 }
  0xb1   : > { %v305_v5 = vmax.f32 %v273_v1, %v287_v4 }
  0xb2   : > { %314 = vst.msk [vmem:[%s575_s23 + $0x18] sm:$0xff] %vm189_vm0, %v306_v3 }
  0xb3   : > { %313 = vst.msk [vmem:[%s575_s23 + $0x10] sm:$0xff] %vm189_vm0, %v305_v5  ;;  %v296_v8 = vpop.xlane.xlu1 %295 }
  0xb4   : > { %v308_v9 = vmax.f32 %v276_v6, %v296_v8  ;;  %v293_v10 = vpop.xlane.xlu0 %292 }
  0xb5   : > { %v307_v11 = vmax.f32 %v275_v7, %v293_v10 }
  0xb6   : > { %316 = vst.msk [vmem:[%s575_s23 + $0x28] sm:$0xff] %vm189_vm0, %v308_v9 }
  0xb7   : > { %315 = vst.msk [vmem:[%s575_s23 + $0x20] sm:$0xff] %vm189_vm0, %v307_v11  ;;  %v302_v14 = vpop.xlane.xlu1 %301 }
  0xb8   : > { %v310_v15 = vmax.f32 %v278_v12, %v302_v14  ;;  %v299_v16 = vpop.xlane.xlu0 %298 }
  0xb9   : > { %v309_v17 = vmax.f32 %v277_v13, %v299_v16 }
  0xba   : > { %318 = vst.msk [vmem:[%s575_s23 + $0x38] sm:$0xff] %vm189_vm0, %v310_v15 }
  0xbb   : > { %317 = vst.msk [vmem:[%s575_s23 + $0x30] sm:$0xff] %vm189_vm0, %v309_v17 }
  0xbc PF: > { %s13_s11 = sadd.s32 1, %s485_s11   ;;  %s653_s9 = smov %s481_s10 }
  0xbd   : > { %p10_p5 = scmp.ge.s32.totalorder %s13_s11, 4   ;;  %s654_s10 = smov %s656_s12 }
  0xbf   :  { %12 = sbr.rel (!%p10_p5) target bundleno = 2 (0x2), region = 70 }

// kernel: cbam_forward.5
= control target key start
LH: loop header
LB: loop body
LE: loop exit
PB: predicated region body
PF: predicated region fallthrough
CT: control target
= control target key end

     0   :  { %s565_s9 = smov 0   ;;  %s567_s10 = smov 0   ;;  %s624_s0 = inlined_call_operand.vmem [shape: f32[2,64,256], index: 0, kind: input, shape index: {}]   ;;  %s625_s1 = inlined_call_operand.vmem [shape: f32[2,64,1], index: 1, kind: input, shape index: {}]   ;;  %s626_s2 = inlined_call_operand.vmem [shape: f32[2,2,256], index: 2, kind: output, shape index: {}]  }
   0x1   :  { %s569_s11 = smov 0  }
   0x2 LB: > { %s24_s12 = sadd.s32 1, %s542_s10  ;;  %p483_p0 = scmp.ge.s32.totalorder %s546_s11, 1  ;;  %s546_s11 = sphi %s569_s11, %s12_s11   ;;  %s542_s10 = sphi %s567_s10, %s628_s10   ;;  %s538_s9 = sphi %s565_s9, %s627_s9  }
   0x3   : > { %p26_p1 = scmp.ge.s32.totalorder %s24_s12, 2  ;;  %p143_p2 = scmp.lt.s32.totalorder %s546_s11, 3 }
   0x5   : > { %s630_s12 = smov (%p26_p1, %s24_s12), 0  ;;  %p144_p3 = pnand %p483_p0, %p143_p2 }
   0x6   : > { %p179_p4 = scmp.lt.s32.totalorder (!%p144_p3), %s538_s9, 1 }
   0x7   : > { %147 = sbr.rel (%p144_p3) target bundleno = 181 (0xb5), region = 28 }
   0xc   : > { %v548_v0 = vmov 0   ;;  %s632_s9 = smov (!%p179_p4, %s538_s9), 1 }
   0xd   : > { %523 = vset.pattern.permute.xlu1 %v548_v0  ;;  %522 = vset.pattern.permute.xlu0 %v548_v0  ;;  %s494_s13 = sshll.u32 %s632_s9, 6  ;;  %s493_s17 = sshll.u32 %s632_s9, 7 }
   0xe   : > { %s192_s16 = scalar_lea.vmem %s625_s1, %s494_s13  ;;  %s593_s20 = scalar_lea.vmem %s624_s0, %s493_s17 }
   0xf   : > { %v221_v1 = vld [vmem:[%s192_s16 + $0x10] sm:$0xff]  ;;  %v219_v2 = vld [vmem:[%s192_s16] sm:$0xff]  ;;  %v222_v3 = vld [vmem:[%s192_s16 + $0x18] sm:$0xff]  ;;  %s495_s21 = sshll.u32 %s632_s9, 2 }
  0x10   : > { %239 = vperm.xlu1 %523, %v221_v1   ;;  %229 = vperm.xlu0 %522, %v219_v2   ;;  %v220_v4 = vld [vmem:[%s192_s16 + $0x8] sm:$0xff]  ;;  %v223_v6 = vld [vmem:[%s192_s16 + $0x20] sm:$0xff]  ;;  %v226_v7 = vld [vmem:[%s192_s16 + $0x38] sm:$0xff]  ;;  %s201_s24 = scalar_lea.vmem %s626_s2, %s495_s21 }
  0x11   : > { %v224_v5 = vld [vmem:[%s192_s16 + $0x28] sm:$0xff]  ;;  %v225_v8 = vld [vmem:[%s192_s16 + $0x30] sm:$0xff]  ;;  %v203_v11 = vld [vmem:[%s593_s20] sm:$0xff] }
  0x12   : > { %v204_v12 = vld [vmem:[%s593_s20 + $0x8] sm:$0xff]  ;;  %v205_v13 = vld [vmem:[%s593_s20 + $0x10] sm:$0xff]  ;;  %v206_v14 = vld [vmem:[%s593_s20 + $0x18] sm:$0xff] }
  0x13   : > { %v209_v15 = vld [vmem:[%s593_s20 + $0x30] sm:$0xff]  ;;  %v210_v16 = vld [vmem:[%s593_s20 + $0x38] sm:$0xff]  ;;  %v207_v17 = vld [vmem:[%s593_s20 + $0x20] sm:$0xff] }
  0x14   : > { %244 = vperm.xlu1 %523, %v222_v3   ;;  %234 = vperm.xlu0 %522, %v220_v4   ;;  %v208_v18 = vld [vmem:[%s593_s20 + $0x28] sm:$0xff]  ;;  %v213_v27 = vld [vmem:[%s593_s20 + $0x50] sm:$0xff]  ;;  %v214_v28 = vld [vmem:[%s593_s20 + $0x58] sm:$0xff] }
  0x15   : > { %v211_v33 = vld [vmem:[%s593_s20 + $0x40] sm:$0xff]  ;;  %v212_v34 = vld [vmem:[%s593_s20 + $0x48] sm:$0xff]  ;;  %v217_v45 = vld [vmem:[%s593_s20 + $0x70] sm:$0xff] }
  0x16   : > { %v218_v46 = vld [vmem:[%s593_s20 + $0x78] sm:$0xff]  ;;  %v215_v49 = vld [vmem:[%s593_s20 + $0x60] sm:$0xff]  ;;  %v216_v50 = vld [vmem:[%s593_s20 + $0x68] sm:$0xff] }
  0x18   : > { %254 = vperm.xlu1 %523, %v224_v5   ;;  %249 = vperm.xlu0 %522, %v223_v6  }
  0x1c   : > { %264 = vperm.xlu1 %523, %v226_v7   ;;  %259 = vperm.xlu0 %522, %v225_v8  }
  0x8b   : > { %v240_v9 = vpop.permute.xlu1 %239  ;;  %v230_v10 = vpop.permute.xlu0 %229 }
  0x8c   : > { %v267_v21 = vmul.f32 %v230_v10, %v203_v11  ;;  %v268_v22 = vmul.f32 %v230_v10, %v204_v12  ;;  %v271_v29 = vmul.f32 %v240_v9, %v207_v17  ;;  %v272_v30 = vmul.f32 %v240_v9, %v208_v18 }
  0x8d   : > { %v549_v17 = vmov 1966171168  }
  0x8e   : > { %v334_v51 = vmax.f32 %v267_v21, %v271_v29  ;;  %v347_v52 = vmax.f32 %v268_v22, %v272_v30  ;;  %v315_v18 = vunpack.c.l.s4 %v549_v17 }
  0x8f   : > { %v245_v19 = vpop.permute.xlu1 %244  ;;  %v235_v20 = vpop.permute.xlu0 %234 }
  0x90   : > { %v269_v23 = vmul.f32 %v235_v20, %v205_v13  ;;  %v270_v24 = vmul.f32 %v235_v20, %v206_v14  ;;  %v273_v25 = vmul.f32 %v245_v19, %v209_v15  ;;  %v274_v26 = vmul.f32 %v245_v19, %v210_v16 }
  0x91   : > { %v317_v19 = vlaneseq }
  0x92   : > { %v283_v31 = vadd.f32 %v269_v23, %v267_v21  ;;  %v296_v32 = vadd.f32 %v270_v24, %v268_v22  ;;  %v335_v41 = vmax.f32 %v269_v23, %v273_v25  ;;  %v348_v42 = vmax.f32 %v270_v24, %v274_v26 }
  0x93   : > { %v255_v35 = vpop.permute.xlu1 %254  ;;  %v250_v36 = vpop.permute.xlu0 %249  ;;  %vm331_vm0 = vcmp.lt.s32.totalorder %v317_v19, 256 }
  0x94   : > { %v284_v37 = vadd.f32 %v283_v31, %v271_v29  ;;  %v297_v38 = vadd.f32 %v296_v32, %v272_v30  ;;  %v277_v39 = vmul.f32 %v255_v35, %v213_v27  ;;  %v278_v40 = vmul.f32 %v255_v35, %v214_v28 }
  0x95   : > { %v275_v43 = vmul.f32 %v250_v36, %v211_v33  ;;  %v276_v44 = vmul.f32 %v250_v36, %v212_v34  ;;  %v316_v28 = vunpack.c.0.s8 %v315_v18  ;;  %v318_v29 = vshrl.u32 %v317_v19, 7 }
  0x96   : > { %v285_v47 = vadd.f32 %v284_v37, %v273_v25  ;;  %v298_v48 = vadd.f32 %v297_v38, %v274_v26  ;;  %v337_v53 = vmax.f32 %v335_v41, %v277_v39  ;;  %v350_v54 = vmax.f32 %v348_v42, %v278_v40 }
  0x97   : > { %v265_v55 = vpop.permute.xlu1 %264  ;;  %v260_v56 = vpop.permute.xlu0 %259  ;;  %v336_v61 = vmax.f32 %v334_v51, %v275_v43  ;;  %v349_v62 = vmax.f32 %v347_v52, %v276_v44  ;;  %v319_v38 = vsub.s32 %v316_v28, %v318_v29 }
  0x98   : > { %v286_v57 = vadd.f32 %v285_v47, %v275_v43  ;;  %v299_v58 = vadd.f32 %v298_v48, %v276_v44  ;;  %v281_v59 = vmul.f32 %v265_v55, %v217_v45  ;;  %v282_v60 = vmul.f32 %v265_v55, %v218_v46 }
  0x99   : > { %v279_v63 = vmul.f32 %v260_v56, %v215_v49  ;;  %v280_v0 = vmul.f32 %v260_v56, %v216_v50 }
  0x9a   : > { %v339_v1 = vmax.f32 %v337_v53, %v281_v59  ;;  %v352_v2 = vmax.f32 %v350_v54, %v282_v60  ;;  %v287_v3 = vadd.f32 %v286_v57, %v277_v39  ;;  %v300_v4 = vadd.f32 %v299_v58, %v278_v40 }
  0x9b   : > { %v338_v5 = vmax.f32 %v336_v61, %v279_v63  ;;  %v351_v6 = vmax.f32 %v349_v62, %v280_v0 }
  0x9c   : > { %v288_v7 = vadd.f32 %v287_v3, %v279_v63  ;;  %v301_v8 = vadd.f32 %v300_v4, %v280_v0 }
  0x9d   : > { %v340_v9 = vmax.f32 %v338_v5, %v339_v1  ;;  %v353_v10 = vmax.f32 %v351_v6, %v352_v2 }
  0x9e   : > { %v289_v11 = vadd.f32 %v288_v7, %v281_v59  ;;  %v302_v12 = vadd.f32 %v301_v8, %v282_v60 }
  0x9f   : > { %v341_v13 = vrot.slane %v340_v9, 4  ;;  %v354_v14 = vrot.slane %v353_v10, 4 }
  0xa0   : > { %v290_v15 = vrot.slane %v289_v11, 4  ;;  %v303_v16 = vrot.slane %v302_v12, 4 }
  0xa1   : > { %v342_v20 = vmax.f32 %v340_v9, %v341_v13  ;;  %v355_v21 = vmax.f32 %v353_v10, %v354_v14 }
  0xa2   : > { %v291_v22 = vadd.f32 %v290_v15, %v289_v11  ;;  %v304_v23 = vadd.f32 %v303_v16, %v302_v12 }
  0xa3   : > { %v343_v24 = vrot.slane %v342_v20, 2  ;;  %v356_v25 = vrot.slane %v355_v21, 2 }
  0xa4   : > { %v292_v26 = vrot.slane %v291_v22, 2  ;;  %v305_v27 = vrot.slane %v304_v23, 2 }
  0xa5   : > { %v344_v30 = vmax.f32 %v342_v20, %v343_v24  ;;  %v357_v31 = vmax.f32 %v355_v21, %v356_v25 }
  0xa6   : > { %v293_v32 = vadd.f32 %v292_v26, %v291_v22  ;;  %v306_v33 = vadd.f32 %v305_v27, %v304_v23 }
  0xa7   : > { %v345_v34 = vrot.slane %v344_v30, 1  ;;  %v358_v35 = vrot.slane %v357_v31, 1 }
  0xa8   : > { %v294_v36 = vrot.slane %v293_v32, 1  ;;  %v307_v37 = vrot.slane %v306_v33, 1 }
  0xa9   : > { %v346_v39 = vmax.f32 %v344_v30, %v345_v34  ;;  %v359_v40 = vmax.f32 %v357_v31, %v358_v35 }
  0xaa   : > { %v295_v41 = vadd.f32 %v294_v36, %v293_v32  ;;  %v308_v42 = vadd.f32 %v307_v37, %v306_v33 }
  0xab   : > { %v362_v43 = vcombine.low %v346_v39, %v359_v40 }
  0xac   : > { %v309_v44 = vmul.f32 0.015625, %v295_v41  ;;  %v310_v45 = vmul.f32 0.015625, %v308_v42 }
  0xad   : > { %v369_v46 = vrot.slane %v362_v43, %v319_v38 }
  0xae   : > { %v313_v47 = vcombine.low %v309_v44, %v310_v45 }
  0xaf   : > { %v376_v48 = vrot.slane %v369_v46, %v319_v38 }
  0xb0   : > { %v320_v49 = vrot.slane %v313_v47, %v319_v38 }
  0xb1   : > { %490 = vst.msk [vmem:[%s201_s24 + $0x1] ss:$2 sm:$0x3] %vm331_vm0, %v376_v48 }
  0xb2   : > { %v327_v50 = vrot.slane %v320_v49, %v319_v38 }
  0xb4   : > { %333 = vst.msk [vmem:[%s201_s24] ss:$2 sm:$0x3] %vm331_vm0, %v327_v50 }
  0xb5 PF: > { %s12_s11 = sadd.s32 1, %s546_s11   ;;  %s627_s9 = smov %s542_s10 }
  0xb6   : > { %p9_p5 = scmp.ge.s32.totalorder %s12_s11, 4   ;;  %s628_s10 = smov %s630_s12 }
  0xb8   :  { %11 = sbr.rel (!%p9_p5) target bundleno = 2 (0x2), region = 62 }

// kernel: cbam_forward.7
= control target key start
LH: loop header
LB: loop body
LE: loop exit
PB: predicated region body
PF: predicated region fallthrough
CT: control target
= control target key end

     0   :  { %s590_s12 = smov 0   ;;  %s592_s13 = smov 0   ;;  %s690_s0 = inlined_call_operand.vmem [shape: f32[2,64,256], index: 0, kind: input, shape index: {}]   ;;  %s691_s1 = inlined_call_operand.vmem [shape: f32[2,64,1], index: 1, kind: input, shape index: {}]   ;;  %s692_s2 = inlined_call_operand.vmem [shape: f32[2,1,256], index: 2, kind: input, shape index: {}]   ;;  %s693_s3 = inlined_call_operand.vmem [shape: f32[2,64,256], index: 3, kind: output, shape index: {}]  }
   0x1   :  { %s594_s14 = smov 0  }
   0x2 LB: > { %s25_s15 = sadd.s32 1, %s563_s13  ;;  %p505_p0 = scmp.ge.s32.totalorder %s567_s14, 1  ;;  %s567_s14 = sphi %s594_s14, %s13_s14   ;;  %s563_s13 = sphi %s592_s13, %s695_s13   ;;  %s559_s12 = sphi %s590_s12, %s694_s12  }
   0x3   : > { %p27_p1 = scmp.ge.s32.totalorder %s25_s15, 2  ;;  %p184_p2 = scmp.lt.s32.totalorder %s567_s14, 3 }
   0x5   : > { %s697_s15 = smov (%p27_p1, %s25_s15), 0  ;;  %p185_p3 = pnand %p505_p0, %p184_p2 }
   0x6   : > { %p230_p4 = scmp.lt.s32.totalorder (!%p185_p3), %s559_s12, 1 }
   0x7   : > { %188 = sbr.rel (%p185_p3) target bundleno = 158 (0x9e), region = 32 }
   0xc   : > { %v569_v0 = vmov 0   ;;  %s699_s12 = smov (!%p230_p4, %s559_s12), 1  ;;  %v345_v9 = vlaneseq }
   0xd   : > { %544 = vset.pattern.permute.xlu1 %v569_v0  ;;  %543 = vset.pattern.permute.xlu0 %v569_v0  ;;  %s516_s16 = sshll.u32 %s699_s12, 6  ;;  %s510_s20 = sshll.u32 %s699_s12, 1 }
   0xe   : > { %s243_s19 = scalar_lea.vmem %s691_s1, %s516_s16  ;;  %v346_v10 = vshrl.u32 %v345_v9, 7  ;;  %s515_s21 = sshll.u32 %s699_s12, 7 }
   0xf   : > { %v281_v1 = vld [vmem:[%s243_s19 + $0x10] sm:$0xff]  ;;  %v279_v2 = vld [vmem:[%s243_s19] sm:$0xff]  ;;  %v282_v3 = vld [vmem:[%s243_s19 + $0x18] sm:$0xff]  ;;  %s251_s24 = scalar_lea.vmem %s692_s2, %s510_s20  ;;  %s622_s27 = scalar_lea.vmem %s690_s0, %s515_s21 }
  0x10   : > { %299 = vperm.xlu1 %544, %v281_v1   ;;  %289 = vperm.xlu0 %543, %v279_v2   ;;  %v280_v4 = vld [vmem:[%s243_s19 + $0x8] sm:$0xff]  ;;  %v283_v6 = vld [vmem:[%s243_s19 + $0x20] sm:$0xff]  ;;  %v286_v7 = vld [vmem:[%s243_s19 + $0x38] sm:$0xff]  ;;  %v347_v11 = vsub.s32 0, %v346_v10  ;;  %v351_v12 = vsub.s32 1, %v346_v10  ;;  %s636_s30 = scalar_lea.vmem %s693_s3, %s515_s21 }
  0x11   : > { %v284_v5 = vld [vmem:[%s243_s19 + $0x28] sm:$0xff]  ;;  %v285_v8 = vld [vmem:[%s243_s19 + $0x30] sm:$0xff]  ;;  %v343_v13 = vld [vmem:[%s251_s24] sm:$0x3] }
  0x12   : > { %v267_v14 = vld [vmem:[%s622_s27 + $0x20] sm:$0xff]  ;;  %v268_v15 = vld [vmem:[%s622_s27 + $0x28] sm:$0xff]  ;;  %v628_v18 = vrot.slane %v343_v13, %v347_v11  ;;  %v630_v19 = vrot.slane %v343_v13, %v351_v12  ;;  %v269_v26 = vld [vmem:[%s622_s27 + $0x30] sm:$0xff] }
  0x13   : > { %v263_v16 = vld [vmem:[%s622_s27] sm:$0xff]  ;;  %v264_v17 = vld [vmem:[%s622_s27 + $0x8] sm:$0xff]  ;;  %v270_v27 = vld [vmem:[%s622_s27 + $0x38] sm:$0xff] }
  0x14   : > { %304 = vperm.xlu1 %544, %v282_v3   ;;  %294 = vperm.xlu0 %543, %v280_v4   ;;  %v265_v28 = vld [vmem:[%s622_s27 + $0x10] sm:$0xff]  ;;  %v266_v29 = vld [vmem:[%s622_s27 + $0x18] sm:$0xff]  ;;  %v271_v42 = vld [vmem:[%s622_s27 + $0x40] sm:$0xff] }
  0x15   : > { %v273_v40 = vld [vmem:[%s622_s27 + $0x50] sm:$0xff]  ;;  %v274_v41 = vld [vmem:[%s622_s27 + $0x58] sm:$0xff]  ;;  %v272_v43 = vld [vmem:[%s622_s27 + $0x48] sm:$0xff] }
  0x16   : > { %v277_v54 = vld [vmem:[%s622_s27 + $0x70] sm:$0xff]  ;;  %v278_v55 = vld [vmem:[%s622_s27 + $0x78] sm:$0xff]  ;;  %v275_v56 = vld [vmem:[%s622_s27 + $0x60] sm:$0xff] }
  0x17   : > { %v276_v57 = vld [vmem:[%s622_s27 + $0x68] sm:$0xff] }
  0x18   : > { %314 = vperm.xlu1 %544, %v284_v5   ;;  %309 = vperm.xlu0 %543, %v283_v6  }
  0x1c   : > { %324 = vperm.xlu1 %544, %v286_v7   ;;  %319 = vperm.xlu0 %543, %v285_v8  }
  0x8b   : > { %v300_v20 = vpop.permute.xlu1 %299  ;;  %v290_v21 = vpop.permute.xlu0 %289 }
  0x8c   : > { %v331_v22 = vmul.f32 %v300_v20, %v267_v14  ;;  %v332_v23 = vmul.f32 %v300_v20, %v268_v15  ;;  %v327_v24 = vmul.f32 %v290_v21, %v263_v16  ;;  %v328_v25 = vmul.f32 %v290_v21, %v264_v17 }
  0x8e   : > { %v359_v30 = vmul.f32 %v628_v18, %v331_v22  ;;  %v360_v31 = vmul.f32 %v630_v19, %v332_v23  ;;  %v355_v32 = vmul.f32 %v628_v18, %v327_v24  ;;  %v356_v33 = vmul.f32 %v630_v19, %v328_v25 }
  0x8f   : > { %v305_v34 = vpop.permute.xlu1 %304  ;;  %v295_v35 = vpop.permute.xlu0 %294 }
  0x90   : > { %375 = vst [vmem:[%s636_s30 + $0x20] sm:$0xff] %v359_v30  ;;  %376 = vst [vmem:[%s636_s30 + $0x28] sm:$0xff] %v360_v31  ;;  %v333_v36 = vmul.f32 %v305_v34, %v269_v26  ;;  %v334_v37 = vmul.f32 %v305_v34, %v270_v27  ;;  %v329_v38 = vmul.f32 %v295_v35, %v265_v28 }
  0x91   : > { %371 = vst [vmem:[%s636_s30] sm:$0xff] %v355_v32  ;;  %372 = vst [vmem:[%s636_s30 + $0x8] sm:$0xff] %v356_v33  ;;  %v330_v39 = vmul.f32 %v295_v35, %v266_v29 }
  0x92   : > { %v361_v44 = vmul.f32 %v628_v18, %v333_v36  ;;  %v362_v45 = vmul.f32 %v630_v19, %v334_v37  ;;  %v357_v46 = vmul.f32 %v628_v18, %v329_v38 }
  0x93   : > { %v358_v47 = vmul.f32 %v630_v19, %v330_v39  ;;  %v315_v48 = vpop.permute.xlu1 %314  ;;  %v310_v49 = vpop.permute.xlu0 %309 }
  0x94   : > { %377 = vst [vmem:[%s636_s30 + $0x30] sm:$0xff] %v361_v44  ;;  %378 = vst [vmem:[%s636_s30 + $0x38] sm:$0xff] %v362_v45  ;;  %v337_v50 = vmul.f32 %v315_v48, %v273_v40  ;;  %v338_v51 = vmul.f32 %v315_v48, %v274_v41  ;;  %v335_v52 = vmul.f32 %v310_v49, %v271_v42 }
  0x95   : > { %373 = vst [vmem:[%s636_s30 + $0x10] sm:$0xff] %v357_v46  ;;  %374 = vst [vmem:[%s636_s30 + $0x18] sm:$0xff] %v358_v47  ;;  %v336_v53 = vmul.f32 %v310_v49, %v272_v43 }
  0x96   : > { %v365_v58 = vmul.f32 %v628_v18, %v337_v50  ;;  %v366_v59 = vmul.f32 %v630_v19, %v338_v51  ;;  %v363_v60 = vmul.f32 %v628_v18, %v335_v52 }
  0x97   : > { %v364_v61 = vmul.f32 %v630_v19, %v336_v53  ;;  %v325_v62 = vpop.permute.xlu1 %324  ;;  %v320_v63 = vpop.permute.xlu0 %319 }
  0x98   : > { %381 = vst [vmem:[%s636_s30 + $0x50] sm:$0xff] %v365_v58  ;;  %382 = vst [vmem:[%s636_s30 + $0x58] sm:$0xff] %v366_v59  ;;  %v341_v0 = vmul.f32 %v325_v62, %v277_v54  ;;  %v342_v1 = vmul.f32 %v325_v62, %v278_v55  ;;  %v339_v2 = vmul.f32 %v320_v63, %v275_v56 }
  0x99   : > { %379 = vst [vmem:[%s636_s30 + $0x40] sm:$0xff] %v363_v60  ;;  %380 = vst [vmem:[%s636_s30 + $0x48] sm:$0xff] %v364_v61  ;;  %v340_v3 = vmul.f32 %v320_v63, %v276_v57 }
  0x9a   : > { %v369_v4 = vmul.f32 %v628_v18, %v341_v0  ;;  %v370_v5 = vmul.f32 %v630_v19, %v342_v1  ;;  %v367_v6 = vmul.f32 %v628_v18, %v339_v2 }
  0x9b   : > { %v368_v7 = vmul.f32 %v630_v19, %v340_v3 }
  0x9c   : > { %385 = vst [vmem:[%s636_s30 + $0x70] sm:$0xff] %v369_v4  ;;  %386 = vst [vmem:[%s636_s30 + $0x78] sm:$0xff] %v370_v5 }
  0x9d   : > { %383 = vst [vmem:[%s636_s30 + $0x60] sm:$0xff] %v367_v6  ;;  %384 = vst [vmem:[%s636_s30 + $0x68] sm:$0xff] %v368_v7 }
  0x9e PF: > { %s13_s14 = sadd.s32 1, %s567_s14   ;;  %s694_s12 = smov %s563_s13 }
  0x9f   : > { %p10_p5 = scmp.ge.s32.totalorder %s13_s14, 4   ;;  %s695_s13 = smov %s697_s15 }
  0xa1   :  { %12 = sbr.rel (!%p10_p5) target bundleno = 2 (0x2), region = 68 }

// kernel: cbam_forward.6
= control target key start
LH: loop header
LB: loop body
LE: loop exit
PB: predicated region body
PF: predicated region fallthrough
CT: control target
= control target key end

     0   :  { %7 = vsyncpa [#allocation4], 0  ;;  %s2394_s9 = smov 0   ;;  %s3696_s0 = inlined_call_operand.vmem [shape: f32[2,49], index: 0, kind: input, shape index: {}]   ;;  %s3697_s1 = inlined_call_operand.vmem [shape: f32[2,2,16,16], index: 1, kind: input, shape index: {}]   ;;  %s3698_s2 = inlined_call_operand.vmem [shape: f32[2,16,16], index: 2, kind: output, shape index: {}]  }
   0x1 LB: > { %s2400_s10 = sadd.s32 4294967295, %s2368_s9   ;;  %p2184_p0 = scmp.ge.s32.totalorder %s2368_s9, 1  ;;  %s2368_s9 = sphi %s2394_s9, %s13_s9  }
   0x2   : > { %p91_p1 = scmp.lt.s32.totalorder %s2368_s9, 3  ;;  %s104_s13 = sshll.u32 %s3696_s0, 4  ;;  %s105_s13 = int_to_ptr.vmem [resolvable:$true] %s104_s13 }
   0x3   : > { %p2304_p3 = scmp.eq.s32.totalorder %s2400_s10, 0  ;;  %s2343_s15 = scalar_lea.vmem %s105_s13, 32 }
   0x4   : > { %p2407_p2 = pnand %p2184_p0, %p91_p1  ;;  %p2344_p6 = scmp.ne.s32.totalorder %s105_s13, %s2343_s15 }
   0x5   : > { %p2351_p10 = scmp.lt.s32.totalorder %s105_s13, %s105_s13  ;;  %p2352_p11 = scmp.lt.s32.totalorder %s2343_s15, %s2343_s15 }
   0x6   : > { %p2300_p4 = pneg %p2407_p2 }
   0x7   : > { %p2353_p12 = por %p2352_p11, %p2351_p10 }
   0x8   : > { %p2301_p5 = pnand %p2304_p3, %p2300_p4 }
   0xa   : > { %p2345_p7 = pneg %p2301_p5 }
   0xc   : > { %p2346_p8 = pnand %p2345_p7, %p2344_p6 }
   0xe   : > { %p2347_p9 = pneg %p2346_p8 }
  0x10   : > { %p2354_p13 = pnand %p2353_p12, %p2347_p9 }
  0x12   : > { %2357 = shalt.err (!%p2354_p13)
}
  0x13   : > { %s2370_s16 = smov [#allocation3]   ;;  %125 = sbr.rel (%p2407_p2) target bundleno = 644 (0x284), region = 28 }
  0x14   : > { %2303 = dma.vmem_to_smem (!%p2301_p5), %s105_s13, 32, %s2370_s16, [#allocation4]  }
  0x18   : > { %2363 = dma.done.wait (%p2304_p3), [#allocation4], 32  }
  0x19   : > { %2365 = vsyncadd (%p2304_p3), [#allocation4], 4294967264 }
  0x1a   : > { %131 = sfence }
  0x1b   : > { %p148_p0 = scmp.lt.s32.totalorder %s2400_s10, 1  ;;  %vm158_vm0 = vcmask 179200   ;;  %vm161_vm1 = vcmask 177152   ;;  %v2371_v0 = vmov 0.0   ;;  %s2372_s21 = smov 3   ;;  %vm186_vm2 = vcmask 154648  }
  0x1c   : > { %163 = vst.msk [vmem:[#allocation2 + $0x18] sm:$0xff] %vm158_vm0, %v2371_v0  ;;  %164 = vst.msk [vmem:[#allocation2 + $0x20] sm:$0xff] %vm158_vm0, %v2371_v0  ;;  %s2206_s22 = sld [smem:[#allocation3 + $0x1]]  ;;  %s2373_s26 = smov 127   ;;  %vm218_vm3 = vcmask 1046528   ;;  %vm253_vm4 = vcmask 1045504  }
  0x1d   : > { %159 = vst.msk [vmem:[#allocation2] sm:$0xff] %vm158_vm0, %v2371_v0  ;;  %160 = vst.msk [vmem:[#allocation2 + $0x8] sm:$0xff] %vm158_vm0, %v2371_v0  ;;  %s3706_s10 = smov (!%p148_p0, %s2400_s10), 1  ;;  %s2207_s23 = sld [smem:[#allocation3 + $0x81]]  ;;  %vm288_vm5 = vcmask 1044480   ;;  %vm323_vm6 = vcmask 1043456  }
  0x1e   : > { %165 = vst.msk [vmem:[#allocation2 + $0x28] sm:$0x3f] %vm161_vm1, %v2371_v0  ;;  %162 = vst.msk [vmem:[#allocation2 + $0x10] sm:$0x3f] %vm161_vm1, %v2371_v0  ;;  %s2294_s17 = sshll.u32 %s3706_s10, 5  ;;  %s2220_s24 = sld [smem:[#allocation3 + $0x2]] }
  0x1f   : > { %s152_s20 = scalar_lea.vmem %s3697_s1, %s2294_s17  ;;  %s2221_s25 = sld [smem:[#allocation3 + $0x82]]  ;;  %vm358_vm7 = vcmask 1042432   ;;  %vm393_vm8 = vcmask 1041408   ;;  %vm2112_vm9 = vcmask 130048  }
  0x20   : > { %v168_v1 = vld [vmem:[%s152_s20 + $0x10] sm:$0xff]  ;;  %v166_v2 = vld [vmem:[%s152_s20] sm:$0xff]  ;;  %v169_v3 = vld [vmem:[%s152_s20 + $0x18] sm:$0xff]  ;;  %s2442_s27 = sld [smem:[#allocation3 + $0x3]]  ;;  %s2374_s3 = smov 126  }
  0x21   : > { %178 = vrot.lane.b32.xlu1 %v168_v1, %s2372_s21  ;;  %174 = vrot.lane.b32.xlu0 %v166_v2, %s2372_s21  ;;  %v167_v4 = vld [vmem:[%s152_s20 + $0x8] sm:$0xff]  ;;  %s2446_s28 = sld [smem:[#allocation3 + $0x83]]  ;;  %s2375_s6 = smov 125  }
  0x22   : > { %v421_v9 = vstv %s2206_s22  ;;  %s2208_s29 = sld [smem:[#allocation3 + $0x8]] }
  0x23   : > { %v435_v11 = vstv %s2207_s23  ;;  %s2209_s30 = sld [smem:[#allocation3 + $0x88]] }
  0x24   : > { %v701_v18 = vstv %s2220_s24  ;;  %s2210_s4 = sld [smem:[#allocation3 + $0xf]] }
  0x25   : > { %180 = vrot.lane.b32.xlu1 %v169_v3, %s2372_s21  ;;  %176 = vrot.lane.b32.xlu0 %v167_v4, %s2372_s21  ;;  %v715_v21 = vstv %s2221_s25  ;;  %s2211_s5 = sld [smem:[#allocation3 + $0x8f]] }
  0x26   : > { %v981_v24 = vstv %s2442_s27  ;;  %s2212_s7 = sld [smem:[#allocation3 + $0x16]] }
  0x27   : > { %v995_v28 = vstv %s2446_s28  ;;  %s2213_s8 = sld [smem:[#allocation3 + $0x96]] }
  0x28   : > { %v449_v27 = vstv %s2208_s29  ;;  %s2214_s11 = sld [smem:[#allocation3 + $0x1d]] }
  0x29   : > { %v470_v30 = vstv %s2209_s30  ;;  %s2215_s12 = sld [smem:[#allocation3 + $0x9d]] }
  0x2a   : > { %v491_v41 = vstv %s2210_s4  ;;  %s2216_s13 = sld [smem:[#allocation3 + $0x24]] }
  0x2b   : > { %v512_v45 = vstv %s2211_s5  ;;  %s2217_s14 = sld [smem:[#allocation3 + $0xa4]] }
  0x2c   : > { %v533_v59 = vstv %s2212_s7  ;;  %s2218_s15 = sld [smem:[#allocation3 + $0x2b]] }
  0x2d   : > { %v554_v63 = vstv %s2213_s8  ;;  %s2219_s16 = sld [smem:[#allocation3 + $0xab]] }
  0x2e   : > { %s2222_s17 = sld [smem:[#allocation3 + $0x9]] }
  0x2f   : > { %s2223_s18 = sld [smem:[#allocation3 + $0x89]] }
  0x30   : > { %s2224_s19 = sld [smem:[#allocation3 + $0x10]] }
  0x31   : > { %s2225_s20 = sld [smem:[#allocation3 + $0x90]] }
  0x32   : > { %s2555_s21 = sld [smem:[#allocation3 + $0x17]] }
  0x33   : > { %s2559_s22 = sld [smem:[#allocation3 + $0x1e]] }
  0x34   : > { %s2563_s23 = sld [smem:[#allocation3 + $0x97]] }
  0x35   : > { %s2565_s24 = sld [smem:[#allocation3 + $0x25]] }
  0x36   : > { %s2568_s25 = sld [smem:[#allocation3 + $0x9e]] }
  0x37   : > { %s2573_s27 = sld [smem:[#allocation3 + $0x2c]] }
  0x38   : > { %s2578_s28 = sld [smem:[#allocation3 + $0xa5]] }
  0x39   : > { %s2580_s29 = sld [smem:[#allocation3]] }
  0x3a   : > { %s2584_s30 = sld [smem:[#allocation3 + $0x80]] }
  0x3b   : > { %s2593_s4 = sld [smem:[#allocation3 + $0xe]] }
  0x3c   : > { %s2596_s5 = sld [smem:[#allocation3 + $0x15]] }
  0x3d   : > { %s2602_s7 = sld [smem:[#allocation3 + $0x87]] }
  0x3e   : > { %s2605_s8 = sld [smem:[#allocation3 + $0x1c]] }
  0x93   : > { %v179_v5 = vpop.permute.xlu1 %178  ;;  %v175_v6 = vpop.permute.xlu0 %174 }
  0x94   : > { %189 = vst.msk [vmem:[#allocation2 + $0x1b] sm:$0xff] %vm186_vm2, %v179_v5  ;;  %187 = vst.msk [vmem:[#allocation2 + $0x3] sm:$0xff] %vm186_vm2, %v175_v6 }
  0x97   : > { %v181_v7 = vpop.permute.xlu1 %180  ;;  %v177_v8 = vpop.permute.xlu0 %176 }
  0x98   : > { %190 = vst.msk [vmem:[#allocation2 + $0x23] sm:$0xff] %vm186_vm2, %v181_v7  ;;  %188 = vst.msk [vmem:[#allocation2 + $0xb] sm:$0xff] %vm186_vm2, %v177_v8 }
  0x9b   : > { %v2430_v10 = vld [vmem:[#allocation2] sm:$0xff]  ;;  %v2433_v13 = vld [vmem:[#allocation2 + $0x18] sm:$0xff] }
  0x9c   : > { %v422_v12 = vmul.f32 %v421_v9, %v2430_v10  ;;  %v436_v14 = vmul.f32 %v435_v11, %v2433_v13  ;;  %v702_v19 = vmul.f32 %v701_v18, %v2430_v10  ;;  %v716_v22 = vmul.f32 %v715_v21, %v2433_v13 }
  0x9d   : > { %v982_v25 = vmul.f32 %v981_v24, %v2430_v10  ;;  %v450_v32 = vmul.f32 %v449_v27, %v2430_v10  ;;  %v996_v33 = vmul.f32 %v995_v28, %v2433_v13  ;;  %v471_v35 = vmul.f32 %v470_v30, %v2433_v13 }
  0x9e   : > { %426 = vrot.lane.b32.xlu0 %v422_v12, %s2373_s26  ;;  %v492_v50 = vmul.f32 %v491_v41, %v2430_v10  ;;  %v513_v52 = vmul.f32 %v512_v45, %v2433_v13  ;;  %v534_v4 = vmul.f32 %v533_v59, %v2430_v10  ;;  %v555_v7 = vmul.f32 %v554_v63, %v2433_v13 }
  0x9f   : > { %v2437_v15 = vld [vmem:[#allocation2 + $0x8] sm:$0xff]  ;;  %v2440_v17 = vld [vmem:[#allocation2 + $0x20] sm:$0xff]  ;;  %v2461_v31 = vld [vmem:[#allocation2 + $0x10] sm:$0x3f]  ;;  %v456_v40 = vrot.slane %v450_v32, 1  ;;  %v477_v43 = vrot.slane %v471_v35, 1 }
  0xa0   : > { %v423_v16 = vmul.f32 %v421_v9, %v2437_v15  ;;  %v437_v20 = vmul.f32 %v435_v11, %v2440_v17  ;;  %v703_v23 = vmul.f32 %v701_v18, %v2437_v15  ;;  %v717_v26 = vmul.f32 %v715_v21, %v2440_v17  ;;  %v2471_v39 = vld [vmem:[#allocation2 + $0x28] sm:$0x3f] }
  0xa1   : > { %v451_v29 = vmul.f32 %v449_v27, %v2437_v15  ;;  %v983_v34 = vmul.f32 %v981_v24, %v2437_v15  ;;  %v472_v37 = vmul.f32 %v470_v30, %v2440_v17  ;;  %v452_v38 = vmul.f32 %v449_v27, %v2461_v31 }
  0xa2   : > { %440 = vrot.lane.b32.xlu0 %v436_v14, %s2373_s26  ;;  %428 = vrot.lane.b32.xlu1 %v423_v16, %s2373_s26  ;;  %v997_v42 = vmul.f32 %v995_v28, %v2440_v17  ;;  %v493_v44 = vmul.f32 %v491_v41, %v2437_v15  ;;  %v473_v49 = vmul.f32 %v470_v30, %v2471_v39  ;;  %v498_v58 = vrot.slane %v492_v50, 2 }
  0xa3   : > { %v457_v36 = vrot.slane %v451_v29, 1  ;;  %v478_v47 = vrot.slane %v472_v37, 1  ;;  %v459_v48 = vrot.slane %v452_v38, 1  ;;  %v514_v53 = vmul.f32 %v512_v45, %v2440_v17 }
  0xa4   : > { %v499_v51 = vrot.slane %v493_v44, 2  ;;  %v480_v56 = vrot.slane %v473_v49, 1  ;;  %v494_v57 = vmul.f32 %v491_v41, %v2461_v31  ;;  %v519_v60 = vrot.slane %v513_v52, 2 }
  0xa5   : > { %v458_v46 = vsel %vm218_vm3, %v456_v40, %v457_v36  ;;  %v479_v54 = vsel %vm218_vm3, %v477_v43, %v478_v47  ;;  %v460_v55 = vsel %vm218_vm3, %v457_v36, %v459_v48  ;;  %v520_v61 = vrot.slane %v514_v53, 2 }
  0xa6   : > { %706 = vrot.lane.b32.xlu0 %v702_v19, %s2374_s3  ;;  %442 = vrot.lane.b32.xlu1 %v437_v20, %s2373_s26  ;;  %v535_v62 = vmul.f32 %v533_v59, %v2437_v15  ;;  %v500_v0 = vsel %vm253_vm4, %v498_v58, %v499_v51  ;;  %v481_v1 = vsel %vm218_vm3, %v478_v47, %v480_v56  ;;  %v501_v2 = vrot.slane %v494_v57, 2 }
  0xa7   : > { %v515_v3 = vmul.f32 %v512_v45, %v2471_v39  ;;  %v521_v5 = vsel %vm253_vm4, %v519_v60, %v520_v61  ;;  %v556_v11 = vmul.f32 %v554_v63, %v2440_v17  ;;  %v536_v12 = vmul.f32 %v533_v59, %v2461_v31 }
  0xa8   : > { %v541_v6 = vrot.slane %v535_v62, 3  ;;  %v502_v8 = vsel %vm253_vm4, %v499_v51, %v501_v2  ;;  %v540_v14 = vrot.slane %v534_v4, 3  ;;  %v575_v16 = vstv %s2214_s11  ;;  %s2610_s11 = sld [smem:[#allocation3 + $0x8e]] }
  0xa9   : > { %v522_v9 = vrot.slane %v515_v3, 2  ;;  %v561_v19 = vrot.slane %v555_v7, 3  ;;  %v577_v20 = vmul.f32 %v575_v16, %v2437_v15  ;;  %v596_v21 = vstv %s2215_s12  ;;  %s2612_s12 = sld [smem:[#allocation3 + $0x95]] }
  0xaa   : > { %720 = vrot.lane.b32.xlu0 %v716_v22, %s2374_s3  ;;  %708 = vrot.lane.b32.xlu1 %v703_v23, %s2374_s3  ;;  %v542_v18 = vsel %vm288_vm5, %v540_v14, %v541_v6  ;;  %v562_v23 = vrot.slane %v556_v11, 3  ;;  %v543_v24 = vrot.slane %v536_v12, 3  ;;  %v597_v27 = vmul.f32 %v596_v21, %v2433_v13 }
  0xab   : > { %v523_v22 = vsel %vm253_vm4, %v520_v61, %v522_v9  ;;  %v598_v28 = vmul.f32 %v596_v21, %v2440_v17  ;;  %v578_v29 = vmul.f32 %v575_v16, %v2461_v31  ;;  %v617_v36 = vstv %s2216_s13  ;;  %s2615_s13 = sld [smem:[#allocation3 + $0x23]] }
  0xac   : > { %v563_v30 = vsel %vm288_vm5, %v561_v19, %v562_v23  ;;  %v544_v32 = vsel %vm288_vm5, %v541_v6, %v543_v24  ;;  %v603_v37 = vrot.slane %v597_v27, 4  ;;  %v619_v41 = vmul.f32 %v617_v36, %v2437_v15 }
  0xad   : > { %v604_v38 = vrot.slane %v598_v28, 4  ;;  %v585_v40 = vrot.slane %v578_v29, 4  ;;  %v599_v44 = vmul.f32 %v596_v21, %v2471_v39  ;;  %v618_v45 = vmul.f32 %v617_v36, %v2430_v10 }
  0xae   : > { %986 = vrot.lane.b32.xlu0 %v982_v25, %s2375_s6  ;;  %722 = vrot.lane.b32.xlu1 %v717_v26, %s2374_s3  ;;  %v557_v25 = vmul.f32 %v554_v63, %v2471_v39  ;;  %v576_v26 = vmul.f32 %v575_v16, %v2430_v10  ;;  %v625_v49 = vrot.slane %v619_v41, 5  ;;  %v620_v53 = vmul.f32 %v617_v36, %v2461_v31 }
  0xaf   : > { %v605_v47 = vsel %vm323_vm6, %v603_v37, %v604_v38  ;;  %v606_v50 = vrot.slane %v599_v44, 4  ;;  %v680_v59 = vstv %s2219_s16  ;;  %v729_v9 = vstv %s2222_s17  ;;  %s2628_s16 = sld [smem:[#allocation3 + $0xa3]] }
  0xb0   : > { %v582_v35 = vrot.slane %v576_v26, 4  ;;  %v627_v63 = vrot.slane %v620_v53, 5  ;;  %v681_v3 = vmul.f32 %v680_v59, %v2433_v13  ;;  %v682_v6 = vmul.f32 %v680_v59, %v2440_v17  ;;  %s2633_s17 = sld [smem:[#allocation3 + $0xaa]] }
  0xb1   : > { %v607_v60 = vsel %vm323_vm6, %v604_v38, %v606_v50  ;;  %v750_v16 = vstv %s2223_s18  ;;  %v683_v21 = vmul.f32 %v680_v59, %v2471_v39  ;;  %s2637_s18 = sld [smem:[#allocation3 + $0xac]] }
  0xb2   : > { %1000 = vrot.lane.b32.xlu0 %v996_v33, %s2375_s6  ;;  %988 = vrot.lane.b32.xlu1 %v983_v34, %s2375_s6  ;;  %v583_v33 = vrot.slane %v577_v20, 4  ;;  %v564_v34 = vrot.slane %v557_v25, 3  ;;  %v687_v14 = vrot.slane %v681_v3, 6  ;;  %v731_v20 = vmul.f32 %v729_v9, %v2437_v15 }
  0xb3   : > { %v752_v24 = vmul.f32 %v750_v16, %v2440_v17  ;;  %v732_v25 = vmul.f32 %v729_v9, %v2461_v31  ;;  %v690_v29 = vrot.slane %v683_v21, 6 }
  0xb4   : > { %v565_v43 = vsel %vm288_vm5, %v562_v23, %v564_v34  ;;  %v586_v48 = vsel %vm323_vm6, %v583_v33, %v585_v40  ;;  %v751_v23 = vmul.f32 %v750_v16, %v2433_v13  ;;  %v737_v28 = vrot.slane %v731_v20, 1 }
  0xb5   : > { %v758_v34 = vrot.slane %v752_v24, 1  ;;  %v753_v40 = vmul.f32 %v750_v16, %v2471_v39  ;;  %v2646_v20 = vstv %s2573_s27  ;;  %v918_v24 = vstv %s2578_s28  ;;  %s2689_s27 = sld [smem:[#allocation3 + $0x26]] }
  0xb6   : > { %461 = vrot.lane.b32.xlu0 %v458_v46, %s2373_s26  ;;  %1002 = vrot.lane.b32.xlu1 %v997_v42, %s2375_s6  ;;  %v584_v42 = vsel %vm323_vm6, %v582_v35, %v583_v33  ;;  %v638_v46 = vstv %s2217_s14  ;;  %v757_v33 = vrot.slane %v751_v23, 1  ;;  %v739_v35 = vrot.slane %v732_v25, 1  ;;  %s2621_s14 = sld [smem:[#allocation3 + $0x2a]] }
  0xb7   : > { %v639_v51 = vmul.f32 %v638_v46, %v2433_v13  ;;  %v640_v52 = vmul.f32 %v638_v46, %v2440_v17  ;;  %v641_v58 = vmul.f32 %v638_v46, %v2471_v39  ;;  %v760_v46 = vrot.slane %v753_v40, 1  ;;  %s2700_s28 = sld [smem:[#allocation3 + $0x9f]] }
  0xb8   : > { %v740_v44 = vsel %vm218_vm3, %v737_v28, %v739_v35  ;;  %v2675_v35 = vstv %s2596_s5  ;;  %s2744_s5 = sld [smem:[#allocation3 + $0xad]] }
  0xb9   : > { %v645_v61 = vrot.slane %v639_v51, 5  ;;  %v646_v62 = vrot.slane %v640_v52, 5  ;;  %v648_v2 = vrot.slane %v641_v58, 5  ;;  %v813_v51 = vstv %s2555_s21  ;;  %s2656_s21 = sld [smem:[#allocation3 + $0x18]] }
  0xba   : > { %482 = vrot.lane.b32.xlu0 %v479_v54, %s2373_s26  ;;  %463 = vrot.lane.b32.xlu1 %v460_v55, %s2373_s26  ;;  %v624_v54 = vrot.slane %v618_v45, 5  ;;  %v659_v55 = vstv %s2218_s15  ;;  %v815_v53 = vmul.f32 %v813_v51, %v2437_v15  ;;  %v816_v3 = vmul.f32 %v813_v51, %v2461_v31  ;;  %s2625_s15 = sld [smem:[#allocation3 + $0x9c]] }
  0xbb   : > { %v661_v57 = vmul.f32 %v659_v55, %v2437_v15  ;;  %v647_v4 = vsel %vm358_vm7, %v645_v61, %v646_v62  ;;  %v662_v7 = vmul.f32 %v659_v55, %v2461_v31  ;;  %v649_v12 = vsel %vm358_vm7, %v646_v62, %v648_v2 }
  0xbc   : > { %v626_v56 = vsel %vm358_vm7, %v624_v54, %v625_v49  ;;  %v821_v61 = vrot.slane %v815_v53, 3 }
  0xbd   : > { %v669_v19 = vrot.slane %v662_v7, 6 }
  0xbe   : > { %503 = vrot.lane.b32.xlu0 %v500_v0, %s2373_s26  ;;  %484 = vrot.lane.b32.xlu1 %v481_v1, %s2373_s26  ;;  %v660_v0 = vmul.f32 %v659_v55, %v2430_v10  ;;  %v667_v1 = vrot.slane %v661_v57, 6  ;;  %v834_v55 = vstv %s2563_s23  ;;  %s2666_s23 = sld [smem:[#allocation3 + $0x91]] }
  0xbf   : > { %v836_v2 = vmul.f32 %v834_v55, %v2440_v17  ;;  %v837_v16 = vmul.f32 %v834_v55, %v2471_v39 }
  0xc0   : > { %v670_v27 = vsel %vm393_vm8, %v667_v1, %v669_v19  ;;  %v897_v19 = vstv %s2565_s24  ;;  %s2677_s24 = sld [smem:[#allocation3 + $0x1f]] }
  0xc1   : > { %v899_v40 = vmul.f32 %v897_v19, %v2437_v15 }
  0xc2   : > { %524 = vrot.lane.b32.xlu0 %v521_v5, %s2373_s26  ;;  %505 = vrot.lane.b32.xlu1 %v502_v8, %s2373_s26  ;;  %v628_v5 = vsel %vm358_vm7, %v625_v49, %v627_v63  ;;  %v666_v8 = vrot.slane %v660_v0, 6  ;;  %v835_v63 = vmul.f32 %v834_v55, %v2433_v13  ;;  %v2719_v55 = vstv %s2628_s16  ;;  %s3306_s16 = sld [smem:[#allocation3 + $0x27]] }
  0xc4   : > { %v668_v11 = vsel %vm393_vm8, %v666_v8, %v667_v1  ;;  %v841_v8 = vrot.slane %v835_v63, 3 }
  0xc6   : > { %545 = vrot.lane.b32.xlu0 %v542_v18, %s2373_s26  ;;  %526 = vrot.lane.b32.xlu1 %v523_v22, %s2373_s26  ;;  %v688_v18 = vrot.slane %v682_v6, 6  ;;  %v730_v22 = vmul.f32 %v729_v9, %v2430_v10  ;;  %v876_v9 = vstv %s2568_s25  ;;  %s2681_s25 = sld [smem:[#allocation3 + $0x98]] }
  0xc7   : > { %v877_v21 = vmul.f32 %v876_v9, %v2433_v13 }
  0xc8   : > { %v689_v26 = vsel %vm393_vm8, %v687_v14, %v688_v18  ;;  %v691_v38 = vsel %vm393_vm8, %v688_v18, %v690_v29  ;;  %v199_v29 = vstv %s2580_s29  ;;  %s3162_s29 = sld [smem:[#allocation3 + $0xb]] }
  0xca   : > { %566 = vrot.lane.b32.xlu0 %v563_v30, %s2373_s26  ;;  %547 = vrot.lane.b32.xlu1 %v544_v32, %s2373_s26  ;;  %v736_v30 = vrot.slane %v730_v22, 1  ;;  %v771_v32 = vstv %s2224_s19  ;;  %s2641_s19 = sld [smem:[#allocation3 + $0xa]]  ;;  %v2652_v22 = vmul.f32 %v876_v9, %v2440_v17 }
  0xcb   : > { %v773_v36 = vmul.f32 %v771_v32, %v2437_v15  ;;  %v772_v41 = vmul.f32 %v771_v32, %v2430_v10  ;;  %v774_v49 = vmul.f32 %v771_v32, %v2461_v31 }
  0xcc   : > { %v738_v37 = vsel %vm218_vm3, %v736_v30, %v737_v28  ;;  %v844_v28 = vrot.slane %v837_v16, 3  ;;  %v205_v30 = vstv %s2584_s30  ;;  %v2762_v16 = vstv %s2677_s24  ;;  %s3168_s30 = sld [smem:[#allocation3 + $0x84]] }
  0xcd   : > { %v779_v45 = vrot.slane %v773_v36, 2  ;;  %v778_v50 = vrot.slane %v772_v41, 2  ;;  %v781_v59 = vrot.slane %v774_v49, 2  ;;  %v883_v36 = vrot.slane %v877_v21, 4  ;;  %s3417_s24 = sld [smem:[#allocation3 + $0x13]] }
  0xce   : > { %587 = vrot.lane.b32.xlu0 %v584_v42, %s2373_s26  ;;  %568 = vrot.lane.b32.xlu1 %v565_v43, %s2373_s26  ;;  %v792_v42 = vstv %s2225_s20  ;;  %v759_v43 = vsel %vm218_vm3, %v757_v33, %v758_v34  ;;  %s2648_s20 = sld [smem:[#allocation3 + $0x11]]  ;;  %v2706_v49 = vstv %s2625_s15 }
  0xcf   : > { %v780_v52 = vsel %vm253_vm4, %v778_v50, %v779_v45  ;;  %v795_v54 = vmul.f32 %v792_v42, %v2471_v39  ;;  %v782_v1 = vsel %vm253_vm4, %v779_v45, %v781_v59  ;;  %v898_v45 = vmul.f32 %v897_v19, %v2430_v10  ;;  %s3285_s15 = sld [smem:[#allocation3 + $0xa0]] }
  0xd0   : > { %v2709_v50 = vstv %s2615_s13  ;;  %v900_v59 = vmul.f32 %v897_v19, %v2461_v31  ;;  %v2733_v63 = vstv %s2641_s19  ;;  %v2769_v19 = vstv %s2700_s28  ;;  %s3239_s13 = sld [smem:[#allocation3 + $0x99]] }
  0xd1   : > { %v802_v62 = vrot.slane %v795_v54, 2  ;;  %v905_v54 = vrot.slane %v899_v40, 5  ;;  %v2772_v21 = vstv %s2689_s27  ;;  %v206_v40 = vmul.f32 %v205_v30, %v2433_v13  ;;  %s3356_s19 = sld [smem:[#allocation3 + $0xae]] }
  0xd2   : > { %608 = vrot.lane.b32.xlu0 %v605_v47, %s2373_s26  ;;  %589 = vrot.lane.b32.xlu1 %v586_v48, %s2373_s26  ;;  %v793_v47 = vmul.f32 %v792_v42, %v2433_v13  ;;  %v794_v48 = vmul.f32 %v792_v42, %v2440_v17  ;;  %s3428_s27 = sld [smem:[#allocation3 + $0x93]] }
  0xd3   : > { %s3442_s28 = sld [smem:[#allocation3 + $0x1a]] }
  0xd4   : > { %v799_v57 = vrot.slane %v793_v47, 2  ;;  %v800_v58 = vrot.slane %v794_v48, 2  ;;  %v2698_v47 = vstv %s2605_s8  ;;  %v2703_v48 = vstv %s2612_s12  ;;  %s3187_s8 = sld [smem:[#allocation3 + $0x12]]  ;;  %s2376_s12 = smov 124  }
  0xd6   : > { %629 = vrot.lane.b32.xlu0 %v626_v56, %s2373_s26  ;;  %610 = vrot.lane.b32.xlu1 %v607_v60, %s2373_s26  ;;  %v761_v56 = vsel %vm218_vm3, %v758_v34, %v760_v46  ;;  %v814_v60 = vmul.f32 %v813_v51, %v2430_v10  ;;  %v801_v0 = vsel %vm253_vm4, %v799_v57, %v800_v58  ;;  %v2672_v34 = vstv %s2593_s4  ;;  %s2730_s4 = sld [smem:[#allocation3 + $0xa6]] }
  0xd7   : > { %v803_v7 = vsel %vm253_vm4, %v800_v58, %v802_v62  ;;  %v2695_v46 = vstv %s2610_s11  ;;  %v2712_v51 = vstv %s2621_s14  ;;  %v919_v57 = vmul.f32 %v918_v24, %v2433_v13  ;;  %s3202_s11 = sld [smem:[#allocation3 + $0x92]] }
  0xd8   : > { %v920_v58 = vmul.f32 %v918_v24, %v2440_v17  ;;  %v960_v62 = vstv %s2637_s18  ;;  %s3268_s14 = sld [smem:[#allocation3 + $0x20]] }
  0xd9   : > { %s3349_s18 = sld [smem:[#allocation3 + $0x2e]] }
  0xda   : > { %650 = vrot.lane.b32.xlu0 %v647_v4, %s2373_s26  ;;  %631 = vrot.lane.b32.xlu1 %v628_v5, %s2373_s26  ;;  %v820_v4 = vrot.slane %v814_v60, 3  ;;  %v855_v5 = vstv %s2559_s22  ;;  %s2660_s22 = sld [smem:[#allocation3 + $0x8a]]  ;;  %v904_v60 = vrot.slane %v898_v45, 5  ;;  %v2804_v45 = vstv %s2744_s5 }
  0xdb   : > { %v857_v14 = vmul.f32 %v855_v5, %v2437_v15  ;;  %v856_v18 = vmul.f32 %v855_v5, %v2430_v10  ;;  %v858_v23 = vmul.f32 %v855_v5, %v2461_v31  ;;  %v921_v5 = vmul.f32 %v918_v24, %v2471_v39  ;;  %s3467_s5 = sld [smem:[#allocation3 + $0xa1]] }
  0xdc   : > { %v822_v6 = vsel %vm288_vm5, %v820_v4, %v821_v61  ;;  %v941_v4 = vmul.f32 %v2646_v20, %v2437_v15 }
  0xdd   : > { %v862_v32 = vrot.slane %v856_v18, 4  ;;  %v928_v24 = vrot.slane %v921_v5, 5  ;;  %v247_v5 = vmul.f32 %v2672_v34, %v2430_v10 }
  0xde   : > { %671 = vrot.lane.b32.xlu0 %v668_v11, %s2373_s26  ;;  %652 = vrot.lane.b32.xlu1 %v649_v12, %s2373_s26  ;;  %v842_v11 = vrot.slane %v836_v2, 3  ;;  %v823_v12 = vrot.slane %v816_v3, 3  ;;  %v2742_v2 = vstv %s2656_s21  ;;  %v906_v3 = vsel %vm358_vm7, %v904_v60, %v905_v54  ;;  %s3396_s21 = sld [smem:[#allocation3 + $0xc]] }
  0xdf   : > { %v963_v60 = vmul.f32 %v960_v62, %v2471_v39 }
  0xe0   : > { %v843_v25 = vsel %vm288_vm5, %v841_v8, %v842_v11  ;;  %v845_v42 = vsel %vm288_vm5, %v842_v11, %v844_v28  ;;  %v925_v8 = vrot.slane %v919_v57, 5  ;;  %v907_v11 = vrot.slane %v900_v59, 5 }
  0xe1   : > { %v1011_v59 = vmul.f32 %v2733_v63, %v2437_v15 }
  0xe2   : > { %692 = vrot.lane.b32.xlu0 %v689_v26, %s2373_s26  ;;  %673 = vrot.lane.b32.xlu1 %v670_v27, %s2373_s26  ;;  %v824_v26 = vsel %vm288_vm5, %v821_v61, %v823_v12  ;;  %v863_v27 = vrot.slane %v857_v14, 4  ;;  %v2727_v61 = vstv %s2633_s17  ;;  %v940_v12 = vmul.f32 %v2646_v20, %v2430_v10  ;;  %s3322_s17 = sld [smem:[#allocation3 + $0xa7]] }
  0xe3   : > { %v2759_v14 = vstv %s2681_s25  ;;  %v908_v28 = vsel %vm358_vm7, %v905_v54, %v907_v11  ;;  %v1010_v11 = vmul.f32 %v2733_v63, %v2430_v10  ;;  %s2377_s25 = smov 123  }
  0xe4   : > { %v864_v41 = vsel %vm323_vm6, %v862_v32, %v863_v27 }
  0xe6   : > { %741 = vrot.lane.b32.xlu0 %v738_v37, %s2374_s3  ;;  %694 = vrot.lane.b32.xlu1 %v691_v38, %s2373_s26  ;;  %s2589_s26 = sld [smem:[#allocation3 + $0x7]]  ;;  %v884_v37 = vrot.slane %v2652_v22, 4  ;;  %v865_v38 = vrot.slane %v858_v23, 4  ;;  %v947_v23 = vrot.slane %v941_v4, 6 }
  0xe8   : > { %v866_v53 = vsel %vm323_vm6, %v863_v27, %v865_v38  ;;  %v200_v38 = vmul.f32 %v199_v29, %v2430_v10 }
  0xea   : > { %762 = vrot.lane.b32.xlu0 %v759_v43, %s2374_s3  ;;  %743 = vrot.lane.b32.xlu1 %v740_v44, %s2374_s3  ;;  %v879_v43 = vmul.f32 %v876_v9, %v2471_v39  ;;  %v2687_v44 = vstv %s2602_s7  ;;  %v926_v9 = vrot.slane %v920_v58, 5  ;;  %s3176_s7 = sld [smem:[#allocation3 + $0x8b]] }
  0xec   : > { %v2669_v33 = vstv %s2589_s26  ;;  %s2714_s26 = sld [smem:[#allocation3 + $0x2d]]  ;;  %v927_v27 = vsel %vm358_vm7, %v925_v8, %v926_v9 }
  0xed   : > { %v2766_v18 = vmul.f32 %v2669_v33, %v2437_v15  ;;  %v212_v32 = vmul.f32 %v2669_v33, %v2430_v10 }
  0xee   : > { %783 = vrot.lane.b32.xlu0 %v780_v52, %s2374_s3  ;;  %764 = vrot.lane.b32.xlu1 %v761_v56, %s2374_s3  ;;  %v885_v52 = vsel %vm323_vm6, %v883_v36, %v884_v37  ;;  %v886_v56 = vrot.slane %v879_v43, 4  ;;  %v942_v36 = vmul.f32 %v2646_v20, %v2461_v31  ;;  %v2798_v43 = vmul.f32 %v2687_v44, %v2440_v17 }
  0xef   : > { %v2801_v20 = vstv %s2730_s4  ;;  %v219_v57 = vrot.slane %v212_v32, 1  ;;  %v1017_v32 = vrot.slane %v1011_v59, 1  ;;  %s3463_s4 = sld [smem:[#allocation3 + $0x21]] }
  0xf0   : > { %v949_v58 = vrot.slane %v942_v36, 6  ;;  %v970_v36 = vrot.slane %v963_v60, 6 }
  0xf2   : > { %804 = vrot.lane.b32.xlu0 %v801_v0, %s2374_s3  ;;  %785 = vrot.lane.b32.xlu1 %v782_v1, %s2374_s3  ;;  %v2736_v0 = vstv %s2660_s22  ;;  %v2739_v1 = vstv %s2648_s20  ;;  %s3389_s20 = sld [smem:[#allocation3 + $0x5]] }
  0xf3   : > { %v2775_v22 = vstv %s2714_s26  ;;  %s3400_s22 = sld [smem:[#allocation3 + $0x85]] }
  0xf4   : > { %s3445_s26 = sld [smem:[#allocation3 + $0x9a]] }
  0xf6   : > { %825 = vrot.lane.b32.xlu0 %v822_v6, %s2374_s3  ;;  %806 = vrot.lane.b32.xlu1 %v803_v7, %s2374_s3  ;;  %v2751_v6 = vstv %s2666_s23  ;;  %v887_v7 = vsel %vm323_vm6, %v884_v37, %v886_v56  ;;  %v946_v37 = vrot.slane %v940_v12, 6  ;;  %v2829_v12 = vmul.f32 %v2695_v46, %v2440_v17  ;;  %s2265_s23 = sld [smem:[#allocation3 + $0x8c]] }
  0xfa   : > { %846 = vrot.lane.b32.xlu0 %v843_v25, %s2374_s3  ;;  %827 = vrot.lane.b32.xlu1 %v824_v26, %s2374_s3  ;;  %v961_v25 = vmul.f32 %v960_v62, %v2433_v13  ;;  %v962_v26 = vmul.f32 %v960_v62, %v2440_v17  ;;  %v265_v62 = vmul.f32 %v2695_v46, %v2433_v13 }
  0xfc   : > { %v967_v54 = vrot.slane %v961_v25, 6  ;;  %v968_v56 = vrot.slane %v962_v26, 6  ;;  %v1031_v26 = vmul.f32 %v2736_v0, %v2433_v13 }
  0xfe   : > { %867 = vrot.lane.b32.xlu0 %v864_v41, %s2374_s3  ;;  %848 = vrot.lane.b32.xlu1 %v845_v42, %s2374_s3  ;;  %v230_v41 = vmul.f32 %v2687_v44, %v2433_v13  ;;  %v220_v42 = vrot.slane %v2766_v18, 1  ;;  %v969_v25 = vsel %vm393_vm8, %v967_v54, %v968_v56  ;;  %v1016_v54 = vrot.slane %v1010_v11, 1 }
  0xff   : > { %v1037_v60 = vrot.slane %v1031_v26, 1  ;;  %v3699_v11 = vrot.slane %v2829_v12, 2  ;;  %v201_v26 = vmul.f32 %v199_v29, %v2437_v15  ;;  %v1075_v18 = vmul.f32 %v2751_v6, %v2471_v39 }
 0x100   : > { %v236_v4 = vrot.slane %v230_v41, 1  ;;  %v221_v8 = vsel %vm218_vm3, %v219_v57, %v220_v42  ;;  %v2857_v57 = vmul.f32 %v2675_v35, %v2437_v15 }
 0x102   : > { %888 = vrot.lane.b32.xlu0 %v885_v52, %s2374_s3  ;;  %869 = vrot.lane.b32.xlu1 %v866_v53, %s2374_s3  ;;  %v948_v52 = vsel %vm393_vm8, %v946_v37, %v947_v23  ;;  %v929_v53 = vsel %vm358_vm7, %v926_v9, %v928_v24  ;;  %v237_v9 = vrot.slane %v2798_v43, 1  ;;  %v1012_v37 = vmul.f32 %v2733_v63, %v2461_v31 }
 0x103   : > { %v214_v63 = vmul.f32 %v2669_v33, %v2461_v31  ;;  %v971_v33 = vsel %vm393_vm8, %v968_v56, %v970_v36  ;;  %v1082_v43 = vrot.slane %v1075_v18, 2 }
 0x105   : > { %v222_v36 = vrot.slane %v214_v63, 1  ;;  %v1074_v63 = vmul.f32 %v2751_v6, %v2440_v17 }
 0x106   : > { %909 = vrot.lane.b32.xlu0 %v906_v3, %s2374_s3  ;;  %890 = vrot.lane.b32.xlu1 %v887_v7, %s2374_s3  ;;  %v208_v3 = vadd.f32 %v206_v40, %v200_v38  ;;  %v2817_v7 = vmul.f32 %v2672_v34, %v2437_v15  ;;  %v254_v40 = vrot.slane %v247_v5, 2  ;;  %v1018_v5 = vsel %vm218_vm3, %v1016_v54, %v1017_v32 }
 0x108   : > { %v226_v38 = vadd.f32 %v221_v8, %v208_v3  ;;  %v3700_v41 = vrot.slane %v2817_v7, 2  ;;  %v1019_v8 = vrot.slane %v1012_v37, 1 }
 0x10a   : > { %930 = vrot.lane.b32.xlu0 %v927_v27, %s2374_s3  ;;  %911 = vrot.lane.b32.xlu1 %v908_v28, %s2374_s3  ;;  %v2838_v27 = vmul.f32 %v2736_v0, %v2440_v17  ;;  %v950_v28 = vsel %vm393_vm8, %v947_v23, %v949_v58  ;;  %v238_v23 = vsel %vm218_vm3, %v236_v4, %v237_v9 }
 0x10b   : > { %v2866_v4 = vmul.f32 %v2739_v1, %v2437_v15  ;;  %v243_v56 = vadd.f32 %v238_v23, %v226_v38  ;;  %v1073_v38 = vmul.f32 %v2751_v6, %v2433_v13  ;;  %v267_v6 = vmul.f32 %v2695_v46, %v2471_v39 }
 0x10c   : > { %v1038_v3 = vrot.slane %v2838_v27, 1  ;;  %v1052_v27 = vmul.f32 %v2739_v1, %v2430_v10 }
 0x10e   : > { %951 = vrot.lane.b32.xlu0 %v948_v52, %s2374_s3  ;;  %932 = vrot.lane.b32.xlu1 %v929_v53, %s2374_s3  ;;  %v2846_v52 = vmul.f32 %v2675_v35, %v2430_v10  ;;  %v271_v53 = vrot.slane %v265_v62, 2  ;;  %v1033_v62 = vmul.f32 %v2736_v0, %v2471_v39  ;;  %v2886_v0 = vmul.f32 %v2703_v48, %v2433_v13 }
 0x10f   : > { %v1039_v54 = vsel %vm218_vm3, %v1037_v60, %v1038_v3 }
 0x110   : > { %v2831_v24 = vpop.permute.xlu0 %426  ;;  %v1040_v23 = vrot.slane %v1033_v62, 1  ;;  %v2909_v60 = vsel %vm253_vm4, %v271_v53, %v3699_v11  ;;  %v223_v53 = vsel %vm218_vm3, %v220_v42, %v222_v36  ;;  %v2938_v36 = vmul.f32 %v2698_v47, %v2430_v10 }
 0x112   : > { %972 = vrot.lane.b32.xlu0 %v969_v25, %s2374_s3  ;;  %953 = vrot.lane.b32.xlu1 %v950_v28, %s2374_s3  ;;  %v207_v25 = vmul.f32 %v205_v30, %v2440_v17  ;;  %v289_v28 = vrot.slane %v2846_v52, 3  ;;  %v232_v30 = vmul.f32 %v2687_v44, %v2471_v39  ;;  %v1020_v52 = vsel %vm218_vm3, %v1017_v32, %v1019_v8 }
 0x113   : > { %v1054_v44 = vmul.f32 %v2739_v1, %v2461_v31  ;;  %v1058_v32 = vrot.slane %v1052_v27, 2  ;;  %v290_v8 = vrot.slane %v2857_v57, 3  ;;  %v2916_v1 = vmul.f32 %v2703_v48, %v2440_v17 }
 0x114   : > { %v2859_v58 = vpop.permute.xlu1 %428  ;;  %v2861_v59 = vpop.permute.xlu0 %440  ;;  %v239_v62 = vrot.slane %v232_v30, 1  ;;  %v1041_v11 = vsel %vm218_vm3, %v1038_v3, %v1040_v23  ;;  %v2942_v30 = vmul.f32 %v2698_v47, %v2437_v15  ;;  %v1159_v57 = vmul.f32 %v2769_v19, %v2471_v39 }
 0x116   : > { %1021 = vrot.lane.b32.xlu0 %v1018_v5, %s2375_s6  ;;  %974 = vrot.lane.b32.xlu1 %v971_v33, %s2374_s3  ;;  %v1059_v5 = vrot.slane %v2866_v4, 2  ;;  %v256_v33 = vsel %vm253_vm4, %v254_v40, %v3700_v41  ;;  %v209_v4 = vadd.f32 %v207_v25, %v201_v26  ;;  %v249_v40 = vmul.f32 %v2672_v34, %v2461_v31  ;;  %s3150_s3 = sld [smem:[#allocation3 + $0x4]] }
 0x117   : > { %v1080_v41 = vrot.slane %v1074_v63, 2  ;;  %v1061_v34 = vrot.slane %v1054_v44, 2  ;;  %v261_v3 = vadd.f32 %v256_v33, %v243_v56  ;;  %v1094_v63 = vmul.f32 %v2742_v2, %v2430_v10 }
 0x118   : > { %v2890_v37 = vpop.permute.xlu1 %442  ;;  %v2892_v29 = vpop.permute.xlu0 %706  ;;  %v1060_v27 = vsel %vm253_vm4, %v1058_v32, %v1059_v5  ;;  %v257_v23 = vrot.slane %v249_v40, 2  ;;  %v240_v44 = vsel %vm218_vm3, %v237_v9, %v239_v62  ;;  %v2962_v56 = vmul.f32 %v2759_v14, %v2440_v17 }
 0x119   : > { %v1062_v33 = vsel %vm253_vm4, %v1059_v5, %v1061_v34  ;;  %v1096_v9 = vmul.f32 %v2742_v2, %v2461_v31  ;;  %v307_v40 = vrot.slane %v2916_v1, 3  ;;  %v2975_v62 = vmul.f32 %v2706_v49, %v2440_v17  ;;  %v3093_v1 = vld [vmem:[#allocation2 + $0x10] sm:$0x3f] }
 0x11a   : > { %1042 = vrot.lane.b32.xlu0 %v1039_v54, %s2375_s6  ;;  %1023 = vrot.lane.b32.xlu1 %v1020_v52, %s2375_s6  ;;  %v1079_v54 = vrot.slane %v1073_v38, 2  ;;  %v2930_v52 = vmul.f32 %v2742_v2, %v2437_v15  ;;  %v227_v38 = vadd.f32 %v223_v53, %v209_v4  ;;  %v2971_v53 = vmul.f32 %v2706_v49, %v2433_v13 }
 0x11b   : > { %v291_v5 = vsel %vm288_vm5, %v289_v28, %v290_v8  ;;  %v274_v2 = vrot.slane %v267_v6, 2  ;;  %v1103_v6 = vrot.slane %v1096_v9, 3 }
 0x11c   : > { %v2923_v25 = vpop.permute.xlu1 %708  ;;  %v2925_v26 = vpop.permute.xlu0 %720  ;;  %v1101_v4 = vrot.slane %v2930_v52, 3  ;;  %v1081_v46 = vsel %vm253_vm4, %v1079_v54, %v1080_v41  ;;  %v284_v54 = vmul.f32 %v2675_v35, %v2461_v31  ;;  %v1100_v52 = vrot.slane %v1094_v63, 3 }
 0x11d   : > { %v1083_v35 = vsel %vm253_vm4, %v1080_v41, %v1082_v43  ;;  %v325_v63 = vrot.slane %v2942_v30, 4  ;;  %v3703_v43 = vrot.slane %v2829_v12, 2 }
 0x11e   : > { %1063 = vrot.lane.b32.xlu0 %v1060_v27, %s2375_s6  ;;  %1044 = vrot.lane.b32.xlu1 %v1041_v11, %s2375_s6  ;;  %v1115_v11 = vmul.f32 %v2759_v14, %v2433_v13  ;;  %v244_v27 = vadd.f32 %v240_v44, %v227_v38  ;;  %v3702_v13 = vrot.slane %v2817_v7, 2  ;;  %v1122_v44 = vrot.slane %v2962_v56, 3  ;;  %v3007_v56 = vld [vmem:[#allocation2] sm:$0xff] }
 0x11f   : > { %v1102_v28 = vsel %vm288_vm5, %v1100_v52, %v1101_v4  ;;  %v1117_v7 = vmul.f32 %v2759_v14, %v2471_v39  ;;  %v3011_v41 = vmul.f32 %v3007_v56, %v2709_v50  ;;  %v292_v14 = vrot.slane %v284_v54, 3 }
 0x120   : > { %v2953_v32 = vpop.permute.xlu1 %722  ;;  %v2955_v42 = vpop.permute.xlu0 %986  ;;  %v258_v34 = vsel %vm253_vm4, %v3702_v13, %v257_v23  ;;  %v1121_v38 = vrot.slane %v1115_v11, 3  ;;  %v324_v23 = vrot.slane %v2938_v36, 4  ;;  %v278_v11 = vadd.f32 %v2909_v60, %v261_v3  ;;  %v3024_v3 = vld [vmem:[#allocation2 + $0x18] sm:$0xff] }
 0x121   : > { %v302_v36 = vmul.f32 %v2703_v48, %v2471_v39  ;;  %v275_v9 = vsel %vm253_vm4, %v3703_v43, %v274_v2  ;;  %v1157_v54 = vmul.f32 %v3024_v3, %v2769_v19  ;;  %v1104_v13 = vsel %vm288_vm5, %v1101_v4, %v1103_v6 }
 0x122   : > { %1084 = vrot.lane.b32.xlu0 %v1081_v46, %s2375_s6  ;;  %1065 = vrot.lane.b32.xlu1 %v1062_v33, %s2375_s6  ;;  %v2994_v46 = vmul.f32 %v2762_v16, %v2437_v15  ;;  %v262_v33 = vadd.f32 %v258_v34, %v244_v27  ;;  %v1136_v15 = vmul.f32 %v2762_v16, %v2430_v10  ;;  %v1124_v48 = vrot.slane %v1117_v7, 3  ;;  %v3029_v34 = vld [vmem:[#allocation2 + $0x20] sm:$0xff] }
 0x123   : > { %v1123_v10 = vsel %vm288_vm5, %v1121_v38, %v1122_v44  ;;  %v1158_v12 = vmul.f32 %v3029_v34, %v2769_v19  ;;  %v1138_v2 = vmul.f32 %v2762_v16, %v2461_v31  ;;  %v3704_v38 = vrot.slane %v2886_v0, 3 }
 0x124   : > { %v2987_v17 = vpop.permute.xlu1 %988  ;;  %v2989_v18 = vpop.permute.xlu0 %1000  ;;  %v1143_v60 = vrot.slane %v2994_v46, 4  ;;  %v1142_v4 = vrot.slane %v1136_v15, 4  ;;  %v296_v6 = vadd.f32 %v291_v5, %v278_v11  ;;  %v326_v7 = vsel %vm323_vm6, %v324_v23, %v325_v63  ;;  %v3056_v5 = vld [vmem:[#allocation2 + $0x8] sm:$0xff] }
 0x125   : > { %v308_v46 = vsel %vm288_vm5, %v3704_v38, %v307_v40  ;;  %v309_v16 = vrot.slane %v302_v36, 3  ;;  %v319_v43 = vmul.f32 %v2698_v47, %v2461_v31  ;;  %v293_v0 = vsel %vm288_vm5, %v290_v8, %v292_v14 }
 0x126   : > { %1105 = vrot.lane.b32.xlu0 %v1102_v28, %s2375_s6  ;;  %1086 = vrot.lane.b32.xlu1 %v1083_v35, %s2375_s6  ;;  %v341_v28 = vrot.slane %v2971_v53, 4  ;;  %v279_v35 = vadd.f32 %v275_v9, %v262_v33  ;;  %v1144_v9 = vsel %vm323_vm6, %v1142_v4, %v1143_v60  ;;  %v1163_v15 = vrot.slane %v1157_v54, 4 }
 0x127   : > { %v3060_v23 = vmul.f32 %v3056_v5, %v2772_v21  ;;  %v1125_v11 = vsel %vm288_vm5, %v1122_v44, %v1124_v48  ;;  %v1164_v31 = vrot.slane %v1158_v12, 4  ;;  %v1145_v47 = vrot.slane %v1138_v2, 4 }
 0x128   : > { %v3018_v27 = vpop.permute.xlu1 %1002  ;;  %v3020_v52 = vpop.permute.xlu0 %461  ;;  %v342_v8 = vrot.slane %v2975_v62, 4  ;;  %v3068_v14 = vmul.f32 %v3056_v5, %v2709_v50  ;;  %v297_v36 = vadd.f32 %v293_v0, %v279_v35  ;;  %v313_v44 = vadd.f32 %v308_v46, %v296_v6 }
 0x129   : > { %v359_v54 = vrot.slane %v3011_v41, 5  ;;  %v337_v19 = vmul.f32 %v2706_v49, %v2471_v39  ;;  %v310_v62 = vsel %vm288_vm5, %v307_v40, %v309_v16  ;;  %v1185_v2 = vrot.slane %v3060_v23, 5 }
 0x12a   : > { %1126 = vrot.lane.b32.xlu0 %v1123_v10, %s2375_s6  ;;  %1107 = vrot.lane.b32.xlu1 %v1104_v13, %s2375_s6  ;;  %v1178_v10 = vmul.f32 %v3007_v56, %v2772_v21  ;;  %v327_v13 = vrot.slane %v319_v43, 4  ;;  %v1199_v38 = vmul.f32 %v3024_v3, %v2801_v20  ;;  %v3089_v41 = vmul.f32 %v3029_v34, %v2801_v20 }
 0x12b   : > { %v1165_v46 = vsel %vm323_vm6, %v1163_v15, %v1164_v31  ;;  %v1146_v39 = vsel %vm323_vm6, %v1143_v60, %v1145_v47  ;;  %v1166_v49 = vrot.slane %v1159_v57, 4  ;;  %v1180_v40 = vmul.f32 %v3093_v1, %v2772_v21 }
 0x12c   : > { %v3051_v53 = vpop.permute.xlu1 %463  ;;  %v3053_v33 = vpop.permute.xlu0 %482  ;;  %v343_v35 = vsel %vm323_vm6, %v341_v28, %v342_v8  ;;  %v3100_v4 = vmul.f32 %v3024_v3, %v2719_v55  ;;  %v314_v6 = vadd.f32 %v310_v62, %v297_v36  ;;  %v1184_v16 = vrot.slane %v1178_v10, 5 }
 0x12d   : > { %v331_v43 = vadd.f32 %v326_v7, %v313_v44  ;;  %v3106_v60 = vmul.f32 %v3029_v34, %v2719_v55  ;;  %v344_v0 = vrot.slane %v337_v19, 4  ;;  %v354_v21 = vmul.f32 %v3093_v1, %v2709_v50  ;;  %v3124_v50 = vld [vmem:[#allocation2 + $0x28] sm:$0x3f] }
 0x12e   : > { %1147 = vrot.lane.b32.xlu0 %v1144_v9, %s2375_s6  ;;  %1128 = vrot.lane.b32.xlu1 %v1125_v11, %s2375_s6  ;;  %v328_v28 = vsel %vm323_vm6, %v325_v63, %v327_v13  ;;  %v1186_v23 = vsel %vm358_vm7, %v1184_v16, %v1185_v2  ;;  %v1205_v11 = vrot.slane %v1199_v38, 5  ;;  %v1206_v7 = vrot.slane %v3089_v41, 5 }
 0x12f   : > { %v1167_v47 = vsel %vm323_vm6, %v1164_v31, %v1166_v49  ;;  %v1187_v57 = vrot.slane %v1180_v40, 5  ;;  %v3122_v36 = vmul.f32 %v3056_v5, %v2775_v22  ;;  %v1201_v30 = vmul.f32 %v3124_v50, %v2801_v20 }
 0x130   : > { %v3080_v48 = vpop.permute.xlu1 %484  ;;  %v3082_v12 = vpop.permute.xlu0 %503  ;;  %v360_v63 = vrot.slane %v3068_v14, 5  ;;  %v376_v10 = vrot.slane %v3100_v4, 5  ;;  %v387_v44 = vmul.f32 %v3007_v56, %v2712_v51  ;;  %v332_v13 = vadd.f32 %v328_v28, %v314_v6 }
 0x131   : > { %v348_v31 = vadd.f32 %v343_v35, %v331_v43  ;;  %v362_v19 = vrot.slane %v354_v21, 5  ;;  %v372_v62 = vmul.f32 %v3124_v50, %v2719_v55  ;;  %v1220_v20 = vmul.f32 %v3007_v56, %v2775_v22 }
 0x132   : > { %1168 = vrot.lane.b32.xlu0 %v1165_v46, %s2375_s6  ;;  %1149 = vrot.lane.b32.xlu1 %v1146_v39, %s2375_s6  ;;  %v345_v14 = vsel %vm323_vm6, %v342_v8, %v344_v0  ;;  %v1207_v46 = vsel %vm358_vm7, %v1205_v11, %v1206_v7  ;;  %v1241_v39 = vmul.f32 %v3024_v3, %v2804_v45  ;;  %v1227_v40 = vrot.slane %v3122_v36, 6 }
 0x133   : > { %v3148_v49 = vmul.f32 %v3029_v34, %v2804_v45  ;;  %v1188_v55 = vsel %vm358_vm7, %v1185_v2, %v1187_v57  ;;  %v1208_v8 = vrot.slane %v1201_v30, 5  ;;  %v1222_v35 = vmul.f32 %v3093_v1, %v2775_v22 }
 0x134   : > { %v3113_v9 = vpop.permute.xlu1 %505  ;;  %v3115_v15 = vpop.permute.xlu0 %524  ;;  %v361_v4 = vsel %vm358_vm7, %v359_v54, %v360_v63  ;;  %v377_v6 = vrot.slane %v3106_v60, 5  ;;  %v388_v16 = vmul.f32 %v3056_v5, %v2712_v51  ;;  %v349_v43 = vadd.f32 %v345_v14, %v332_v13 }
 0x135   : > { %v366_v2 = vadd.f32 %v361_v4, %v348_v31  ;;  %v405_v0 = vmul.f32 %v3024_v3, %v2727_v61  ;;  %v389_v22 = vmul.f32 %v3093_v1, %v2712_v51  ;;  %v1226_v54 = vrot.slane %v1220_v20, 6 }
 0x136   : > { %1189 = vrot.lane.b32.xlu0 %v1186_v23, %s2375_s6  ;;  %1170 = vrot.lane.b32.xlu1 %v1167_v47, %s2375_s6  ;;  %v379_v60 = vrot.slane %v372_v62, 5  ;;  %v363_v21 = vsel %vm358_vm7, %v360_v63, %v362_v19  ;;  %v1247_v11 = vrot.slane %v1241_v39, 6  ;;  %v1248_v47 = vrot.slane %v3148_v49, 6 }
 0x137   : > { %v1228_v57 = vsel %vm393_vm8, %v1226_v54, %v1227_v40  ;;  %v1209_v36 = vsel %vm358_vm7, %v1206_v7, %v1208_v8  ;;  %v1229_v51 = vrot.slane %v1222_v35, 6  ;;  %v1243_v30 = vmul.f32 %v3124_v50, %v2804_v45 }
 0x138   : > { %v3139_v38 = vpop.permute.xlu1 %526  ;;  %v3141_v41 = vpop.permute.xlu0 %545  ;;  %v378_v63 = vsel %vm358_vm7, %v376_v10, %v377_v6  ;;  %v395_v13 = vrot.slane %v388_v16, 6  ;;  %v406_v31 = vmul.f32 %v3029_v34, %v2727_v61  ;;  %v367_v19 = vadd.f32 %v363_v21, %v349_v43 }
 0x139   : > { %v383_v62 = vadd.f32 %v378_v63, %v366_v2  ;;  %v394_v7 = vrot.slane %v387_v44, 6  ;;  %v397_v20 = vrot.slane %v389_v22, 6  ;;  %v407_v14 = vmul.f32 %v3124_v50, %v2727_v61 }
 0x13a   : > { %1210 = vrot.lane.b32.xlu0 %v1207_v46, %s2375_s6  ;;  %1191 = vrot.lane.b32.xlu1 %v1188_v55, %s2375_s6  ;;  %v1261_v46 = vstv %s3150_s3  ;;  %v380_v39 = vsel %vm358_vm7, %v377_v6, %v379_v60  ;;  %v1249_v49 = vsel %vm393_vm8, %v1247_v11, %v1248_v47  ;;  %v1230_v55 = vsel %vm393_vm8, %v1227_v40, %v1229_v51  ;;  %s3482_s3 = sld [smem:[#allocation3 + $0x28]] }
 0x13b   : > { %v1250_v8 = vrot.slane %v1243_v30, 6  ;;  %v396_v44 = vsel %vm393_vm8, %v394_v7, %v395_v13  ;;  %v411_v35 = vrot.slane %v405_v0, 6  ;;  %v412_v4 = vrot.slane %v406_v31, 6 }
 0x13c   : > { %v3171_v28 = vpop.permute.xlu1 %547  ;;  %v3173_v23 = vpop.permute.xlu0 %566  ;;  %v384_v61 = vadd.f32 %v380_v39, %v367_v19  ;;  %v401_v16 = vadd.f32 %v396_v44, %v383_v62  ;;  %v1262_v40 = vmul.f32 %v3007_v56, %v1261_v46  ;;  %v1275_v2 = vstv %s3168_s30  ;;  %s3505_s30 = sld [smem:[#allocation3 + $0x2f]] }
 0x13d   : > { %v1289_v22 = vstv %s3162_s29  ;;  %v1310_v54 = vstv %s3176_s7  ;;  %v414_v0 = vrot.slane %v407_v14, 6  ;;  %v398_v60 = vsel %vm393_vm8, %v395_v13, %v397_v20  ;;  %s3490_s29 = sld [smem:[#allocation3 + $0xa8]] }
 0x13e   : > { %1231 = vrot.lane.b32.xlu0 %v1228_v57, %s2375_s6  ;;  %1212 = vrot.lane.b32.xlu1 %v1209_v36, %s2375_s6  ;;  %v1251_v21 = vsel %vm393_vm8, %v1248_v47, %v1250_v8  ;;  %v1291_v11 = vmul.f32 %v3056_v5, %v1289_v22  ;;  %v413_v57 = vsel %vm393_vm8, %v411_v35, %v412_v4  ;;  %v1331_v63 = vstv %s3187_s8  ;;  %s3512_s7 = sld [smem:[#allocation3 + $0xaf]] }
 0x13f   : > { %v402_v36 = vadd.f32 %v398_v60, %v384_v61  ;;  %v418_v51 = vadd.f32 %v413_v57, %v401_v16  ;;  %v1290_v30 = vmul.f32 %v3007_v56, %v1289_v22  ;;  %v1276_v47 = vmul.f32 %v3024_v3, %v1275_v2  ;;  %s3544_s8 = sld [smem:[#allocation3 + $0x6]] }
 0x140   : > { %v3191_v45 = vpop.permute.xlu1 %568  ;;  %v3193_v10 = vpop.permute.xlu0 %587  ;;  %v1263_v19 = vmul.f32 %v3056_v5, %v1261_v46  ;;  %v1311_v62 = vmul.f32 %v3024_v3, %v1310_v54  ;;  %v1312_v7 = vmul.f32 %v3029_v34, %v1310_v54  ;;  %v415_v14 = vsel %vm393_vm8, %v412_v4, %v414_v0 }
 0x141   : > { %v432_v20 = vadd.f32 %v2831_v24, %v418_v51  ;;  %v1297_v39 = vrot.slane %v1291_v11, 1  ;;  %v1352_v8 = vstv %s3202_s11  ;;  %v1296_v44 = vrot.slane %v1290_v30, 1  ;;  %s3550_s11 = sld [smem:[#allocation3 + $0xd]] }
 0x142   : > { %1252 = vrot.lane.b32.xlu0 %v1249_v49, %s2375_s6  ;;  %1233 = vrot.lane.b32.xlu1 %v1230_v55, %s2375_s6  ;;  %v1292_v49 = vmul.f32 %v3093_v1, %v1289_v22  ;;  %v419_v55 = vadd.f32 %v415_v14, %v402_v36  ;;  %v1332_v35 = vmul.f32 %v3007_v56, %v1331_v63  ;;  %v1318_v22 = vrot.slane %v1312_v7, 1 }
 0x143   : > { %v446_v46 = vadd.f32 %v2861_v59, %v432_v20  ;;  %v1333_v24 = vmul.f32 %v3056_v5, %v1331_v63  ;;  %v1277_v16 = vmul.f32 %v3029_v34, %v1275_v2  ;;  %v1313_v0 = vmul.f32 %v3124_v50, %v1310_v54 }
 0x144   : > { %v3204_v6 = vpop.permute.xlu1 %589  ;;  %v3206_v43 = vpop.permute.xlu0 %608  ;;  %v433_v60 = vadd.f32 %v2859_v58, %v419_v55  ;;  %v1299_v11 = vrot.slane %v1292_v49, 1  ;;  %v1338_v36 = vrot.slane %v1332_v35, 2 }
 0x145   : > { %v467_v59 = vadd.f32 %v3020_v52, %v446_v46  ;;  %v1339_v51 = vrot.slane %v1333_v24, 2  ;;  %v1320_v58 = vrot.slane %v1313_v0, 1  ;;  %v1353_v52 = vmul.f32 %v3024_v3, %v1352_v8 }
 0x146   : > { %1266 = vrot.lane.b32.xlu0 %v1262_v40, %s2376_s12  ;;  %1254 = vrot.lane.b32.xlu1 %v1251_v21, %s2375_s6  ;;  %s3234_s6 = sld [smem:[#allocation3 + $0x19]]  ;;  %v1317_v40 = vrot.slane %v1311_v62, 1  ;;  %v1298_v21 = vsel %vm218_vm3, %v1296_v44, %v1297_v39  ;;  %v447_v57 = vadd.f32 %v2890_v37, %v433_v60  ;;  %v1300_v7 = vsel %vm218_vm3, %v1297_v39, %v1299_v11 }
 0x147   : > { %v488_v2 = vadd.f32 %v3053_v33, %v467_v59  ;;  %v1321_v39 = vsel %vm218_vm3, %v1318_v22, %v1320_v58  ;;  %v1359_v46 = vrot.slane %v1353_v52, 2 }
 0x148   : > { %v3220_v31 = vpop.permute.xlu1 %610  ;;  %v3222_v13 = vpop.permute.xlu0 %629  ;;  %v468_v62 = vadd.f32 %v3051_v53, %v447_v57  ;;  %v1319_v33 = vsel %vm218_vm3, %v1317_v40, %v1318_v22  ;;  %v1394_v53 = vstv %s3239_s13  ;;  %s3564_s13 = sld [smem:[#allocation3 + $0x14]] }
 0x149   : > { %v509_v37 = vadd.f32 %v3082_v12, %v488_v2  ;;  %v1396_v11 = vmul.f32 %v3029_v34, %v1394_v53 }
 0x14a   : > { %1280 = vrot.lane.b32.xlu0 %v1276_v47, %s2376_s12  ;;  %1268 = vrot.lane.b32.xlu1 %v1263_v19, %s2376_s12  ;;  %v1354_v47 = vmul.f32 %v3029_v34, %v1352_v8  ;;  %v1334_v19 = vmul.f32 %v3093_v1, %v1331_v63  ;;  %v489_v14 = vadd.f32 %v3080_v48, %v468_v62 }
 0x14b   : > { %v530_v49 = vadd.f32 %v3115_v15, %v509_v37  ;;  %v1340_v63 = vsel %vm253_vm4, %v1338_v36, %v1339_v51  ;;  %v1355_v15 = vmul.f32 %v3124_v50, %v1352_v8  ;;  %v1415_v36 = vstv %s3268_s14  ;;  %s3570_s14 = sld [smem:[#allocation3 + $0x94]] }
 0x14c   : > { %v3241_v4 = vpop.permute.xlu1 %631  ;;  %v3243_v61 = vpop.permute.xlu0 %650  ;;  %v1373_v20 = vstv %s3234_s6  ;;  %v1360_v44 = vrot.slane %v1354_v47, 2  ;;  %v1341_v35 = vrot.slane %v1334_v19, 2  ;;  %v510_v24 = vadd.f32 %v3113_v9, %v489_v14  ;;  %s2279_s6 = sld [smem:[#allocation3 + $0x8d]] }
 0x14d   : > { %v1375_v48 = vmul.f32 %v3056_v5, %v1373_v20  ;;  %v1374_v0 = vmul.f32 %v3007_v56, %v1373_v20  ;;  %v1376_v9 = vmul.f32 %v3093_v1, %v1373_v20  ;;  %v1362_v2 = vrot.slane %v1355_v15, 2 }
 0x14e   : > { %1301 = vrot.lane.b32.xlu0 %v1298_v21, %s2376_s12  ;;  %1282 = vrot.lane.b32.xlu1 %v1277_v16, %s2376_s12  ;;  %v551_v16 = vadd.f32 %v3141_v41, %v530_v49  ;;  %v531_v40 = vadd.f32 %v3139_v38, %v510_v24  ;;  %v1361_v8 = vsel %vm253_vm4, %v1359_v46, %v1360_v44  ;;  %v1402_v62 = vrot.slane %v1396_v11, 3 }
 0x14f   : > { %v1342_v59 = vsel %vm253_vm4, %v1339_v51, %v1341_v35  ;;  %v1395_v21 = vmul.f32 %v3024_v3, %v1394_v53  ;;  %v1381_v57 = vrot.slane %v1375_v48, 3  ;;  %v1380_v51 = vrot.slane %v1374_v0, 3 }
 0x150   : > { %v3254_v30 = vpop.permute.xlu1 %652  ;;  %v3256_v54 = vpop.permute.xlu0 %671  ;;  %v572_v22 = vadd.f32 %v3173_v23, %v551_v16  ;;  %v552_v38 = vadd.f32 %v3171_v28, %v531_v40  ;;  %v1383_v47 = vrot.slane %v1376_v9, 3  ;;  %v1397_v37 = vmul.f32 %v3124_v50, %v1394_v53 }
 0x151   : > { %v1363_v20 = vsel %vm253_vm4, %v1360_v44, %v1362_v2  ;;  %v1416_v14 = vmul.f32 %v3007_v56, %v1415_v36  ;;  %v1436_v49 = vstv %s3285_s15  ;;  %v1418_v24 = vmul.f32 %v3093_v1, %v1415_v36  ;;  %s2378_s15 = smov 122  }
 0x152   : > { %1322 = vrot.lane.b32.xlu0 %v1319_v33, %s2376_s12  ;;  %1303 = vrot.lane.b32.xlu1 %v1300_v7, %s2376_s12  ;;  %v593_v23 = vadd.f32 %v3193_v10, %v572_v22  ;;  %v573_v58 = vadd.f32 %v3191_v45, %v552_v38  ;;  %v1401_v10 = vrot.slane %v1395_v21, 3  ;;  %v1417_v33 = vmul.f32 %v3056_v5, %v1415_v36 }
 0x153   : > { %v1404_v44 = vrot.slane %v1397_v37, 3  ;;  %v1422_v15 = vrot.slane %v1416_v14, 4  ;;  %v1457_v0 = vstv %s3306_s16  ;;  %v1439_v21 = vmul.f32 %v3124_v50, %v1436_v49  ;;  %s3590_s16 = sld [smem:[#allocation3 + $0x1b]] }
 0x154   : > { %v3274_v55 = vpop.permute.xlu1 %673  ;;  %v3276_v12 = vpop.permute.xlu0 %692  ;;  %v614_v52 = vadd.f32 %v3206_v43, %v593_v23  ;;  %v594_v7 = vadd.f32 %v3204_v6, %v573_v58  ;;  %v1382_v43 = vsel %vm288_vm5, %v1380_v51, %v1381_v57  ;;  %v1384_v6 = vsel %vm288_vm5, %v1381_v57, %v1383_v47 }
 0x155   : > { %v1403_v46 = vsel %vm288_vm5, %v1401_v10, %v1402_v62  ;;  %v1423_v35 = vrot.slane %v1417_v33, 4  ;;  %v1478_v23 = vstv %s3322_s17  ;;  %v1458_v36 = vmul.f32 %v3007_v56, %v1457_v0  ;;  %s3593_s17 = sld [smem:[#allocation3 + $0x9b]] }
 0x156   : > { %1343 = vrot.lane.b32.xlu0 %v1340_v63, %s2376_s12  ;;  %1324 = vrot.lane.b32.xlu1 %v1321_v39, %s2376_s12  ;;  %v635_v45 = vadd.f32 %v3222_v13, %v614_v52  ;;  %v615_v63 = vadd.f32 %v3220_v31, %v594_v7  ;;  %v1437_v31 = vmul.f32 %v3024_v3, %v1436_v49  ;;  %v1446_v51 = vrot.slane %v1439_v21, 4 }
 0x157   : > { %v1460_v47 = vmul.f32 %v3093_v1, %v1457_v0  ;;  %v1479_v37 = vmul.f32 %v3024_v3, %v1478_v23  ;;  %v1464_v7 = vrot.slane %v1458_v36, 5 }
 0x158   : > { %v3291_v41 = vpop.permute.xlu1 %694  ;;  %v3293_v60 = vpop.permute.xlu0 %741  ;;  %v656_v53 = vadd.f32 %v3243_v61, %v635_v45  ;;  %v636_v16 = vadd.f32 %v3241_v4, %v615_v63  ;;  %v1438_v61 = vmul.f32 %v3029_v34, %v1436_v49  ;;  %v1481_v49 = vmul.f32 %v3124_v50, %v1478_v23 }
 0x159   : > { %v1467_v14 = vrot.slane %v1460_v47, 5  ;;  %v1499_v63 = vstv %s3349_s18  ;;  %v1541_v47 = vstv %s3389_s20  ;;  %s2284_s18 = sld [smem:[#allocation3 + $0x22]] }
 0x15a   : > { %1364 = vrot.lane.b32.xlu0 %v1361_v8, %s2376_s12  ;;  %1345 = vrot.lane.b32.xlu1 %v1342_v59, %s2376_s12  ;;  %v677_v48 = vadd.f32 %v3256_v54, %v656_v53  ;;  %v657_v40 = vadd.f32 %v3254_v30, %v636_v16  ;;  %v1405_v54 = vsel %vm288_vm5, %v1402_v62, %v1404_v44  ;;  %v1425_v59 = vrot.slane %v1418_v24, 4  ;;  %s3624_s20 = sld [smem:[#allocation3 + $0x29]] }
 0x15b   : > { %v1424_v8 = vsel %vm323_vm6, %v1422_v15, %v1423_v35  ;;  %v1443_v30 = vrot.slane %v1437_v31, 4  ;;  %v1444_v38 = vrot.slane %v1438_v61, 4  ;;  %v1501_v44 = vmul.f32 %v3056_v5, %v1499_v63 }
 0x15c   : > { %v3308_v19 = vpop.permute.xlu1 %743  ;;  %v3310_v28 = vpop.permute.xlu0 %762  ;;  %v698_v22 = vadd.f32 %v3276_v12, %v677_v48  ;;  %v678_v11 = vadd.f32 %v3274_v55, %v657_v40  ;;  %v1459_v12 = vmul.f32 %v3056_v5, %v1457_v0  ;;  %v1426_v52 = vsel %vm323_vm6, %v1423_v35, %v1425_v59 }
 0x15d   : > { %v1445_v10 = vsel %vm323_vm6, %v1443_v30, %v1444_v38  ;;  %v1500_v24 = vmul.f32 %v3007_v56, %v1499_v63  ;;  %v1488_v61 = vrot.slane %v1481_v49, 5  ;;  %v1502_v15 = vmul.f32 %v3093_v1, %v1499_v63 }
 0x15e   : > { %1385 = vrot.lane.b32.xlu0 %v1382_v43, %s2376_s12  ;;  %1366 = vrot.lane.b32.xlu1 %v1363_v20, %s2376_s12  ;;  %v712_v57 = vadd.f32 %v2892_v29, %v698_v22  ;;  %v699_v2 = vadd.f32 %v3291_v41, %v678_v11  ;;  %v1465_v62 = vrot.slane %v1459_v12, 5  ;;  %v1480_v29 = vmul.f32 %v3029_v34, %v1478_v23 }
 0x15f   : > { %v1447_v20 = vsel %vm323_vm6, %v1444_v38, %v1446_v51  ;;  %v1507_v22 = vrot.slane %v1501_v44, 6  ;;  %v1509_v30 = vrot.slane %v1502_v15, 6 }
 0x160   : > { %v3327_v13 = vpop.permute.xlu1 %764  ;;  %v3329_v39 = vpop.permute.xlu0 %783  ;;  %v726_v41 = vadd.f32 %v2925_v26, %v712_v57  ;;  %v713_v33 = vadd.f32 %v2923_v25, %v699_v2  ;;  %v1466_v53 = vsel %vm358_vm7, %v1464_v7, %v1465_v62  ;;  %v1520_v25 = vstv %s3356_s19  ;;  %s3613_s19 = sld [smem:[#allocation3 + $0xa2]] }
 0x161   : > { %v1468_v31 = vsel %vm358_vm7, %v1465_v62, %v1467_v14  ;;  %v1521_v0 = vmul.f32 %v3024_v3, %v1520_v25  ;;  %v1523_v38 = vmul.f32 %v3124_v50, %v1520_v25  ;;  %v1510_v51 = vsel %vm393_vm8, %v1507_v22, %v1509_v30 }
 0x162   : > { %1387 = vrot.lane.b32.xlu1 %v1384_v6, %s2376_s12  ;;  %1406 = vrot.lane.b32.xlu0 %v1403_v46, %s2376_s12  ;;  %v1485_v6 = vrot.slane %v1479_v37, 5  ;;  %v1486_v46 = vrot.slane %v1480_v29, 5  ;;  %v727_v26 = vadd.f32 %v2953_v32, %v713_v33  ;;  %v747_v35 = vadd.f32 %v3293_v60, %v726_v41 }
 0x163   : > { %v1522_v32 = vmul.f32 %v3029_v34, %v1520_v25  ;;  %v1527_v57 = vrot.slane %v1521_v0, 6  ;;  %v1530_v37 = vrot.slane %v1523_v38, 6  ;;  %v1542_v33 = vmul.f32 %v3007_v56, %v1541_v47 }
 0x164   : > { %v3342_v9 = vpop.permute.xlu1 %785  ;;  %v3344_v4 = vpop.permute.xlu0 %804  ;;  %v1487_v40 = vsel %vm358_vm7, %v1485_v6, %v1486_v46  ;;  %v748_v60 = vadd.f32 %v3308_v19, %v727_v26  ;;  %v1489_v11 = vsel %vm358_vm7, %v1486_v46, %v1488_v61  ;;  %v1555_v7 = vstv %s3400_s22  ;;  %s2288_s22 = sld [smem:[#allocation3 + $0x30]] }
 0x165   : > { %v1528_v19 = vrot.slane %v1522_v32, 6  ;;  %v1556_v44 = vmul.f32 %v3024_v3, %v1555_v7 }
 0x166   : > { %1408 = vrot.lane.b32.xlu1 %v1405_v54, %s2376_s12  ;;  %1427 = vrot.lane.b32.xlu0 %v1424_v8, %s2376_s12  ;;  %v768_v54 = vadd.f32 %v3310_v28, %v747_v35  ;;  %v1506_v8 = vrot.slane %v1500_v24, 6  ;;  %v769_v28 = vadd.f32 %v3327_v13, %v748_v60  ;;  %v1557_v60 = vmul.f32 %v3029_v34, %v1555_v7 }
 0x167   : > { %v1529_v62 = vsel %vm393_vm8, %v1527_v57, %v1528_v19  ;;  %v1531_v49 = vsel %vm393_vm8, %v1528_v19, %v1530_v37 }
 0x168   : > { %v3361_v58 = vpop.permute.xlu1 %806  ;;  %v3363_v55 = vpop.permute.xlu0 %825  ;;  %v789_v12 = vadd.f32 %v3329_v39, %v768_v54  ;;  %v1508_v23 = vsel %vm393_vm8, %v1506_v8, %v1507_v22  ;;  %v790_v39 = vadd.f32 %v3342_v9, %v769_v28  ;;  %v1569_v9 = vstv %s3396_s21  ;;  %s3627_s21 = sld [smem:[#allocation3 + $0xa9]] }
 0x169   : > { %v1571_v63 = vmul.f32 %v3056_v5, %v1569_v9  ;;  %v1572_v25 = vmul.f32 %v3093_v1, %v1569_v9 }
 0x16a   : > { %1429 = vrot.lane.b32.xlu1 %v1426_v52, %s2376_s12  ;;  %1448 = vrot.lane.b32.xlu0 %v1445_v10, %s2376_s12  ;;  %v810_v2 = vadd.f32 %v3344_v4, %v789_v12  ;;  %v811_v13 = vadd.f32 %v3361_v58, %v790_v39 }
 0x16b   : > { %v1579_v54 = vrot.slane %v1572_v25, 1 }
 0x16c   : > { %v3374_v45 = vpop.permute.xlu1 %827  ;;  %v847_v43 = vpop.permute.xlu0 %846  ;;  %v831_v10 = vadd.f32 %v3363_v55, %v810_v2 }
 0x16d   : > { %v832_v55 = vadd.f32 %v3374_v45, %v811_v13  ;;  %v1543_v45 = vmul.f32 %v3056_v5, %v1541_v47 }
 0x16e   : > { %1450 = vrot.lane.b32.xlu1 %v1447_v20, %s2376_s12  ;;  %1469 = vrot.lane.b32.xlu0 %v1466_v53, %s2376_s12  ;;  %v852_v4 = vadd.f32 %v847_v43, %v831_v10  ;;  %v1590_v20 = vstv %s2265_s23  ;;  %v1570_v53 = vmul.f32 %v3007_v56, %v1569_v9  ;;  %s3650_s23 = sld [smem:[#allocation3 + $0xb0]] }
 0x16f   : > { %v1591_v26 = vmul.f32 %v3024_v3, %v1590_v20  ;;  %v1593_v22 = vmul.f32 %v3124_v50, %v1590_v20 }
 0x170   : > { %v849_v16 = vpop.permute.xlu1 %848  ;;  %v868_v48 = vpop.permute.xlu0 %867 }
 0x171   : > { %v873_v14 = vadd.f32 %v868_v48, %v852_v4  ;;  %v853_v58 = vadd.f32 %v849_v16, %v832_v55  ;;  %v1577_v48 = vrot.slane %v1571_v63, 1  ;;  %v1611_v16 = vstv %s3417_s24  ;;  %s2295_s24 = sshll.u32 %s3706_s10, 4 }
 0x172   : > { %1471 = vrot.lane.b32.xlu1 %v1468_v31, %s2376_s12  ;;  %1490 = vrot.lane.b32.xlu0 %v1487_v40, %s2376_s12  ;;  %v1592_v31 = vmul.f32 %v3029_v34, %v1590_v20  ;;  %v1576_v40 = vrot.slane %v1570_v53, 1  ;;  %v1597_v8 = vrot.slane %v1591_v26, 1  ;;  %v1612_v12 = vmul.f32 %v3007_v56, %v1611_v16 }
 0x173   : > { %v1600_v28 = vrot.slane %v1593_v22, 1  ;;  %v1614_v47 = vmul.f32 %v3093_v1, %v1611_v16 }
 0x174   : > { %v870_v59 = vpop.permute.xlu1 %869  ;;  %v889_v21 = vpop.permute.xlu0 %888  ;;  %v1578_v30 = vsel %vm218_vm3, %v1576_v40, %v1577_v48  ;;  %v1598_v38 = vrot.slane %v1592_v31, 1  ;;  %v1618_v13 = vrot.slane %v1612_v12, 2 }
 0x175   : > { %v894_v43 = vadd.f32 %v889_v21, %v873_v14  ;;  %v874_v35 = vadd.f32 %v870_v59, %v853_v58  ;;  %v1613_v59 = vmul.f32 %v3056_v5, %v1611_v16  ;;  %v1621_v20 = vrot.slane %v1614_v47, 2 }
 0x176   : > { %1492 = vrot.lane.b32.xlu1 %v1489_v11, %s2376_s12  ;;  %1511 = vrot.lane.b32.xlu0 %v1508_v23, %s2376_s12  ;;  %v1632_v23 = vstv %s3428_s27  ;;  %v1599_v10 = vsel %vm218_vm3, %v1597_v8, %v1598_v38  ;;  %v1653_v14 = vstv %s3442_s28  ;;  %s157_s28 = scalar_lea.vmem %s3698_s2, %s2295_s24 }
 0x177   : > { %v1634_v37 = vmul.f32 %v3029_v34, %v1632_v23  ;;  %v1635_v55 = vmul.f32 %v3124_v50, %v1632_v23  ;;  %v1655_v58 = vmul.f32 %v3056_v5, %v1653_v14  ;;  %v1656_v25 = vmul.f32 %v3093_v1, %v1653_v14 }
 0x178   : > { %v891_v36 = vpop.permute.xlu1 %890  ;;  %v910_v52 = vpop.permute.xlu0 %909  ;;  %v1737_v47 = vstv %s3482_s3 }
 0x179   : > { %v915_v24 = vadd.f32 %v910_v52, %v894_v43  ;;  %v895_v61 = vadd.f32 %v891_v36, %v874_v35  ;;  %v1580_v52 = vsel %vm218_vm3, %v1577_v48, %v1579_v54  ;;  %v1640_v63 = vrot.slane %v1634_v37, 2 }
 0x17a   : > { %1513 = vrot.lane.b32.xlu1 %v1510_v51, %s2376_s12  ;;  %1532 = vrot.lane.b32.xlu0 %v1529_v62, %s2376_s12  ;;  %v1619_v51 = vrot.slane %v1613_v59, 2  ;;  %v1633_v62 = vmul.f32 %v3024_v3, %v1632_v23  ;;  %v1674_v43 = vstv %s3445_s26  ;;  %v1661_v48 = vrot.slane %v1655_v58, 3 }
 0x17b   : > { %v1675_v26 = vmul.f32 %v3024_v3, %v1674_v43  ;;  %v1676_v31 = vmul.f32 %v3029_v34, %v1674_v43  ;;  %v1740_v58 = vmul.f32 %v3093_v1, %v1737_v47 }
 0x17c   : > { %v912_v29 = vpop.permute.xlu1 %911  ;;  %v931_v41 = vpop.permute.xlu0 %930  ;;  %v1620_v9 = vsel %vm253_vm4, %v1618_v13, %v1619_v51  ;;  %v1622_v35 = vsel %vm253_vm4, %v1619_v51, %v1621_v20  ;;  %v1758_v20 = vstv %s3490_s29 }
 0x17d   : > { %v936_v15 = vadd.f32 %v931_v41, %v915_v24  ;;  %v916_v21 = vadd.f32 %v912_v29, %v895_v61  ;;  %v1601_v41 = vsel %vm218_vm3, %v1598_v38, %v1600_v28  ;;  %v1682_v8 = vrot.slane %v1676_v31, 3 }
 0x17e   : > { %1534 = vrot.lane.b32.xlu1 %v1531_v49, %s2376_s12  ;;  %1546 = vrot.lane.b32.xlu0 %v1542_v33, %s2377_s25  ;;  %v1639_v49 = vrot.slane %v1633_v62, 2  ;;  %v1747_v31 = vrot.slane %v1740_v58, 5  ;;  %s3555_s12 = sld [smem:[#allocation3 + $0x86]] }
 0x180   : > { %v933_v6 = vpop.permute.xlu1 %932  ;;  %v952_v46 = vpop.permute.xlu0 %951  ;;  %v1641_v24 = vsel %vm253_vm4, %v1639_v49, %v1640_v63  ;;  %v3514_v49 = vld [vmem:[#allocation2] sm:$0xff] }
 0x181   : > { %v957_v11 = vadd.f32 %v952_v46, %v936_v15  ;;  %v937_v57 = vadd.f32 %v933_v6, %v916_v21  ;;  %v1654_v6 = vmul.f32 %v3007_v56, %v1653_v14  ;;  %v1716_v21 = vstv %s3467_s5 }
 0x182   : > { %1548 = vrot.lane.b32.xlu1 %v1543_v45, %s2377_s25  ;;  %1560 = vrot.lane.b32.xlu0 %v1556_v44, %s2377_s25  ;;  %v1642_v44 = vrot.slane %v1635_v55, 2  ;;  %v1718_v28 = vmul.f32 %v3029_v34, %v1716_v21 }
 0x183   : > { %v1660_v61 = vrot.slane %v1654_v6, 3  ;;  %v3519_v6 = vld [vmem:[#allocation2 + $0x18] sm:$0xff] }
 0x184   : > { %v954_v0 = vpop.permute.xlu1 %953  ;;  %v973_v32 = vpop.permute.xlu0 %972  ;;  %v1643_v22 = vsel %vm253_vm4, %v1640_v63, %v1642_v44  ;;  %v1738_v63 = vmul.f32 %v3514_v49, %v1737_v47 }
 0x185   : > { %v978_v19 = vadd.f32 %v973_v32, %v957_v11  ;;  %v958_v39 = vadd.f32 %v954_v0, %v937_v57  ;;  %v1663_v0 = vrot.slane %v1656_v25, 3  ;;  %v1681_v32 = vrot.slane %v1675_v26, 3 }
 0x186   : > { %1562 = vrot.lane.b32.xlu1 %v1557_v60, %s2377_s25  ;;  %1581 = vrot.lane.b32.xlu0 %v1578_v30, %s2377_s25  ;;  %v1695_v60 = vstv %s3463_s4  ;;  %v1662_v54 = vsel %vm288_vm5, %v1660_v61, %v1661_v48 }
 0x187   : > { %v992_v4 = vadd.f32 %v2955_v42, %v978_v19  ;;  %v1697_v59 = vmul.f32 %v3056_v5, %v1695_v60  ;;  %v1696_v38 = vmul.f32 %v3007_v56, %v1695_v60  ;;  %v1698_v57 = vmul.f32 %v3093_v1, %v1695_v60 }
 0x188   : > { %v975_v2 = vpop.permute.xlu1 %974  ;;  %v1022_v36 = vpop.permute.xlu0 %1021  ;;  %v1717_v19 = vmul.f32 %v3024_v3, %v1716_v21  ;;  %v1719_v3 = vmul.f32 %v3124_v50, %v1716_v21  ;;  %v1800_v21 = vstv %s3512_s7 }
 0x189   : > { %v979_v29 = vadd.f32 %v975_v2, %v958_v39  ;;  %v1006_v42 = vadd.f32 %v2989_v18, %v992_v4  ;;  %v1703_v51 = vrot.slane %v1697_v59, 4  ;;  %v1702_v62 = vrot.slane %v1696_v38, 4 }
 0x18a   : > { %1583 = vrot.lane.b32.xlu1 %v1580_v52, %s2377_s25  ;;  %1602 = vrot.lane.b32.xlu0 %v1599_v10, %s2377_s25  ;;  %v1683_v52 = vsel %vm288_vm5, %v1681_v32, %v1682_v8  ;;  %v1705_v13 = vrot.slane %v1698_v57, 4  ;;  %v1723_v4 = vrot.slane %v1717_v19, 4  ;;  %v3541_v57 = vld [vmem:[#allocation2 + $0x10] sm:$0x3f] }
 0x18b   : > { %v993_v53 = vadd.f32 %v2987_v17, %v979_v29  ;;  %v1677_v17 = vmul.f32 %v3124_v50, %v1674_v43  ;;  %v1027_v16 = vadd.f32 %v1022_v36, %v1006_v42  ;;  %v1664_v36 = vsel %vm288_vm5, %v1661_v48, %v1663_v0 }
 0x18c   : > { %v1024_v33 = vpop.permute.xlu1 %1023  ;;  %v1043_v7 = vpop.permute.xlu0 %1042  ;;  %v1724_v29 = vrot.slane %v1718_v28, 4  ;;  %v1706_v42 = vsel %vm323_vm6, %v1703_v51, %v1705_v13  ;;  %v1744_v48 = vrot.slane %v1738_v63, 5 }
 0x18d   : > { %v1007_v18 = vadd.f32 %v3018_v27, %v993_v53  ;;  %v1684_v27 = vrot.slane %v1677_v17, 3  ;;  %v1048_v30 = vadd.f32 %v1043_v7, %v1027_v16  ;;  %v1726_v53 = vrot.slane %v1719_v3, 4 }
 0x18e   : > { %1604 = vrot.lane.b32.xlu1 %v1601_v41, %s2377_s25  ;;  %1623 = vrot.lane.b32.xlu0 %v1620_v9, %s2377_s25  ;;  %v1739_v41 = vmul.f32 %v3056_v5, %v1737_v47  ;;  %v1704_v9 = vsel %vm323_vm6, %v1702_v62, %v1703_v51  ;;  %v1779_v17 = vstv %s3505_s30  ;;  %v1803_v3 = vmul.f32 %v3124_v50, %v1800_v21 }
 0x18f   : > { %v1028_v11 = vadd.f32 %v1024_v33, %v1007_v18  ;;  %v1685_v56 = vsel %vm288_vm5, %v1682_v8, %v1684_v27  ;;  %v1780_v59 = vmul.f32 %v3514_v49, %v1779_v17  ;;  %v1782_v19 = vmul.f32 %v3541_v57, %v1779_v17 }
 0x190   : > { %v1045_v46 = vpop.permute.xlu1 %1044  ;;  %v1064_v45 = vpop.permute.xlu0 %1063 }
 0x191   : > { %v1069_v2 = vadd.f32 %v1064_v45, %v1048_v30  ;;  %v1049_v39 = vadd.f32 %v1045_v46, %v1028_v11  ;;  %v1759_v46 = vmul.f32 %v3519_v6, %v1758_v20  ;;  %v3522_v45 = vld [vmem:[#allocation2 + $0x20] sm:$0xff]  ;;  %v1786_v51 = vrot.slane %v1780_v59, 6 }
 0x192   : > { %1625 = vrot.lane.b32.xlu1 %v1622_v35, %s2377_s25  ;;  %1644 = vrot.lane.b32.xlu0 %v1641_v24, %s2377_s25  ;;  %v1760_v44 = vmul.f32 %v3522_v45, %v1758_v20  ;;  %v1725_v35 = vsel %vm323_vm6, %v1723_v4, %v1724_v29  ;;  %v1745_v24 = vrot.slane %v1739_v41, 5  ;;  %v1789_v62 = vrot.slane %v1782_v19, 6 }
 0x193   : > { %v1765_v61 = vrot.slane %v1759_v46, 5 }
 0x194   : > { %v1066_v15 = vpop.permute.xlu1 %1065  ;;  %v1085_v40 = vpop.permute.xlu0 %1084  ;;  %v1746_v8 = vsel %vm358_vm7, %v1744_v48, %v1745_v24  ;;  %v1748_v27 = vsel %vm358_vm7, %v1745_v24, %v1747_v31 }
 0x195   : > { %v1090_v10 = vadd.f32 %v1085_v40, %v1069_v2  ;;  %v1070_v33 = vadd.f32 %v1066_v15, %v1049_v39  ;;  %v1766_v15 = vrot.slane %v1760_v44, 5  ;;  %v1761_v40 = vmul.f32 %v3124_v50, %v1758_v20 }
 0x196   : > { %1646 = vrot.lane.b32.xlu1 %v1643_v22, %s2377_s25  ;;  %1665 = vrot.lane.b32.xlu0 %v1662_v54, %s2377_s25  ;;  %v3530_v22 = vld [vmem:[#allocation2 + $0x8] sm:$0xff]  ;;  %v1727_v54 = vsel %vm323_vm6, %v1724_v29, %v1726_v53 }
 0x197   : > { %v1781_v0 = vmul.f32 %v3530_v22, %v1779_v17  ;;  %v1767_v38 = vsel %vm358_vm7, %v1765_v61, %v1766_v15 }
 0x198   : > { %v1087_v12 = vpop.permute.xlu1 %1086  ;;  %v1106_v23 = vpop.permute.xlu0 %1105 }
 0x199   : > { %v1111_v7 = vadd.f32 %v1106_v23, %v1090_v10  ;;  %v1091_v55 = vadd.f32 %v1087_v12, %v1070_v33  ;;  %v1768_v12 = vrot.slane %v1761_v40, 5  ;;  %v1787_v23 = vrot.slane %v1781_v0, 6 }
 0x19a   : > { %1667 = vrot.lane.b32.xlu1 %v1664_v36, %s2377_s25  ;;  %1686 = vrot.lane.b32.xlu0 %v1683_v52, %s2377_s25  ;;  %v1801_v36 = vmul.f32 %v3519_v6, %v1800_v21  ;;  %v1802_v52 = vmul.f32 %v3522_v45, %v1800_v21  ;;  %v1810_v33 = vrot.slane %v1803_v3, 6 }
 0x19b   : > { %v1769_v39 = vsel %vm358_vm7, %v1766_v15, %v1768_v12  ;;  %v1788_v10 = vsel %vm393_vm8, %v1786_v51, %v1787_v23  ;;  %v1790_v50 = vsel %vm393_vm8, %v1787_v23, %v1789_v62 }
 0x19c   : > { %v1108_v34 = vpop.permute.xlu1 %1107  ;;  %v1127_v37 = vpop.permute.xlu0 %1126  ;;  %v1807_v13 = vrot.slane %v1801_v36, 6  ;;  %v1808_v4 = vrot.slane %v1802_v52, 6 }
 0x19d   : > { %v1132_v14 = vadd.f32 %v1127_v37, %v1111_v7  ;;  %v1112_v25 = vadd.f32 %v1108_v34, %v1091_v55  ;;  %v1821_v7 = vstv %s3544_s8 }
 0x19e   : > { %1688 = vrot.lane.b32.xlu1 %v1685_v56, %s2377_s25  ;;  %1707 = vrot.lane.b32.xlu0 %v1704_v9, %s2377_s25  ;;  %v1809_v55 = vsel %vm393_vm8, %v1807_v13, %v1808_v4  ;;  %v1811_v58 = vsel %vm393_vm8, %v1808_v4, %v1810_v33 }
 0x1a0   : > { %v1129_v5 = vpop.permute.xlu1 %1128  ;;  %v1148_v43 = vpop.permute.xlu0 %1147 }
 0x1a1   : > { %v1153_v26 = vadd.f32 %v1148_v43, %v1132_v14  ;;  %v1133_v1 = vadd.f32 %v1129_v5, %v1112_v25  ;;  %v1822_v5 = vmul.f32 %v3514_v49, %v1821_v7  ;;  %v1835_v43 = vstv %s3555_s12 }
 0x1a2   : > { %1709 = vrot.lane.b32.xlu1 %v1706_v42, %s2377_s25  ;;  %1728 = vrot.lane.b32.xlu0 %v1725_v35, %s2377_s25  ;;  %v1849_v42 = vstv %s3550_s11  ;;  %v1870_v25 = vstv %s2279_s6  ;;  %v1836_v48 = vmul.f32 %v3519_v6, %v1835_v43  ;;  %v1837_v40 = vmul.f32 %v3522_v45, %v1835_v43 }
 0x1a3   : > { %v1851_v44 = vmul.f32 %v3530_v22, %v1849_v42  ;;  %v1852_v31 = vmul.f32 %v3541_v57, %v1849_v42  ;;  %v1871_v17 = vmul.f32 %v3519_v6, %v1870_v25  ;;  %v1872_v15 = vmul.f32 %v3522_v45, %v1870_v25 }
 0x1a4   : > { %v1150_v18 = vpop.permute.xlu1 %1149  ;;  %v1169_v16 = vpop.permute.xlu0 %1168 }
 0x1a5   : > { %v1154_v32 = vadd.f32 %v1150_v18, %v1133_v1  ;;  %v1174_v60 = vadd.f32 %v1169_v16, %v1153_v26  ;;  %v1850_v26 = vmul.f32 %v3514_v49, %v1849_v42  ;;  %v1823_v1 = vmul.f32 %v3530_v22, %v1821_v7 }
 0x1a6   : > { %1730 = vrot.lane.b32.xlu1 %v1727_v54, %s2377_s25  ;;  %1749 = vrot.lane.b32.xlu0 %v1746_v8, %s2377_s25  ;;  %v1857_v61 = vrot.slane %v1851_v44, 1  ;;  %v1891_v54 = vstv %s3564_s13  ;;  %v1859_v21 = vrot.slane %v1852_v31, 1  ;;  %v1878_v19 = vrot.slane %v1872_v15, 1 }
 0x1a7   : > { %v1856_v0 = vrot.slane %v1850_v26, 1  ;;  %v1894_v36 = vmul.f32 %v3541_v57, %v1891_v54 }
 0x1a8   : > { %v1171_v11 = vpop.permute.xlu1 %1170  ;;  %v1190_v30 = vpop.permute.xlu0 %1189  ;;  %v1860_v3 = vsel %vm218_vm3, %v1857_v61, %v1859_v21 }
 0x1a9   : > { %v1175_v28 = vadd.f32 %v1171_v11, %v1154_v32  ;;  %v1195_v2 = vadd.f32 %v1190_v30, %v1174_v60  ;;  %v3584_v32 = vld [vmem:[#allocation2 + $0x28] sm:$0x3f]  ;;  %v1893_v11 = vmul.f32 %v3530_v22, %v1891_v54  ;;  %v1912_v30 = vstv %s3570_s14 }
 0x1aa   : > { %1751 = vrot.lane.b32.xlu1 %v1748_v27, %s2377_s25  ;;  %1770 = vrot.lane.b32.xlu0 %v1767_v38, %s2377_s25  ;;  %v1873_v60 = vmul.f32 %v3584_v32, %v1870_v25  ;;  %v1877_v27 = vrot.slane %v1871_v17, 1  ;;  %v1858_v23 = vsel %vm218_vm3, %v1856_v0, %v1857_v61  ;;  %v1901_v4 = vrot.slane %v1894_v36, 2 }
 0x1ac   : > { %v1192_v56 = vpop.permute.xlu1 %1191  ;;  %v1211_v47 = vpop.permute.xlu0 %1210 }
 0x1ad   : > { %v1196_v34 = vadd.f32 %v1192_v56, %v1175_v28  ;;  %v1216_v37 = vadd.f32 %v1211_v47, %v1195_v2  ;;  %v1892_v28 = vmul.f32 %v3514_v49, %v1891_v54  ;;  %v1880_v2 = vrot.slane %v1873_v60, 1 }
 0x1ae   : > { %1772 = vrot.lane.b32.xlu1 %v1769_v39, %s2377_s25  ;;  %1791 = vrot.lane.b32.xlu0 %v1788_v10, %s2377_s25  ;;  %v1899_v56 = vrot.slane %v1893_v11, 2  ;;  %v1913_v47 = vmul.f32 %v3519_v6, %v1912_v30  ;;  %v1914_v39 = vmul.f32 %v3522_v45, %v1912_v30  ;;  %v1996_v11 = vstv %s3613_s19 }
 0x1af   : > { %v1881_v13 = vsel %vm218_vm3, %v1878_v19, %v1880_v2 }
 0x1b0   : > { %v1213_v29 = vpop.permute.xlu1 %1212  ;;  %v1232_v41 = vpop.permute.xlu0 %1231 }
 0x1b1   : > { %v1217_v9 = vadd.f32 %v1213_v29, %v1196_v34  ;;  %v1237_v20 = vadd.f32 %v1232_v41, %v1216_v37  ;;  %v1879_v34 = vsel %vm218_vm3, %v1877_v27, %v1878_v19  ;;  %v1898_v37 = vrot.slane %v1892_v28, 2 }
 0x1b2   : > { %1793 = vrot.lane.b32.xlu1 %v1790_v50, %s2377_s25  ;;  %1812 = vrot.lane.b32.xlu0 %v1809_v55, %s2377_s25  ;;  %v1915_v29 = vmul.f32 %v3584_v32, %v1912_v30  ;;  %v1933_v50 = vstv %s3590_s16 }
 0x1b3   : > { %v1900_v7 = vsel %vm253_vm4, %v1898_v37, %v1899_v56  ;;  %v1934_v43 = vmul.f32 %v3514_v49, %v1933_v50  ;;  %v1936_v44 = vmul.f32 %v3541_v57, %v1933_v50 }
 0x1b4   : > { %v1234_v14 = vpop.permute.xlu1 %1233  ;;  %v1253_v63 = vpop.permute.xlu0 %1252 }
 0x1b5   : > { %v1238_v53 = vadd.f32 %v1234_v14, %v1217_v9  ;;  %v1258_v46 = vadd.f32 %v1253_v63, %v1237_v20  ;;  %v1919_v9 = vrot.slane %v1913_v47, 2  ;;  %v1920_v20 = vrot.slane %v1914_v39, 2 }
 0x1b6   : > { %1814 = vrot.lane.b32.xlu1 %v1811_v58, %s2377_s25  ;;  %1826 = vrot.lane.b32.xlu0 %v1822_v5, %s2378_s15  ;;  %v1935_v63 = vmul.f32 %v3530_v22, %v1933_v50  ;;  %v1954_v58 = vstv %s3593_s17  ;;  %v1922_v5 = vrot.slane %v1915_v29, 2  ;;  %v1940_v31 = vrot.slane %v1934_v43, 3 }
 0x1b7   : > { %v1955_v25 = vmul.f32 %v3519_v6, %v1954_v58  ;;  %v1956_v26 = vmul.f32 %v3522_v45, %v1954_v58  ;;  %v1957_v17 = vmul.f32 %v3584_v32, %v1954_v58  ;;  %v1943_v15 = vrot.slane %v1936_v44, 3 }
 0x1b8   : > { %v1255_v35 = vpop.permute.xlu1 %1254  ;;  %v1267_v24 = vpop.permute.xlu0 %1266  ;;  %v2038_v29 = vstv %s3627_s21 }
 0x1b9   : > { %v1259_v18 = vadd.f32 %v1255_v35, %v1238_v53  ;;  %v1272_v16 = vadd.f32 %v1267_v24, %v1258_v46  ;;  %v1902_v46 = vsel %vm253_vm4, %v1899_v56, %v1901_v4  ;;  %v1962_v0 = vrot.slane %v1956_v26, 3 }
 0x1ba   : > { %1828 = vrot.lane.b32.xlu1 %v1823_v1, %s2378_s15  ;;  %1840 = vrot.lane.b32.xlu0 %v1836_v48, %s2378_s15  ;;  %v1921_v1 = vsel %vm253_vm4, %v1919_v9, %v1920_v20  ;;  %v1941_v48 = vrot.slane %v1935_v63, 3  ;;  %v1964_v30 = vrot.slane %v1957_v17, 3  ;;  %v1998_v56 = vmul.f32 %v3522_v45, %v1996_v11 }
 0x1bb   : > { %v2040_v43 = vmul.f32 %v3522_v45, %v2038_v29 }
 0x1bc   : > { %v1269_v8 = vpop.permute.xlu1 %1268  ;;  %v1281_v59 = vpop.permute.xlu0 %1280  ;;  %v1942_v21 = vsel %vm288_vm5, %v1940_v31, %v1941_v48  ;;  %v1965_v39 = vsel %vm288_vm5, %v1962_v0, %v1964_v30  ;;  %v2004_v9 = vrot.slane %v1998_v56, 4 }
 0x1bd   : > { %v1273_v38 = vadd.f32 %v1269_v8, %v1259_v18  ;;  %v1286_v12 = vadd.f32 %v1281_v59, %v1272_v16  ;;  %v1975_v18 = vstv %s2284_s18  ;;  %v1923_v59 = vsel %vm253_vm4, %v1920_v20, %v1922_v5 }
 0x1be   : > { %1842 = vrot.lane.b32.xlu1 %v1837_v40, %s2378_s15  ;;  %1861 = vrot.lane.b32.xlu0 %v1858_v23, %s2378_s15  ;;  %v1961_v40 = vrot.slane %v1955_v25, 3  ;;  %v1977_v60 = vmul.f32 %v3530_v22, %v1975_v18  ;;  %v1976_v27 = vmul.f32 %v3514_v49, %v1975_v18  ;;  %v1944_v23 = vsel %vm288_vm5, %v1941_v48, %v1943_v15 }
 0x1bf   : > { %v1978_v2 = vmul.f32 %v3541_v57, %v1975_v18  ;;  %v2039_v5 = vmul.f32 %v3519_v6, %v2038_v29  ;;  %v2046_v17 = vrot.slane %v2040_v43, 5  ;;  %v2059_v18 = vstv %s2288_s22 }
 0x1c0   : > { %v1283_v52 = vpop.permute.xlu1 %1282  ;;  %v1302_v51 = vpop.permute.xlu0 %1301  ;;  %v1963_v19 = vsel %vm288_vm5, %v1961_v40, %v1962_v0  ;;  %v1983_v28 = vrot.slane %v1977_v60, 4  ;;  %v1982_v47 = vrot.slane %v1976_v27, 4  ;;  %v2061_v40 = vmul.f32 %v3530_v22, %v2059_v18 }
 0x1c1   : > { %v1287_v10 = vadd.f32 %v1283_v52, %v1273_v38  ;;  %v1307_v62 = vadd.f32 %v1302_v51, %v1286_v12  ;;  %v1997_v51 = vmul.f32 %v3519_v6, %v1996_v11  ;;  %v2045_v31 = vrot.slane %v2039_v5, 5 }
 0x1c2   : > { %1863 = vrot.lane.b32.xlu1 %v1860_v3, %s2378_s15  ;;  %1882 = vrot.lane.b32.xlu0 %v1879_v34, %s2378_s15  ;;  %v1984_v37 = vsel %vm323_vm6, %v1982_v47, %v1983_v28  ;;  %v2080_v0 = vstv %s3650_s23  ;;  %v2060_v60 = vmul.f32 %v3514_v49, %v2059_v18 }
 0x1c4   : > { %v1304_v41 = vpop.permute.xlu1 %1303  ;;  %v1323_v33 = vpop.permute.xlu0 %1322 }
 0x1c5   : > { %v1308_v55 = vadd.f32 %v1304_v41, %v1287_v10  ;;  %v1328_v14 = vadd.f32 %v1323_v33, %v1307_v62  ;;  %v1999_v10 = vmul.f32 %v3584_v32, %v1996_v11  ;;  %v2017_v62 = vstv %s3624_s20 }
 0x1c6   : > { %1884 = vrot.lane.b32.xlu1 %v1881_v13, %s2378_s15  ;;  %1903 = vrot.lane.b32.xlu0 %v1900_v7, %s2378_s15  ;;  %v1985_v13 = vrot.slane %v1978_v2, 4  ;;  %v2019_v4 = vmul.f32 %v3530_v22, %v2017_v62  ;;  %v2003_v7 = vrot.slane %v1997_v51, 4  ;;  %v2018_v50 = vmul.f32 %v3514_v49, %v2017_v62 }
 0x1c7   : > { %v2006_v20 = vrot.slane %v1999_v10, 4  ;;  %v2020_v58 = vmul.f32 %v3541_v57, %v2017_v62  ;;  %v2062_v11 = vmul.f32 %v3541_v57, %v2059_v18  ;;  %v2081_v22 = vmul.f32 %v3519_v6, %v2080_v0 }
 0x1c8   : > { %v1325_v42 = vpop.permute.xlu1 %1324  ;;  %v1344_v53 = vpop.permute.xlu0 %1343  ;;  %v1986_v63 = vsel %vm323_vm6, %v1983_v28, %v1985_v13  ;;  %v2025_v44 = vrot.slane %v2019_v4, 5  ;;  %v2024_v26 = vrot.slane %v2018_v50, 5  ;;  %v2066_v49 = vrot.slane %v2060_v60, 6 }
 0x1c9   : > { %v1329_v35 = vadd.f32 %v1325_v42, %v1308_v55  ;;  %v1349_v24 = vadd.f32 %v1344_v53, %v1328_v14  ;;  %v2007_v25 = vsel %vm323_vm6, %v2004_v9, %v2006_v20  ;;  %v2027_v48 = vrot.slane %v2020_v58, 5 }
 0x1ca   : > { %1905 = vrot.lane.b32.xlu1 %v1902_v46, %s2378_s15  ;;  %1924 = vrot.lane.b32.xlu0 %v1921_v1, %s2378_s15  ;;  %v2005_v46 = vsel %vm323_vm6, %v2003_v7, %v2004_v9  ;;  %v2026_v15 = vsel %vm358_vm7, %v2024_v26, %v2025_v44  ;;  %v2069_v2 = vrot.slane %v2062_v11, 6  ;;  %v2083_v51 = vmul.f32 %v3584_v32, %v2080_v0 }
 0x1cc   : > { %v1346_v16 = vpop.permute.xlu1 %1345  ;;  %v1365_v61 = vpop.permute.xlu0 %1364 }
 0x1cd   : > { %v1350_v54 = vadd.f32 %v1346_v16, %v1329_v35  ;;  %v1370_v8 = vadd.f32 %v1365_v61, %v1349_v24  ;;  %v2041_v35 = vmul.f32 %v3584_v32, %v2038_v29 }
 0x1ce   : > { %1926 = vrot.lane.b32.xlu1 %v1923_v59, %s2378_s15  ;;  %1945 = vrot.lane.b32.xlu0 %v1942_v21, %s2378_s15  ;;  %v2028_v59 = vsel %vm358_vm7, %v2025_v44, %v2027_v48  ;;  %v2047_v21 = vsel %vm358_vm7, %v2045_v31, %v2046_v17 }
 0x1cf   : > { %v2048_v27 = vrot.slane %v2041_v35, 5 }
 0x1d0   : > { %v1367_v38 = vpop.permute.xlu1 %1366  ;;  %v1386_v12 = vpop.permute.xlu0 %1385 }
 0x1d1   : > { %v1371_v36 = vadd.f32 %v1367_v38, %v1350_v54  ;;  %v1391_v52 = vadd.f32 %v1386_v12, %v1370_v8  ;;  %v2067_v38 = vrot.slane %v2061_v40, 6  ;;  %v2082_v12 = vmul.f32 %v3522_v45, %v2080_v0 }
 0x1d2   : > { %1947 = vrot.lane.b32.xlu1 %v1944_v23, %s2378_s15  ;;  %1966 = vrot.lane.b32.xlu0 %v1963_v19, %s2378_s15  ;;  %v2049_v28 = vsel %vm358_vm7, %v2046_v17, %v2048_v27 }
 0x1d3   : > { %v2088_v57 = vrot.slane %v2082_v12, 6  ;;  %v2070_v56 = vsel %vm393_vm8, %v2067_v38, %v2069_v2 }
 0x1d4   : > { %v1388_v3 = vpop.permute.xlu1 %1387  ;;  %v1407_v34 = vpop.permute.xlu0 %1406 }
 0x1d5   : > { %v1392_v41 = vadd.f32 %v1388_v3, %v1371_v36  ;;  %v1412_v33 = vadd.f32 %v1407_v34, %v1391_v52  ;;  %v2068_v36 = vsel %vm393_vm8, %v2066_v49, %v2067_v38  ;;  %v2087_v52 = vrot.slane %v2081_v22, 6 }
 0x1d6   : > { %1968 = vrot.lane.b32.xlu1 %v1965_v39, %s2378_s15  ;;  %1987 = vrot.lane.b32.xlu0 %v1984_v37, %s2378_s15  ;;  %v2090_v39 = vrot.slane %v2083_v51, 6 }
 0x1d7   : > { %v2089_v47 = vsel %vm393_vm8, %v2087_v52, %v2088_v57 }
 0x1d8   : > { %v1409_v55 = vpop.permute.xlu1 %1408  ;;  %v1428_v14 = vpop.permute.xlu0 %1427  ;;  %v2091_v3 = vsel %vm393_vm8, %v2088_v57, %v2090_v39 }
 0x1d9   : > { %v1413_v42 = vadd.f32 %v1409_v55, %v1392_v41  ;;  %v1433_v53 = vadd.f32 %v1428_v14, %v1412_v33 }
 0x1da   : > { %1989 = vrot.lane.b32.xlu1 %v1986_v63, %s2378_s15  ;;  %2008 = vrot.lane.b32.xlu0 %v2005_v46, %s2378_s15 }
 0x1dc   : > { %v1430_v24 = vpop.permute.xlu1 %1429  ;;  %v1449_v1 = vpop.permute.xlu0 %1448 }
 0x1dd   : > { %v1434_v16 = vadd.f32 %v1430_v24, %v1413_v42  ;;  %v3662_v61 = vadd.f32 %v1449_v1, %v1433_v53 }
 0x1de   : > { %2010 = vrot.lane.b32.xlu1 %v2007_v25, %s2378_s15  ;;  %2029 = vrot.lane.b32.xlu0 %v2026_v15, %s2378_s15 }
 0x1e0   : > { %v1451_v54 = vpop.permute.xlu1 %1450  ;;  %v1470_v8 = vpop.permute.xlu0 %1469 }
 0x1e1   : > { %v1455_v30 = vadd.f32 %v1451_v54, %v1434_v16  ;;  %v1475_v35 = vadd.f32 %v1470_v8, %v3662_v61 }
 0x1e2   : > { %2031 = vrot.lane.b32.xlu1 %v2028_v59, %s2378_s15  ;;  %2050 = vrot.lane.b32.xlu0 %v2047_v21, %s2378_s15 }
 0x1e4   : > { %v1472_v23 = vpop.permute.xlu1 %1471  ;;  %v1491_v19 = vpop.permute.xlu0 %1490 }
 0x1e5   : > { %v1496_v48 = vadd.f32 %v1491_v19, %v1475_v35  ;;  %v1476_v31 = vadd.f32 %v1472_v23, %v1455_v30 }
 0x1e6   : > { %2052 = vrot.lane.b32.xlu1 %v2049_v28, %s2378_s15  ;;  %2071 = vrot.lane.b32.xlu0 %v2068_v36, %s2378_s15 }
 0x1e8   : > { %v1493_v6 = vpop.permute.xlu1 %1492  ;;  %v1512_v45 = vpop.permute.xlu0 %1511 }
 0x1e9   : > { %v1517_v17 = vadd.f32 %v1512_v45, %v1496_v48  ;;  %v1497_v15 = vadd.f32 %v1493_v6, %v1476_v31 }
 0x1ea   : > { %2073 = vrot.lane.b32.xlu1 %v2070_v56, %s2378_s15  ;;  %2092 = vrot.lane.b32.xlu0 %v2089_v47, %s2378_s15 }
 0x1ec   : > { %v1514_v10 = vpop.permute.xlu1 %1513  ;;  %v1533_v62 = vpop.permute.xlu0 %1532 }
 0x1ed   : > { %v1538_v40 = vadd.f32 %v1533_v62, %v1517_v17  ;;  %v1518_v0 = vadd.f32 %v1514_v10, %v1497_v15 }
 0x1ee   : > { %2094 = vrot.lane.b32.xlu1 %v2091_v3, %s2378_s15 }
 0x1f0   : > { %v1535_v32 = vpop.permute.xlu1 %1534  ;;  %v1547_v34 = vpop.permute.xlu0 %1546 }
 0x1f1   : > { %v1552_v60 = vadd.f32 %v1547_v34, %v1538_v40  ;;  %v1539_v21 = vadd.f32 %v1535_v32, %v1518_v0 }
 0x1f4   : > { %v1549_v37 = vpop.permute.xlu1 %1548  ;;  %v1561_v13 = vpop.permute.xlu0 %1560 }
 0x1f5   : > { %v1566_v27 = vadd.f32 %v1561_v13, %v1552_v60  ;;  %v1553_v11 = vadd.f32 %v1549_v37, %v1539_v21 }
 0x1f8   : > { %v1563_v4 = vpop.permute.xlu1 %1562  ;;  %v1582_v29 = vpop.permute.xlu0 %1581 }
 0x1f9   : > { %v1587_v38 = vadd.f32 %v1582_v29, %v1566_v27  ;;  %v1567_v61 = vadd.f32 %v1563_v4, %v1553_v11 }
 0x1fc   : > { %v1584_v41 = vpop.permute.xlu1 %1583  ;;  %v1603_v33 = vpop.permute.xlu0 %1602 }
 0x1fd   : > { %v1608_v8 = vadd.f32 %v1603_v33, %v1587_v38  ;;  %v1588_v49 = vadd.f32 %v1584_v41, %v1567_v61 }
 0x200   : > { %v1605_v7 = vpop.permute.xlu1 %1604  ;;  %v1624_v9 = vpop.permute.xlu0 %1623 }
 0x201   : > { %v1629_v19 = vadd.f32 %v1624_v9, %v1608_v8  ;;  %v1609_v28 = vadd.f32 %v1605_v7, %v1588_v49 }
 0x204   : > { %v1626_v20 = vpop.permute.xlu1 %1625  ;;  %v1645_v50 = vpop.permute.xlu0 %1644 }
 0x205   : > { %v1650_v2 = vadd.f32 %v1645_v50, %v1629_v19  ;;  %v1630_v36 = vadd.f32 %v1626_v20, %v1609_v28 }
 0x208   : > { %v1647_v55 = vpop.permute.xlu1 %1646  ;;  %v1666_v14 = vpop.permute.xlu0 %1665 }
 0x209   : > { %v1671_v52 = vadd.f32 %v1666_v14, %v1650_v2  ;;  %v1651_v6 = vadd.f32 %v1647_v55, %v1630_v36 }
 0x20c   : > { %v1668_v63 = vpop.permute.xlu1 %1667  ;;  %v1687_v58 = vpop.permute.xlu0 %1686 }
 0x20d   : > { %v1692_v45 = vadd.f32 %v1687_v58, %v1671_v52  ;;  %v1672_v56 = vadd.f32 %v1668_v63, %v1651_v6 }
 0x210   : > { %v1689_v5 = vpop.permute.xlu1 %1688  ;;  %v1708_v43 = vpop.permute.xlu0 %1707 }
 0x211   : > { %v1713_v47 = vadd.f32 %v1708_v43, %v1692_v45  ;;  %v1693_v62 = vadd.f32 %v1689_v5, %v1672_v56 }
 0x214   : > { %v1710_v42 = vpop.permute.xlu1 %1709  ;;  %v1729_v53 = vpop.permute.xlu0 %1728 }
 0x215   : > { %v1734_v3 = vadd.f32 %v1729_v53, %v1713_v47  ;;  %v1714_v32 = vadd.f32 %v1710_v42, %v1693_v62 }
 0x218   : > { %v1731_v46 = vpop.permute.xlu1 %1730  ;;  %v1750_v44 = vpop.permute.xlu0 %1749 }
 0x219   : > { %v1755_v34 = vadd.f32 %v1750_v44, %v1734_v3  ;;  %v1735_v4 = vadd.f32 %v1731_v46, %v1714_v32 }
 0x21c   : > { %v1752_v25 = vpop.permute.xlu1 %1751  ;;  %v1771_v26 = vpop.permute.xlu0 %1770 }
 0x21d   : > { %v1776_v29 = vadd.f32 %v1771_v26, %v1755_v34  ;;  %v1756_v41 = vadd.f32 %v1752_v25, %v1735_v4 }
 0x220   : > { %v1773_v24 = vpop.permute.xlu1 %1772  ;;  %v1792_v1 = vpop.permute.xlu0 %1791 }
 0x221   : > { %v1797_v33 = vadd.f32 %v1792_v1, %v1776_v29  ;;  %v1777_v20 = vadd.f32 %v1773_v24, %v1756_v41 }
 0x224   : > { %v1794_v18 = vpop.permute.xlu1 %1793  ;;  %v1813_v16 = vpop.permute.xlu0 %1812 }
 0x225   : > { %v1818_v50 = vadd.f32 %v1813_v16, %v1797_v33  ;;  %v1798_v55 = vadd.f32 %v1794_v18, %v1777_v20 }
 0x228   : > { %v1815_v54 = vpop.permute.xlu1 %1814  ;;  %v1827_v59 = vpop.permute.xlu0 %1826 }
 0x229   : > { %v1832_v14 = vadd.f32 %v1827_v59, %v1818_v50  ;;  %v1819_v43 = vadd.f32 %v1815_v54, %v1798_v55 }
 0x22c   : > { %v1829_v22 = vpop.permute.xlu1 %1828  ;;  %v1841_v12 = vpop.permute.xlu0 %1840 }
 0x22d   : > { %v1846_v35 = vadd.f32 %v1841_v12, %v1832_v14  ;;  %v1833_v5 = vadd.f32 %v1829_v22, %v1819_v43 }
 0x230   : > { %v1843_v30 = vpop.permute.xlu1 %1842  ;;  %v1862_v23 = vpop.permute.xlu0 %1861 }
 0x231   : > { %v1867_v53 = vadd.f32 %v1862_v23, %v1846_v35  ;;  %v1847_v48 = vadd.f32 %v1843_v30, %v1833_v5 }
 0x234   : > { %v1864_v57 = vpop.permute.xlu1 %1863  ;;  %v1883_v51 = vpop.permute.xlu0 %1882 }
 0x235   : > { %v1888_v31 = vadd.f32 %v1883_v51, %v1867_v53  ;;  %v1868_v46 = vadd.f32 %v1864_v57, %v1847_v48 }
 0x238   : > { %v1885_v39 = vpop.permute.xlu1 %1884  ;;  %v1904_v10 = vpop.permute.xlu0 %1903 }
 0x239   : > { %v1909_v26 = vadd.f32 %v1904_v10, %v1888_v31  ;;  %v1889_v17 = vadd.f32 %v1885_v39, %v1868_v46 }
 0x23c   : > { %v1906_v37 = vpop.permute.xlu1 %1905  ;;  %v1925_v13 = vpop.permute.xlu0 %1924 }
 0x23d   : > { %v1930_v15 = vadd.f32 %v1925_v13, %v1909_v26  ;;  %v1910_v24 = vadd.f32 %v1906_v37, %v1889_v17 }
 0x240   : > { %v1927_v7 = vpop.permute.xlu1 %1926  ;;  %v1946_v9 = vpop.permute.xlu0 %1945 }
 0x241   : > { %v1951_v16 = vadd.f32 %v1946_v9, %v1930_v15  ;;  %v1931_v0 = vadd.f32 %v1927_v7, %v1910_v24 }
 0x244   : > { %v1948_v63 = vpop.permute.xlu1 %1947  ;;  %v1967_v58 = vpop.permute.xlu0 %1966 }
 0x245   : > { %v1972_v60 = vadd.f32 %v1967_v58, %v1951_v16  ;;  %v1952_v54 = vadd.f32 %v1948_v63, %v1931_v0 }
 0x248   : > { %v1969_v42 = vpop.permute.xlu1 %1968  ;;  %v1988_v44 = vpop.permute.xlu0 %1987 }
 0x249   : > { %v1993_v59 = vadd.f32 %v1988_v44, %v1972_v60  ;;  %v1973_v11 = vadd.f32 %v1969_v42, %v1952_v54 }
 0x24c   : > { %v1990_v25 = vpop.permute.xlu1 %1989  ;;  %v2009_v1 = vpop.permute.xlu0 %2008 }
 0x24d   : > { %v2014_v38 = vadd.f32 %v2009_v1, %v1993_v59  ;;  %v1994_v22 = vadd.f32 %v1990_v25, %v1973_v11 }
 0x250   : > { %v2011_v18 = vpop.permute.xlu1 %2010  ;;  %v2030_v40 = vpop.permute.xlu0 %2029 }
 0x251   : > { %v2035_v12 = vadd.f32 %v2030_v40, %v2014_v38  ;;  %v2015_v49 = vadd.f32 %v2011_v18, %v1994_v22 }
 0x254   : > { %v2032_v21 = vpop.permute.xlu1 %2031  ;;  %v2051_v27 = vpop.permute.xlu0 %2050 }
 0x255   : > { %v2056_v19 = vadd.f32 %v2051_v27, %v2035_v12  ;;  %v2036_v30 = vadd.f32 %v2032_v21, %v2015_v49 }
 0x258   : > { %v2053_v61 = vpop.permute.xlu1 %2052  ;;  %v2072_v8 = vpop.permute.xlu0 %2071 }
 0x259   : > { %v2077_v23 = vadd.f32 %v2072_v8, %v2056_v19  ;;  %v2057_v36 = vadd.f32 %v2053_v61, %v2036_v30 }
 0x25c   : > { %v2074_v28 = vpop.permute.xlu1 %2073  ;;  %v2093_v2 = vpop.permute.xlu0 %2092 }
 0x25d   : > { %v2098_v52 = vadd.f32 %v2093_v2, %v2077_v23  ;;  %v2078_v57 = vadd.f32 %v2074_v28, %v2057_v36 }
 0x25f   : > { %v2290_v51 = vmul.f32 -1.442695, %v2098_v52 }
 0x260   : > { %v2095_v6 = vpop.permute.xlu1 %2094 }
 0x261   : > { %2323 = vpow2.f32 %v2290_v51  ;;  %v2099_v45 = vadd.f32 %v2095_v6, %v2078_v57 }
 0x263   : > { %v2291_v56 = vmul.f32 -1.442695, %v2099_v45 }
 0x265   : > { %2325 = vpow2.f32 %v2291_v56 }
 0x26e   : > { %v2324_v47 = vpop.eup %2323 }
 0x26f   : > { %v2106_v39 = vadd.f32 1.0, %v2324_v47 }
 0x271   : > { %2327 = vrcp.f32 %v2106_v39 }
 0x272   : > { %v2326_v10 = vpop.eup %2325 }
 0x273   : > { %v2107_v62 = vadd.f32 1.0, %v2326_v10 }
 0x275   : > { %2329 = vrcp.f32 %v2107_v62 }
 0x27e   : > { %v2328_v3 = vpop.eup %2327 }
 0x27f   : > { %2113 = vst.msk [vmem:[%s157_s28] sm:$0xff] %vm2112_vm9, %v2328_v3 }
 0x282   : > { %v2330_v32 = vpop.eup %2329 }
 0x283   : > { %2114 = vst.msk [vmem:[%s157_s28 + $0x8] sm:$0xff] %vm2112_vm9, %v2330_v32 }
 0x284 PF: > { %s13_s9 = sadd.s32 1, %s2368_s9  }
 0x285   : > { %p10_p1 = scmp.ge.s32.totalorder %s13_s9, 4  }
 0x287   :  { %12 = sbr.rel (!%p10_p1) target bundleno = 1 (0x1), region = 64 }
 0x28c   :  { %2136 = vsyncpa [#allocation4], 1 }
 0x28d   :  { %2138 = vsyncpa [#allocation4 + $0x1], 1 }

</bundles_post_ra>
